<compile_context>
chip_gen: v7x
topology: tpu7x:2x2x1
jax: 0.10.0
libtpu: 0.0.40
codegen_flags: <defaults>
</compile_context>

<pallas_src>
import functools

import jax
import jax.numpy as jnp
from jax.experimental import pallas as pl
from jax.experimental.pallas import tpu as pltpu


# ------------------------------ Fused kernel ------------------------------- #

def _mann_lstm_kernel(x_ref, wih0_ref, wih_ref, whh_ref, b_ref, wfc_ref,
                      bfc_ref, out_ref, hseq_scr, gpre_scr, *, T, B):
    """Whole model: 5 stacked LSTM layers + FC head, layer-major.

    x_ref    : (T*B, D_in)   flattened time-major input (row = t*B + b)
    wih0_ref : (D_in, 4H)    layer-0 W_ih^T, gate columns ordered [i|f|o|g]
    wih_ref  : (L-1, H, 4H)  layers 1..L-1 W_ih^T, [i|f|o|g]
    whh_ref  : (L, H, 4H)    per-layer W_hh^T, [i|f|o|g]
    b_ref    : (L, 1, 4H)    per-layer b_ih + b_hh, [i|f|o|g]
    wfc_ref  : (H, O), bfc_ref: (1, O)
    out_ref  : (T*B, O)
    hseq_scr : (T*B, H)      current layer's hidden outputs for all timesteps
    gpre_scr : (T*B, 4H)     batched input projection (+bias) for current layer
    """
    L, H, _ = whh_ref.shape

    def run_layer(layer):
        whh = whh_ref[layer]                     # (H,4H) load hoisted out of t-loop

        def step(t, carry):
            h, c = carry                         # (B,H) vreg-resident carries
            row = pl.multiple_of(t * B, B)
            gates = gpre_scr[pl.ds(row, B), :] + jnp.dot(
                h, whh, preferred_element_type=jnp.float32)
            # Gate columns pre-ordered [i | f | o | g]:
            sg = jax.nn.sigmoid(gates[:, 0:3 * H])      # one 3H-lane EUP pass
            g = jnp.tanh(gates[:, 3 * H:4 * H])         # one H-lane EUP pass
            i = sg[:, 0 * H:1 * H]
            f = sg[:, 1 * H:2 * H]
            o = sg[:, 2 * H:3 * H]
            c_new = f * c + i * g
            h_new = o * jnp.tanh(c_new)
            hseq_scr[pl.ds(row, B), :] = h_new          # off the serial chain
            return (h_new, c_new)

        zeros = jnp.zeros((B, H), jnp.float32)
        # TODO(synk): at larger T switch unroll=True -> unroll=2/4 to bound
        # compile time and vreg live ranges.
        jax.lax.fori_loop(0, T, step, (zeros, zeros), unroll=True)

    # ---- layer 0: batched input projection for all T*B rows (bias folded) ----
    gpre_scr[...] = jnp.dot(x_ref[...], wih0_ref[...],
                            preferred_element_type=jnp.float32) + b_ref[0]
    run_layer(0)

    # ---- layers 1..L-1: projection consumes previous layer's full h-sequence ----
    for layer in range(1, L):
        gpre_scr[...] = jnp.dot(hseq_scr[...], wih_ref[layer - 1],
                                preferred_element_type=jnp.float32) + b_ref[layer]
        run_layer(layer)

    # ---- FC head: one (T*B, H) @ (H, O) matmul + single contiguous store ----
    y = jnp.dot(hseq_scr[...], wfc_ref[...],
                preferred_element_type=jnp.float32) + bfc_ref[...]
    out_ref[...] = y.astype(out_ref.dtype)


# ---------------------------- Parameter prep ------------------------------- #

def init_params(key, input_size, hidden_size, output_size, num_layers):
    """PyTorch-style uniform(-1/sqrt(H), 1/sqrt(H)) init (deterministic)."""
    params = {}
    stdv = 1.0 / jnp.sqrt(jnp.float32(hidden_size))
    for l in range(num_layers):
        d_in = input_size if l == 0 else hidden_size
        key, k1, k2, k3, k4 = jax.random.split(key, 5)
        params[f"w_ih_{l}"] = jax.random.uniform(
            k1, (4 * hidden_size, d_in), jnp.float32, -stdv, stdv)
        params[f"w_hh_{l}"] = jax.random.uniform(
            k2, (4 * hidden_size, hidden_size), jnp.float32, -stdv, stdv)
        params[f"b_ih_{l}"] = jax.random.uniform(
            k3, (4 * hidden_size,), jnp.float32, -stdv, stdv)
        params[f"b_hh_{l}"] = jax.random.uniform(
            k4, (4 * hidden_size,), jnp.float32, -stdv, stdv)
    key, k1, k2 = jax.random.split(key, 3)
    params["w_fc"] = jax.random.uniform(
        k1, (output_size, hidden_size), jnp.float32, -stdv, stdv)
    params["b_fc"] = jax.random.uniform(
        k2, (output_size,), jnp.float32, -stdv, stdv)
    return params


def _reorder_gates(w):
    """Permute the 4H gate axis (axis 0) from PyTorch [i,f,g,o] to [i,f,o,g]."""
    i, f, g, o = jnp.split(w, 4, axis=0)
    return jnp.concatenate([i, f, o, g], axis=0)


def prepare_params(params, num_layers):
    """One-time transpose / gate-reorder / bias-combine (hoisted out of fwd)."""
    wih0 = _reorder_gates(params["w_ih_0"]).T                       # (D, 4H)
    wih = jnp.stack([_reorder_gates(params[f"w_ih_{l}"]).T
                     for l in range(1, num_layers)], axis=0)        # (L-1, H, 4H)
    whh = jnp.stack([_reorder_gates(params[f"w_hh_{l}"]).T
                     for l in range(num_layers)], axis=0)           # (L, H, 4H)
    bias = jnp.stack([
        _reorder_gates(params[f"b_ih_{l}"] + params[f"b_hh_{l}"]).reshape(1, -1)
        for l in range(num_layers)], axis=0)                        # (L, 1, 4H)
    wfc = params["w_fc"].T                                          # (H, O)
    bfc = params["b_fc"].reshape(1, -1)                             # (1, O)
    return {"wih0": wih0, "wih": wih, "whh": whh, "b": bias,
            "wfc": wfc, "bfc": bfc}


# ------------------------------ Forward pass ------------------------------- #

def mann_lstm_forward(x, prepped):
    """x: (B, T, input_size) batch-first, like the PyTorch module."""
    B, T, D = x.shape
    wih0, wih, whh = prepped["wih0"], prepped["wih"], prepped["whh"]
    bias, wfc, bfc = prepped["b"], prepped["wfc"], prepped["bfc"]
    L, H, _ = whh.shape
    O = wfc.shape[1]

    # Row index = t*B + b (time-major, flattened for batched projections).
    x_flat = jnp.transpose(x, (1, 0, 2)).reshape(T * B, D)

    kernel = functools.partial(_mann_lstm_kernel, T=T, B=B)

    out_flat = pl.pallas_call(
        kernel,
        out_shape=jax.ShapeDtypeStruct((T * B, O), x.dtype),
        grid=(1,),
        in_specs=[
            pl.BlockSpec((T * B, D), lambda i: (0, 0)),     # x (resident)
            pl.BlockSpec(wih0.shape, lambda i: (0, 0)),     # layer-0 W_ih^T
            pl.BlockSpec(wih.shape, lambda i: (0, 0, 0)),   # layers 1.. W_ih^T
            pl.BlockSpec(whh.shape, lambda i: (0, 0, 0)),   # W_hh^T per layer
            pl.BlockSpec(bias.shape, lambda i: (0, 0, 0)),  # biases
            pl.BlockSpec(wfc.shape, lambda i: (0, 0)),      # FC weight
            pl.BlockSpec(bfc.shape, lambda i: (0, 0)),      # FC bias
        ],
        out_specs=pl.BlockSpec((T * B, O), lambda i: (0, 0)),
        scratch_shapes=[
            pltpu.VMEM((T * B, H), jnp.float32),            # h-sequence (per layer)
            pltpu.VMEM((T * B, 4 * H), jnp.float32),        # batched gate precompute
        ],
        compiler_params=pltpu.CompilerParams(
            dimension_semantics=("arbitrary",)),
    )(x_flat, wih0, wih, whh, bias, wfc, bfc)

    return out_flat.reshape(T, B, O).transpose(1, 0, 2)     # (B, T, O)


# ---------------------------- Pure-JAX reference ---------------------------- #

def mann_lstm_reference(x, params, num_layers):
    B, T, _ = x.shape
    h_seq = x
    for l in range(num_layers):
        w_ih, w_hh = params[f"w_ih_{l}"], params[f"w_hh_{l}"]
        b = params[f"b_ih_{l}"] + params[f"b_hh_{l}"]
        H = w_hh.shape[1]

        def step(carry, xt, w_ih=w_ih, w_hh=w_hh, b=b):
            hp, cp = carry
            gates = xt @ w_ih.T + hp @ w_hh.T + b
            i, f, g, o = jnp.split(gates, 4, axis=-1)
            i, f, o = jax.nn.sigmoid(i), jax.nn.sigmoid(f), jax.nn.sigmoid(o)
            g = jnp.tanh(g)
            c = f * cp + i * g
            h = o * jnp.tanh(c)
            return (h, c), h

        init = (jnp.zeros((B, H), jnp.float32), jnp.zeros((B, H), jnp.float32))
        _, hs = jax.lax.scan(step, init, jnp.transpose(h_seq, (1, 0, 2)))
        h_seq = jnp.transpose(hs, (1, 0, 2))
    return h_seq @ params["w_fc"].T + params["b_fc"]


# ----------------------------------- Main ----------------------------------- #

if __name__ == "__main__":
    batch, seq = 2, 8
    input_size, hidden_size, output_size, num_layers = 16, 32, 8, 5

    key = jax.random.PRNGKey(0)
    key, kx = jax.random.split(key)
    x = jax.random.normal(kx, (batch, seq, input_size), jnp.float32)

    params = init_params(key, input_size, hidden_size, output_size, num_layers)
    prepped = prepare_params(params, num_layers)

    y = mann_lstm_forward(x, prepped)
    y = jax.block_until_ready(y)

    y_ref = mann_lstm_reference(x, params, num_layers)
    assert y.shape == (batch, seq, output_size)
    assert jnp.allclose(y, y_ref, rtol=2e-3, atol=2e-3), "mismatch vs reference"

    print("KERNEL_OK")
</pallas_src>

<mosaic_0001>
module attributes {stable_mosaic.version = 11 : i64} {
  func.func @_mann_lstm_kernel(%arg0: i32, %arg1: memref<16x16xf32, #tpu.memory_space<vmem>>, %arg2: memref<16x128xf32, #tpu.memory_space<vmem>>, %arg3: memref<4x32x128xf32, #tpu.memory_space<vmem>>, %arg4: memref<5x32x128xf32, #tpu.memory_space<vmem>>, %arg5: memref<5x1x128xf32, #tpu.memory_space<vmem>>, %arg6: memref<32x8xf32, #tpu.memory_space<vmem>>, %arg7: memref<1x8xf32, #tpu.memory_space<vmem>>, %arg8: memref<16x8xf32, #tpu.memory_space<vmem>>, %arg9: memref<16x32xf32, #tpu.memory_space<vmem>>, %arg10: memref<16x128xf32, #tpu.memory_space<vmem>>) attributes {dimension_semantics = [#tpu.dimension_semantics<arbitrary>], iteration_bounds = array<i64: 1>, scalar_prefetch = 0 : i64, scratch_operands = 2 : i64, tpu.core_type = #tpu.core_type<tc>, window_params = [{pipeline_mode = #tpu.pipeline_mode<synchronous>, transform_indices = @transform_0, window_bounds = array<i64: 16, 16>}, {pipeline_mode = #tpu.pipeline_mode<synchronous>, transform_indices = @transform_1, window_bounds = array<i64: 16, 128>}, {pipeline_mode = #tpu.pipeline_mode<synchronous>, transform_indices = @transform_2, window_bounds = array<i64: 4, 32, 128>}, {pipeline_mode = #tpu.pipeline_mode<synchronous>, transform_indices = @transform_3, window_bounds = array<i64: 5, 32, 128>}, {pipeline_mode = #tpu.pipeline_mode<synchronous>, transform_indices = @transform_4, window_bounds = array<i64: 5, 1, 128>}, {pipeline_mode = #tpu.pipeline_mode<synchronous>, transform_indices = @transform_5, window_bounds = array<i64: 32, 8>}, {pipeline_mode = #tpu.pipeline_mode<synchronous>, transform_indices = @transform_6, window_bounds = array<i64: 1, 8>}, {pipeline_mode = #tpu.pipeline_mode<synchronous>, transform_indices = @transform_7, window_bounds = array<i64: 16, 8>}]} {
    %c0 = arith.constant 0 : index
    %c0_0 = arith.constant 0 : index
    %0 = vector.load %arg1[%c0, %c0_0] : memref<16x16xf32, #tpu.memory_space<vmem>>, vector<16x16xf32>
    %c0_1 = arith.constant 0 : index
    %c0_2 = arith.constant 0 : index
    %1 = vector.load %arg2[%c0_1, %c0_2] : memref<16x128xf32, #tpu.memory_space<vmem>>, vector<16x128xf32>
    %cst = arith.constant dense<0.000000e+00> : vector<16x128xf32>
    %2 = tpu.matmul %0, %1, %cst {dimension_numbers = #tpu.dot_dimension_numbers<[1], [0], [0], [1], [0, 0, 1, 1], [], []>} : vector<16x16xf32>, vector<16x128xf32>, vector<16x128xf32> -> vector<16x128xf32>
    %c0_3 = arith.constant 0 : index
    %c0_4 = arith.constant 0 : index
    %c0_5 = arith.constant 0 : index
    %3 = vector.load %arg5[%c0_3, %c0_4, %c0_5] : memref<5x1x128xf32, #tpu.memory_space<vmem>>, vector<1x1x128xf32>
    %4 = vector.shape_cast %3 : vector<1x1x128xf32> to vector<1x128xf32>
    %5 = vector.broadcast %4 : vector<1x128xf32> to vector<16x128xf32>
    %6 = arith.addf %2, %5 : vector<16x128xf32>
    %c0_6 = arith.constant 0 : index
    %c0_7 = arith.constant 0 : index
    %7 = vector.load %arg10[%c0_6, %c0_7] : memref<16x128xf32, #tpu.memory_space<vmem>>, vector<16x128xf32>
    tpu.vector_store %arg10[%c0_6, %c0_7], %6 {strides = array<i32>} : memref<16x128xf32, #tpu.memory_space<vmem>>, vector<16x128xf32>,
    %c0_8 = arith.constant 0 : index
    %c0_9 = arith.constant 0 : index
    %c0_10 = arith.constant 0 : index
    %8 = vector.load %arg4[%c0_8, %c0_9, %c0_10] : memref<5x32x128xf32, #tpu.memory_space<vmem>>, vector<1x32x128xf32>
    %9 = vector.shape_cast %8 : vector<1x32x128xf32> to vector<32x128xf32>
    %cst_11 = arith.constant 0.000000e+00 : f32
    %10 = vector.broadcast %cst_11 : f32 to vector<2x32xf32>
    %c0_i32 = arith.constant 0 : i32
    %c2_i32 = arith.constant 2 : i32
    %11 = arith.muli %c0_i32, %c2_i32 : i32
    %12 = tpu.assume_multiple %11, 2 : i32
    %13 = arith.index_cast %12 : i32 to index
    %c0_12 = arith.constant 0 : index
    %14 = vector.load %arg10[%13, %c0_12] : memref<16x128xf32, #tpu.memory_space<vmem>>, vector<2x128xf32>
    %cst_13 = arith.constant dense<0.000000e+00> : vector<2x128xf32>
    %15 = tpu.matmul %10, %9, %cst_13 {dimension_numbers = #tpu.dot_dimension_numbers<[1], [0], [0], [1], [0, 0, 1, 1], [], []>} : vector<2x32xf32>, vector<32x128xf32>, vector<2x128xf32> -> vector<2x128xf32>
    %16 = arith.addf %14, %15 : vector<2x128xf32>
    %17 = vector.extract_strided_slice %16 {offsets = [0, 0], sizes = [2, 96], strides = [1, 1]} : vector<2x128xf32> to vector<2x96xf32>
    %18 = arith.negf %17 : vector<2x96xf32>
    %19 = math.exp %18 : vector<2x96xf32>
    %cst_14 = arith.constant 1.000000e+00 : f32
    %20 = vector.broadcast %cst_14 : f32 to vector<2x96xf32>
    %21 = arith.addf %20, %19 : vector<2x96xf32>
    %22 = arith.divf %20, %21 : vector<2x96xf32>
    %23 = vector.extract_strided_slice %16 {offsets = [0, 96], sizes = [2, 32], strides = [1, 1]} : vector<2x128xf32> to vector<2x32xf32>
    %24 = math.tanh %23 : vector<2x32xf32>
    %25 = vector.extract_strided_slice %22 {offsets = [0, 0], sizes = [2, 32], strides = [1, 1]} : vector<2x96xf32> to vector<2x32xf32>
    %26 = vector.extract_strided_slice %22 {offsets = [0, 32], sizes = [2, 32], strides = [1, 1]} : vector<2x96xf32> to vector<2x32xf32>
    %27 = vector.extract_strided_slice %22 {offsets = [0, 64], sizes = [2, 32], strides = [1, 1]} : vector<2x96xf32> to vector<2x32xf32>
    %28 = arith.mulf %26, %10 : vector<2x32xf32>
    %29 = arith.mulf %25, %24 : vector<2x32xf32>
    %30 = arith.addf %28, %29 : vector<2x32xf32>
    %31 = math.tanh %30 : vector<2x32xf32>
    %32 = arith.mulf %27, %31 : vector<2x32xf32>
    %33 = arith.index_cast %12 : i32 to index
    %c0_15 = arith.constant 0 : index
    %34 = vector.load %arg9[%33, %c0_15] : memref<16x32xf32, #tpu.memory_space<vmem>>, vector<2x32xf32>
    tpu.vector_store %arg9[%33, %c0_15], %32 {strides = array<i32>} : memref<16x32xf32, #tpu.memory_space<vmem>>, vector<2x32xf32>,
    %c1_i32 = arith.constant 1 : i32
    %c2_i32_16 = arith.constant 2 : i32
    %35 = arith.muli %c1_i32, %c2_i32_16 : i32
    %36 = tpu.assume_multiple %35, 2 : i32
    %37 = arith.index_cast %36 : i32 to index
    %c0_17 = arith.constant 0 : index
    %38 = vector.load %arg10[%37, %c0_17] : memref<16x128xf32, #tpu.memory_space<vmem>>, vector<2x128xf32>
    %cst_18 = arith.constant dense<0.000000e+00> : vector<2x128xf32>
    %39 = tpu.matmul %32, %9, %cst_18 {dimension_numbers = #tpu.dot_dimension_numbers<[1], [0], [0], [1], [0, 0, 1, 1], [], []>} : vector<2x32xf32>, vector<32x128xf32>, vector<2x128xf32> -> vector<2x128xf32>
    %40 = arith.addf %38, %39 : vector<2x128xf32>
    %41 = vector.extract_strided_slice %40 {offsets = [0, 0], sizes = [2, 96], strides = [1, 1]} : vector<2x128xf32> to vector<2x96xf32>
    %42 = arith.negf %41 : vector<2x96xf32>
    %43 = math.exp %42 : vector<2x96xf32>
    %cst_19 = arith.constant 1.000000e+00 : f32
    %44 = vector.broadcast %cst_19 : f32 to vector<2x96xf32>
    %45 = arith.addf %44, %43 : vector<2x96xf32>
    %46 = arith.divf %44, %45 : vector<2x96xf32>
    %47 = vector.extract_strided_slice %40 {offsets = [0, 96], sizes = [2, 32], strides = [1, 1]} : vector<2x128xf32> to vector<2x32xf32>
    %48 = math.tanh %47 : vector<2x32xf32>
    %49 = vector.extract_strided_slice %46 {offsets = [0, 0], sizes = [2, 32], strides = [1, 1]} : vector<2x96xf32> to vector<2x32xf32>
    %50 = vector.extract_strided_slice %46 {offsets = [0, 32], sizes = [2, 32], strides = [1, 1]} : vector<2x96xf32> to vector<2x32xf32>
    %51 = vector.extract_strided_slice %46 {offsets = [0, 64], sizes = [2, 32], strides = [1, 1]} : vector<2x96xf32> to vector<2x32xf32>
    %52 = arith.mulf %50, %30 : vector<2x32xf32>
    %53 = arith.mulf %49, %48 : vector<2x32xf32>
    %54 = arith.addf %52, %53 : vector<2x32xf32>
    %55 = math.tanh %54 : vector<2x32xf32>
    %56 = arith.mulf %51, %55 : vector<2x32xf32>
    %57 = arith.index_cast %36 : i32 to index
    %c0_20 = arith.constant 0 : index
    %58 = vector.load %arg9[%57, %c0_20] : memref<16x32xf32, #tpu.memory_space<vmem>>, vector<2x32xf32>
    tpu.vector_store %arg9[%57, %c0_20], %56 {strides = array<i32>} : memref<16x32xf32, #tpu.memory_space<vmem>>, vector<2x32xf32>,
    %c2_i32_21 = arith.constant 2 : i32
    %c2_i32_22 = arith.constant 2 : i32
    %59 = arith.muli %c2_i32_21, %c2_i32_22 : i32
    %60 = tpu.assume_multiple %59, 2 : i32
    %61 = arith.index_cast %60 : i32 to index
    %c0_23 = arith.constant 0 : index
    %62 = vector.load %arg10[%61, %c0_23] : memref<16x128xf32, #tpu.memory_space<vmem>>, vector<2x128xf32>
    %cst_24 = arith.constant dense<0.000000e+00> : vector<2x128xf32>
    %63 = tpu.matmul %56, %9, %cst_24 {dimension_numbers = #tpu.dot_dimension_numbers<[1], [0], [0], [1], [0, 0, 1, 1], [], []>} : vector<2x32xf32>, vector<32x128xf32>, vector<2x128xf32> -> vector<2x128xf32>
    %64 = arith.addf %62, %63 : vector<2x128xf32>
    %65 = vector.extract_strided_slice %64 {offsets = [0, 0], sizes = [2, 96], strides = [1, 1]} : vector<2x128xf32> to vector<2x96xf32>
    %66 = arith.negf %65 : vector<2x96xf32>
    %67 = math.exp %66 : vector<2x96xf32>
    %cst_25 = arith.constant 1.000000e+00 : f32
    %68 = vector.broadcast %cst_25 : f32 to vector<2x96xf32>
    %69 = arith.addf %68, %67 : vector<2x96xf32>
    %70 = arith.divf %68, %69 : vector<2x96xf32>
    %71 = vector.extract_strided_slice %64 {offsets = [0, 96], sizes = [2, 32], strides = [1, 1]} : vector<2x128xf32> to vector<2x32xf32>
    %72 = math.tanh %71 : vector<2x32xf32>
    %73 = vector.extract_strided_slice %70 {offsets = [0, 0], sizes = [2, 32], strides = [1, 1]} : vector<2x96xf32> to vector<2x32xf32>
    %74 = vector.extract_strided_slice %70 {offsets = [0, 32], sizes = [2, 32], strides = [1, 1]} : vector<2x96xf32> to vector<2x32xf32>
    %75 = vector.extract_strided_slice %70 {offsets = [0, 64], sizes = [2, 32], strides = [1, 1]} : vector<2x96xf32> to vector<2x32xf32>
    %76 = arith.mulf %74, %54 : vector<2x32xf32>
    %77 = arith.mulf %73, %72 : vector<2x32xf32>
    %78 = arith.addf %76, %77 : vector<2x32xf32>
    %79 = math.tanh %78 : vector<2x32xf32>
    %80 = arith.mulf %75, %79 : vector<2x32xf32>
    %81 = arith.index_cast %60 : i32 to index
    %c0_26 = arith.constant 0 : index
    %82 = vector.load %arg9[%81, %c0_26] : memref<16x32xf32, #tpu.memory_space<vmem>>, vector<2x32xf32>
    tpu.vector_store %arg9[%81, %c0_26], %80 {strides = array<i32>} : memref<16x32xf32, #tpu.memory_space<vmem>>, vector<2x32xf32>,
    %c3_i32 = arith.constant 3 : i32
    %c2_i32_27 = arith.constant 2 : i32
    %83 = arith.muli %c3_i32, %c2_i32_27 : i32
    %84 = tpu.assume_multiple %83, 2 : i32
    %85 = arith.index_cast %84 : i32 to index
    %c0_28 = arith.constant 0 : index
    %86 = vector.load %arg10[%85, %c0_28] : memref<16x128xf32, #tpu.memory_space<vmem>>, vector<2x128xf32>
    %cst_29 = arith.constant dense<0.000000e+00> : vector<2x128xf32>
    %87 = tpu.matmul %80, %9, %cst_29 {dimension_numbers = #tpu.dot_dimension_numbers<[1], [0], [0], [1], [0, 0, 1, 1], [], []>} : vector<2x32xf32>, vector<32x128xf32>, vector<2x128xf32> -> vector<2x128xf32>
    %88 = arith.addf %86, %87 : vector<2x128xf32>
    %89 = vector.extract_strided_slice %88 {offsets = [0, 0], sizes = [2, 96], strides = [1, 1]} : vector<2x128xf32> to vector<2x96xf32>
    %90 = arith.negf %89 : vector<2x96xf32>
    %91 = math.exp %90 : vector<2x96xf32>
    %cst_30 = arith.constant 1.000000e+00 : f32
    %92 = vector.broadcast %cst_30 : f32 to vector<2x96xf32>
    %93 = arith.addf %92, %91 : vector<2x96xf32>
    %94 = arith.divf %92, %93 : vector<2x96xf32>
    %95 = vector.extract_strided_slice %88 {offsets = [0, 96], sizes = [2, 32], strides = [1, 1]} : vector<2x128xf32> to vector<2x32xf32>
    %96 = math.tanh %95 : vector<2x32xf32>
    %97 = vector.extract_strided_slice %94 {offsets = [0, 0], sizes = [2, 32], strides = [1, 1]} : vector<2x96xf32> to vector<2x32xf32>
    %98 = vector.extract_strided_slice %94 {offsets = [0, 32], sizes = [2, 32], strides = [1, 1]} : vector<2x96xf32> to vector<2x32xf32>
    %99 = vector.extract_strided_slice %94 {offsets = [0, 64], sizes = [2, 32], strides = [1, 1]} : vector<2x96xf32> to vector<2x32xf32>
    %100 = arith.mulf %98, %78 : vector<2x32xf32>
    %101 = arith.mulf %97, %96 : vector<2x32xf32>
    %102 = arith.addf %100, %101 : vector<2x32xf32>
    %103 = math.tanh %102 : vector<2x32xf32>
    %104 = arith.mulf %99, %103 : vector<2x32xf32>
    %105 = arith.index_cast %84 : i32 to index
    %c0_31 = arith.constant 0 : index
    %106 = vector.load %arg9[%105, %c0_31] : memref<16x32xf32, #tpu.memory_space<vmem>>, vector<2x32xf32>
    tpu.vector_store %arg9[%105, %c0_31], %104 {strides = array<i32>} : memref<16x32xf32, #tpu.memory_space<vmem>>, vector<2x32xf32>,
    %c4_i32 = arith.constant 4 : i32
    %c2_i32_32 = arith.constant 2 : i32
    %107 = arith.muli %c4_i32, %c2_i32_32 : i32
    %108 = tpu.assume_multiple %107, 2 : i32
    %109 = arith.index_cast %108 : i32 to index
    %c0_33 = arith.constant 0 : index
    %110 = vector.load %arg10[%109, %c0_33] : memref<16x128xf32, #tpu.memory_space<vmem>>, vector<2x128xf32>
    %cst_34 = arith.constant dense<0.000000e+00> : vector<2x128xf32>
    %111 = tpu.matmul %104, %9, %cst_34 {dimension_numbers = #tpu.dot_dimension_numbers<[1], [0], [0], [1], [0, 0, 1, 1], [], []>} : vector<2x32xf32>, vector<32x128xf32>, vector<2x128xf32> -> vector<2x128xf32>
    %112 = arith.addf %110, %111 : vector<2x128xf32>
    %113 = vector.extract_strided_slice %112 {offsets = [0, 0], sizes = [2, 96], strides = [1, 1]} : vector<2x128xf32> to vector<2x96xf32>
    %114 = arith.negf %113 : vector<2x96xf32>
    %115 = math.exp %114 : vector<2x96xf32>
    %cst_35 = arith.constant 1.000000e+00 : f32
    %116 = vector.broadcast %cst_35 : f32 to vector<2x96xf32>
    %117 = arith.addf %116, %115 : vector<2x96xf32>
    %118 = arith.divf %116, %117 : vector<2x96xf32>
    %119 = vector.extract_strided_slice %112 {offsets = [0, 96], sizes = [2, 32], strides = [1, 1]} : vector<2x128xf32> to vector<2x32xf32>
    %120 = math.tanh %119 : vector<2x32xf32>
    %121 = vector.extract_strided_slice %118 {offsets = [0, 0], sizes = [2, 32], strides = [1, 1]} : vector<2x96xf32> to vector<2x32xf32>
    %122 = vector.extract_strided_slice %118 {offsets = [0, 32], sizes = [2, 32], strides = [1, 1]} : vector<2x96xf32> to vector<2x32xf32>
    %123 = vector.extract_strided_slice %118 {offsets = [0, 64], sizes = [2, 32], strides = [1, 1]} : vector<2x96xf32> to vector<2x32xf32>
    %124 = arith.mulf %122, %102 : vector<2x32xf32>
    %125 = arith.mulf %121, %120 : vector<2x32xf32>
    %126 = arith.addf %124, %125 : vector<2x32xf32>
    %127 = math.tanh %126 : vector<2x32xf32>
    %128 = arith.mulf %123, %127 : vector<2x32xf32>
    %129 = arith.index_cast %108 : i32 to index
    %c0_36 = arith.constant 0 : index
    %130 = vector.load %arg9[%129, %c0_36] : memref<16x32xf32, #tpu.memory_space<vmem>>, vector<2x32xf32>
    tpu.vector_store %arg9[%129, %c0_36], %128 {strides = array<i32>} : memref<16x32xf32, #tpu.memory_space<vmem>>, vector<2x32xf32>,
    %c5_i32 = arith.constant 5 : i32
    %c2_i32_37 = arith.constant 2 : i32
    %131 = arith.muli %c5_i32, %c2_i32_37 : i32
    %132 = tpu.assume_multiple %131, 2 : i32
    %133 = arith.index_cast %132 : i32 to index
    %c0_38 = arith.constant 0 : index
    %134 = vector.load %arg10[%133, %c0_38] : memref<16x128xf32, #tpu.memory_space<vmem>>, vector<2x128xf32>
    %cst_39 = arith.constant dense<0.000000e+00> : vector<2x128xf32>
    %135 = tpu.matmul %128, %9, %cst_39 {dimension_numbers = #tpu.dot_dimension_numbers<[1], [0], [0], [1], [0, 0, 1, 1], [], []>} : vector<2x32xf32>, vector<32x128xf32>, vector<2x128xf32> -> vector<2x128xf32>
    %136 = arith.addf %134, %135 : vector<2x128xf32>
    %137 = vector.extract_strided_slice %136 {offsets = [0, 0], sizes = [2, 96], strides = [1, 1]} : vector<2x128xf32> to vector<2x96xf32>
    %138 = arith.negf %137 : vector<2x96xf32>
    %139 = math.exp %138 : vector<2x96xf32>
    %cst_40 = arith.constant 1.000000e+00 : f32
    %140 = vector.broadcast %cst_40 : f32 to vector<2x96xf32>
    %141 = arith.addf %140, %139 : vector<2x96xf32>
    %142 = arith.divf %140, %141 : vector<2x96xf32>
    %143 = vector.extract_strided_slice %136 {offsets = [0, 96], sizes = [2, 32], strides = [1, 1]} : vector<2x128xf32> to vector<2x32xf32>
    %144 = math.tanh %143 : vector<2x32xf32>
    %145 = vector.extract_strided_slice %142 {offsets = [0, 0], sizes = [2, 32], strides = [1, 1]} : vector<2x96xf32> to vector<2x32xf32>
    %146 = vector.extract_strided_slice %142 {offsets = [0, 32], sizes = [2, 32], strides = [1, 1]} : vector<2x96xf32> to vector<2x32xf32>
    %147 = vector.extract_strided_slice %142 {offsets = [0, 64], sizes = [2, 32], strides = [1, 1]} : vector<2x96xf32> to vector<2x32xf32>
    %148 = arith.mulf %146, %126 : vector<2x32xf32>
    %149 = arith.mulf %145, %144 : vector<2x32xf32>
    %150 = arith.addf %148, %149 : vector<2x32xf32>
    %151 = math.tanh %150 : vector<2x32xf32>
    %152 = arith.mulf %147, %151 : vector<2x32xf32>
    %153 = arith.index_cast %132 : i32 to index
    %c0_41 = arith.constant 0 : index
    %154 = vector.load %arg9[%153, %c0_41] : memref<16x32xf32, #tpu.memory_space<vmem>>, vector<2x32xf32>
    tpu.vector_store %arg9[%153, %c0_41], %152 {strides = array<i32>} : memref<16x32xf32, #tpu.memory_space<vmem>>, vector<2x32xf32>,
    %c6_i32 = arith.constant 6 : i32
    %c2_i32_42 = arith.constant 2 : i32
    %155 = arith.muli %c6_i32, %c2_i32_42 : i32
    %156 = tpu.assume_multiple %155, 2 : i32
    %157 = arith.index_cast %156 : i32 to index
    %c0_43 = arith.constant 0 : index
    %158 = vector.load %arg10[%157, %c0_43] : memref<16x128xf32, #tpu.memory_space<vmem>>, vector<2x128xf32>
    %cst_44 = arith.constant dense<0.000000e+00> : vector<2x128xf32>
    %159 = tpu.matmul %152, %9, %cst_44 {dimension_numbers = #tpu.dot_dimension_numbers<[1], [0], [0], [1], [0, 0, 1, 1], [], []>} : vector<2x32xf32>, vector<32x128xf32>, vector<2x128xf32> -> vector<2x128xf32>
    %160 = arith.addf %158, %159 : vector<2x128xf32>
    %161 = vector.extract_strided_slice %160 {offsets = [0, 0], sizes = [2, 96], strides = [1, 1]} : vector<2x128xf32> to vector<2x96xf32>
    %162 = arith.negf %161 : vector<2x96xf32>
    %163 = math.exp %162 : vector<2x96xf32>
    %cst_45 = arith.constant 1.000000e+00 : f32
    %164 = vector.broadcast %cst_45 : f32 to vector<2x96xf32>
    %165 = arith.addf %164, %163 : vector<2x96xf32>
    %166 = arith.divf %164, %165 : vector<2x96xf32>
    %167 = vector.extract_strided_slice %160 {offsets = [0, 96], sizes = [2, 32], strides = [1, 1]} : vector<2x128xf32> to vector<2x32xf32>
    %168 = math.tanh %167 : vector<2x32xf32>
    %169 = vector.extract_strided_slice %166 {offsets = [0, 0], sizes = [2, 32], strides = [1, 1]} : vector<2x96xf32> to vector<2x32xf32>
    %170 = vector.extract_strided_slice %166 {offsets = [0, 32], sizes = [2, 32], strides = [1, 1]} : vector<2x96xf32> to vector<2x32xf32>
    %171 = vector.extract_strided_slice %166 {offsets = [0, 64], sizes = [2, 32], strides = [1, 1]} : vector<2x96xf32> to vector<2x32xf32>
    %172 = arith.mulf %170, %150 : vector<2x32xf32>
    %173 = arith.mulf %169, %168 : vector<2x32xf32>
    %174 = arith.addf %172, %173 : vector<2x32xf32>
    %175 = math.tanh %174 : vector<2x32xf32>
    %176 = arith.mulf %171, %175 : vector<2x32xf32>
    %177 = arith.index_cast %156 : i32 to index
    %c0_46 = arith.constant 0 : index
    %178 = vector.load %arg9[%177, %c0_46] : memref<16x32xf32, #tpu.memory_space<vmem>>, vector<2x32xf32>
    tpu.vector_store %arg9[%177, %c0_46], %176 {strides = array<i32>} : memref<16x32xf32, #tpu.memory_space<vmem>>, vector<2x32xf32>,
    %c7_i32 = arith.constant 7 : i32
    %c2_i32_47 = arith.constant 2 : i32
    %179 = arith.muli %c7_i32, %c2_i32_47 : i32
    %180 = tpu.assume_multiple %179, 2 : i32
    %181 = arith.index_cast %180 : i32 to index
    %c0_48 = arith.constant 0 : index
    %182 = vector.load %arg10[%181, %c0_48] : memref<16x128xf32, #tpu.memory_space<vmem>>, vector<2x128xf32>
    %cst_49 = arith.constant dense<0.000000e+00> : vector<2x128xf32>
    %183 = tpu.matmul %176, %9, %cst_49 {dimension_numbers = #tpu.dot_dimension_numbers<[1], [0], [0], [1], [0, 0, 1, 1], [], []>} : vector<2x32xf32>, vector<32x128xf32>, vector<2x128xf32> -> vector<2x128xf32>
    %184 = arith.addf %182, %183 : vector<2x128xf32>
    %185 = vector.extract_strided_slice %184 {offsets = [0, 0], sizes = [2, 96], strides = [1, 1]} : vector<2x128xf32> to vector<2x96xf32>
    %186 = arith.negf %185 : vector<2x96xf32>
    %187 = math.exp %186 : vector<2x96xf32>
    %cst_50 = arith.constant 1.000000e+00 : f32
    %188 = vector.broadcast %cst_50 : f32 to vector<2x96xf32>
    %189 = arith.addf %188, %187 : vector<2x96xf32>
    %190 = arith.divf %188, %189 : vector<2x96xf32>
    %191 = vector.extract_strided_slice %184 {offsets = [0, 96], sizes = [2, 32], strides = [1, 1]} : vector<2x128xf32> to vector<2x32xf32>
    %192 = math.tanh %191 : vector<2x32xf32>
    %193 = vector.extract_strided_slice %190 {offsets = [0, 0], sizes = [2, 32], strides = [1, 1]} : vector<2x96xf32> to vector<2x32xf32>
    %194 = vector.extract_strided_slice %190 {offsets = [0, 32], sizes = [2, 32], strides = [1, 1]} : vector<2x96xf32> to vector<2x32xf32>
    %195 = vector.extract_strided_slice %190 {offsets = [0, 64], sizes = [2, 32], strides = [1, 1]} : vector<2x96xf32> to vector<2x32xf32>
    %196 = arith.mulf %194, %174 : vector<2x32xf32>
    %197 = arith.mulf %193, %192 : vector<2x32xf32>
    %198 = arith.addf %196, %197 : vector<2x32xf32>
    %199 = math.tanh %198 : vector<2x32xf32>
    %200 = arith.mulf %195, %199 : vector<2x32xf32>
    %201 = arith.index_cast %180 : i32 to index
    %c0_51 = arith.constant 0 : index
    %202 = vector.load %arg9[%201, %c0_51] : memref<16x32xf32, #tpu.memory_space<vmem>>, vector<2x32xf32>
    tpu.vector_store %arg9[%201, %c0_51], %200 {strides = array<i32>} : memref<16x32xf32, #tpu.memory_space<vmem>>, vector<2x32xf32>,
    %c8_i32 = arith.constant 8 : i32
    %c0_52 = arith.constant 0 : index
    %c0_53 = arith.constant 0 : index
    %203 = vector.load %arg9[%c0_52, %c0_53] : memref<16x32xf32, #tpu.memory_space<vmem>>, vector<16x32xf32>
    %c0_54 = arith.constant 0 : index
    %c0_55 = arith.constant 0 : index
    %c0_56 = arith.constant 0 : index
    %204 = vector.load %arg3[%c0_54, %c0_55, %c0_56] : memref<4x32x128xf32, #tpu.memory_space<vmem>>, vector<1x32x128xf32>
    %205 = vector.shape_cast %204 : vector<1x32x128xf32> to vector<32x128xf32>
    %cst_57 = arith.constant dense<0.000000e+00> : vector<16x128xf32>
    %206 = tpu.matmul %203, %205, %cst_57 {dimension_numbers = #tpu.dot_dimension_numbers<[1], [0], [0], [1], [0, 0, 1, 1], [], []>} : vector<16x32xf32>, vector<32x128xf32>, vector<16x128xf32> -> vector<16x128xf32>
    %c1 = arith.constant 1 : index
    %c0_58 = arith.constant 0 : index
    %c0_59 = arith.constant 0 : index
    %207 = vector.load %arg5[%c1, %c0_58, %c0_59] : memref<5x1x128xf32, #tpu.memory_space<vmem>>, vector<1x1x128xf32>
    %208 = vector.shape_cast %207 : vector<1x1x128xf32> to vector<1x128xf32>
    %209 = vector.broadcast %208 : vector<1x128xf32> to vector<16x128xf32>
    %210 = arith.addf %206, %209 : vector<16x128xf32>
    %c0_60 = arith.constant 0 : index
    %c0_61 = arith.constant 0 : index
    %211 = vector.load %arg10[%c0_60, %c0_61] : memref<16x128xf32, #tpu.memory_space<vmem>>, vector<16x128xf32>
    tpu.vector_store %arg10[%c0_60, %c0_61], %210 {strides = array<i32>} : memref<16x128xf32, #tpu.memory_space<vmem>>, vector<16x128xf32>,
    %c1_62 = arith.constant 1 : index
    %c0_63 = arith.constant 0 : index
    %c0_64 = arith.constant 0 : index
    %212 = vector.load %arg4[%c1_62, %c0_63, %c0_64] : memref<5x32x128xf32, #tpu.memory_space<vmem>>, vector<1x32x128xf32>
    %213 = vector.shape_cast %212 : vector<1x32x128xf32> to vector<32x128xf32>
    %cst_65 = arith.constant 0.000000e+00 : f32
    %214 = vector.broadcast %cst_65 : f32 to vector<2x32xf32>
    %c0_i32_66 = arith.constant 0 : i32
    %c2_i32_67 = arith.constant 2 : i32
    %215 = arith.muli %c0_i32_66, %c2_i32_67 : i32
    %216 = tpu.assume_multiple %215, 2 : i32
    %217 = arith.index_cast %216 : i32 to index
    %c0_68 = arith.constant 0 : index
    %218 = vector.load %arg10[%217, %c0_68] : memref<16x128xf32, #tpu.memory_space<vmem>>, vector<2x128xf32>
    %cst_69 = arith.constant dense<0.000000e+00> : vector<2x128xf32>
    %219 = tpu.matmul %214, %213, %cst_69 {dimension_numbers = #tpu.dot_dimension_numbers<[1], [0], [0], [1], [0, 0, 1, 1], [], []>} : vector<2x32xf32>, vector<32x128xf32>, vector<2x128xf32> -> vector<2x128xf32>
    %220 = arith.addf %218, %219 : vector<2x128xf32>
    %221 = vector.extract_strided_slice %220 {offsets = [0, 0], sizes = [2, 96], strides = [1, 1]} : vector<2x128xf32> to vector<2x96xf32>
    %222 = arith.negf %221 : vector<2x96xf32>
    %223 = math.exp %222 : vector<2x96xf32>
    %cst_70 = arith.constant 1.000000e+00 : f32
    %224 = vector.broadcast %cst_70 : f32 to vector<2x96xf32>
    %225 = arith.addf %224, %223 : vector<2x96xf32>
    %226 = arith.divf %224, %225 : vector<2x96xf32>
    %227 = vector.extract_strided_slice %220 {offsets = [0, 96], sizes = [2, 32], strides = [1, 1]} : vector<2x128xf32> to vector<2x32xf32>
    %228 = math.tanh %227 : vector<2x32xf32>
    %229 = vector.extract_strided_slice %226 {offsets = [0, 0], sizes = [2, 32], strides = [1, 1]} : vector<2x96xf32> to vector<2x32xf32>
    %230 = vector.extract_strided_slice %226 {offsets = [0, 32], sizes = [2, 32], strides = [1, 1]} : vector<2x96xf32> to vector<2x32xf32>
    %231 = vector.extract_strided_slice %226 {offsets = [0, 64], sizes = [2, 32], strides = [1, 1]} : vector<2x96xf32> to vector<2x32xf32>
    %232 = arith.mulf %230, %214 : vector<2x32xf32>
    %233 = arith.mulf %229, %228 : vector<2x32xf32>
    %234 = arith.addf %232, %233 : vector<2x32xf32>
    %235 = math.tanh %234 : vector<2x32xf32>
    %236 = arith.mulf %231, %235 : vector<2x32xf32>
    %237 = arith.index_cast %216 : i32 to index
    %c0_71 = arith.constant 0 : index
    %238 = vector.load %arg9[%237, %c0_71] : memref<16x32xf32, #tpu.memory_space<vmem>>, vector<2x32xf32>
    tpu.vector_store %arg9[%237, %c0_71], %236 {strides = array<i32>} : memref<16x32xf32, #tpu.memory_space<vmem>>, vector<2x32xf32>,
    %c1_i32_72 = arith.constant 1 : i32
    %c2_i32_73 = arith.constant 2 : i32
    %239 = arith.muli %c1_i32_72, %c2_i32_73 : i32
    %240 = tpu.assume_multiple %239, 2 : i32
    %241 = arith.index_cast %240 : i32 to index
    %c0_74 = arith.constant 0 : index
    %242 = vector.load %arg10[%241, %c0_74] : memref<16x128xf32, #tpu.memory_space<vmem>>, vector<2x128xf32>
    %cst_75 = arith.constant dense<0.000000e+00> : vector<2x128xf32>
    %243 = tpu.matmul %236, %213, %cst_75 {dimension_numbers = #tpu.dot_dimension_numbers<[1], [0], [0], [1], [0, 0, 1, 1], [], []>} : vector<2x32xf32>, vector<32x128xf32>, vector<2x128xf32> -> vector<2x128xf32>
    %244 = arith.addf %242, %243 : vector<2x128xf32>
    %245 = vector.extract_strided_slice %244 {offsets = [0, 0], sizes = [2, 96], strides = [1, 1]} : vector<2x128xf32> to vector<2x96xf32>
    %246 = arith.negf %245 : vector<2x96xf32>
    %247 = math.exp %246 : vector<2x96xf32>
    %cst_76 = arith.constant 1.000000e+00 : f32
    %248 = vector.broadcast %cst_76 : f32 to vector<2x96xf32>
    %249 = arith.addf %248, %247 : vector<2x96xf32>
    %250 = arith.divf %248, %249 : vector<2x96xf32>
    %251 = vector.extract_strided_slice %244 {offsets = [0, 96], sizes = [2, 32], strides = [1, 1]} : vector<2x128xf32> to vector<2x32xf32>
    %252 = math.tanh %251 : vector<2x32xf32>
    %253 = vector.extract_strided_slice %250 {offsets = [0, 0], sizes = [2, 32], strides = [1, 1]} : vector<2x96xf32> to vector<2x32xf32>
    %254 = vector.extract_strided_slice %250 {offsets = [0, 32], sizes = [2, 32], strides = [1, 1]} : vector<2x96xf32> to vector<2x32xf32>
    %255 = vector.extract_strided_slice %250 {offsets = [0, 64], sizes = [2, 32], strides = [1, 1]} : vector<2x96xf32> to vector<2x32xf32>
    %256 = arith.mulf %254, %234 : vector<2x32xf32>
    %257 = arith.mulf %253, %252 : vector<2x32xf32>
    %258 = arith.addf %256, %257 : vector<2x32xf32>
    %259 = math.tanh %258 : vector<2x32xf32>
    %260 = arith.mulf %255, %259 : vector<2x32xf32>
    %261 = arith.index_cast %240 : i32 to index
    %c0_77 = arith.constant 0 : index
    %262 = vector.load %arg9[%261, %c0_77] : memref<16x32xf32, #tpu.memory_space<vmem>>, vector<2x32xf32>
    tpu.vector_store %arg9[%261, %c0_77], %260 {strides = array<i32>} : memref<16x32xf32, #tpu.memory_space<vmem>>, vector<2x32xf32>,
    %c2_i32_78 = arith.constant 2 : i32
    %c2_i32_79 = arith.constant 2 : i32
    %263 = arith.muli %c2_i32_78, %c2_i32_79 : i32
    %264 = tpu.assume_multiple %263, 2 : i32
    %265 = arith.index_cast %264 : i32 to index
    %c0_80 = arith.constant 0 : index
    %266 = vector.load %arg10[%265, %c0_80] : memref<16x128xf32, #tpu.memory_space<vmem>>, vector<2x128xf32>
    %cst_81 = arith.constant dense<0.000000e+00> : vector<2x128xf32>
    %267 = tpu.matmul %260, %213, %cst_81 {dimension_numbers = #tpu.dot_dimension_numbers<[1], [0], [0], [1], [0, 0, 1, 1], [], []>} : vector<2x32xf32>, vector<32x128xf32>, vector<2x128xf32> -> vector<2x128xf32>
    %268 = arith.addf %266, %267 : vector<2x128xf32>
    %269 = vector.extract_strided_slice %268 {offsets = [0, 0], sizes = [2, 96], strides = [1, 1]} : vector<2x128xf32> to vector<2x96xf32>
    %270 = arith.negf %269 : vector<2x96xf32>
    %271 = math.exp %270 : vector<2x96xf32>
    %cst_82 = arith.constant 1.000000e+00 : f32
    %272 = vector.broadcast %cst_82 : f32 to vector<2x96xf32>
    %273 = arith.addf %272, %271 : vector<2x96xf32>
    %274 = arith.divf %272, %273 : vector<2x96xf32>
    %275 = vector.extract_strided_slice %268 {offsets = [0, 96], sizes = [2, 32], strides = [1, 1]} : vector<2x128xf32> to vector<2x32xf32>
    %276 = math.tanh %275 : vector<2x32xf32>
    %277 = vector.extract_strided_slice %274 {offsets = [0, 0], sizes = [2, 32], strides = [1, 1]} : vector<2x96xf32> to vector<2x32xf32>
    %278 = vector.extract_strided_slice %274 {offsets = [0, 32], sizes = [2, 32], strides = [1, 1]} : vector<2x96xf32> to vector<2x32xf32>
    %279 = vector.extract_strided_slice %274 {offsets = [0, 64], sizes = [2, 32], strides = [1, 1]} : vector<2x96xf32> to vector<2x32xf32>
    %280 = arith.mulf %278, %258 : vector<2x32xf32>
    %281 = arith.mulf %277, %276 : vector<2x32xf32>
    %282 = arith.addf %280, %281 : vector<2x32xf32>
    %283 = math.tanh %282 : vector<2x32xf32>
    %284 = arith.mulf %279, %283 : vector<2x32xf32>
    %285 = arith.index_cast %264 : i32 to index
    %c0_83 = arith.constant 0 : index
    %286 = vector.load %arg9[%285, %c0_83] : memref<16x32xf32, #tpu.memory_space<vmem>>, vector<2x32xf32>
    tpu.vector_store %arg9[%285, %c0_83], %284 {strides = array<i32>} : memref<16x32xf32, #tpu.memory_space<vmem>>, vector<2x32xf32>,
    %c3_i32_84 = arith.constant 3 : i32
    %c2_i32_85 = arith.constant 2 : i32
    %287 = arith.muli %c3_i32_84, %c2_i32_85 : i32
    %288 = tpu.assume_multiple %287, 2 : i32
    %289 = arith.index_cast %288 : i32 to index
    %c0_86 = arith.constant 0 : index
    %290 = vector.load %arg10[%289, %c0_86] : memref<16x128xf32, #tpu.memory_space<vmem>>, vector<2x128xf32>
    %cst_87 = arith.constant dense<0.000000e+00> : vector<2x128xf32>
    %291 = tpu.matmul %284, %213, %cst_87 {dimension_numbers = #tpu.dot_dimension_numbers<[1], [0], [0], [1], [0, 0, 1, 1], [], []>} : vector<2x32xf32>, vector<32x128xf32>, vector<2x128xf32> -> vector<2x128xf32>
    %292 = arith.addf %290, %291 : vector<2x128xf32>
    %293 = vector.extract_strided_slice %292 {offsets = [0, 0], sizes = [2, 96], strides = [1, 1]} : vector<2x128xf32> to vector<2x96xf32>
    %294 = arith.negf %293 : vector<2x96xf32>
    %295 = math.exp %294 : vector<2x96xf32>
    %cst_88 = arith.constant 1.000000e+00 : f32
    %296 = vector.broadcast %cst_88 : f32 to vector<2x96xf32>
    %297 = arith.addf %296, %295 : vector<2x96xf32>
    %298 = arith.divf %296, %297 : vector<2x96xf32>
    %299 = vector.extract_strided_slice %292 {offsets = [0, 96], sizes = [2, 32], strides = [1, 1]} : vector<2x128xf32> to vector<2x32xf32>
    %300 = math.tanh %299 : vector<2x32xf32>
    %301 = vector.extract_strided_slice %298 {offsets = [0, 0], sizes = [2, 32], strides = [1, 1]} : vector<2x96xf32> to vector<2x32xf32>
    %302 = vector.extract_strided_slice %298 {offsets = [0, 32], sizes = [2, 32], strides = [1, 1]} : vector<2x96xf32> to vector<2x32xf32>
    %303 = vector.extract_strided_slice %298 {offsets = [0, 64], sizes = [2, 32], strides = [1, 1]} : vector<2x96xf32> to vector<2x32xf32>
    %304 = arith.mulf %302, %282 : vector<2x32xf32>
    %305 = arith.mulf %301, %300 : vector<2x32xf32>
    %306 = arith.addf %304, %305 : vector<2x32xf32>
    %307 = math.tanh %306 : vector<2x32xf32>
    %308 = arith.mulf %303, %307 : vector<2x32xf32>
    %309 = arith.index_cast %288 : i32 to index
    %c0_89 = arith.constant 0 : index
    %310 = vector.load %arg9[%309, %c0_89] : memref<16x32xf32, #tpu.memory_space<vmem>>, vector<2x32xf32>
    tpu.vector_store %arg9[%309, %c0_89], %308 {strides = array<i32>} : memref<16x32xf32, #tpu.memory_space<vmem>>, vector<2x32xf32>,
    %c4_i32_90 = arith.constant 4 : i32
    %c2_i32_91 = arith.constant 2 : i32
    %311 = arith.muli %c4_i32_90, %c2_i32_91 : i32
    %312 = tpu.assume_multiple %311, 2 : i32
    %313 = arith.index_cast %312 : i32 to index
    %c0_92 = arith.constant 0 : index
    %314 = vector.load %arg10[%313, %c0_92] : memref<16x128xf32, #tpu.memory_space<vmem>>, vector<2x128xf32>
    %cst_93 = arith.constant dense<0.000000e+00> : vector<2x128xf32>
    %315 = tpu.matmul %308, %213, %cst_93 {dimension_numbers = #tpu.dot_dimension_numbers<[1], [0], [0], [1], [0, 0, 1, 1], [], []>} : vector<2x32xf32>, vector<32x128xf32>, vector<2x128xf32> -> vector<2x128xf32>
    %316 = arith.addf %314, %315 : vector<2x128xf32>
    %317 = vector.extract_strided_slice %316 {offsets = [0, 0], sizes = [2, 96], strides = [1, 1]} : vector<2x128xf32> to vector<2x96xf32>
    %318 = arith.negf %317 : vector<2x96xf32>
    %319 = math.exp %318 : vector<2x96xf32>
    %cst_94 = arith.constant 1.000000e+00 : f32
    %320 = vector.broadcast %cst_94 : f32 to vector<2x96xf32>
    %321 = arith.addf %320, %319 : vector<2x96xf32>
    %322 = arith.divf %320, %321 : vector<2x96xf32>
    %323 = vector.extract_strided_slice %316 {offsets = [0, 96], sizes = [2, 32], strides = [1, 1]} : vector<2x128xf32> to vector<2x32xf32>
    %324 = math.tanh %323 : vector<2x32xf32>
    %325 = vector.extract_strided_slice %322 {offsets = [0, 0], sizes = [2, 32], strides = [1, 1]} : vector<2x96xf32> to vector<2x32xf32>
    %326 = vector.extract_strided_slice %322 {offsets = [0, 32], sizes = [2, 32], strides = [1, 1]} : vector<2x96xf32> to vector<2x32xf32>
    %327 = vector.extract_strided_slice %322 {offsets = [0, 64], sizes = [2, 32], strides = [1, 1]} : vector<2x96xf32> to vector<2x32xf32>
    %328 = arith.mulf %326, %306 : vector<2x32xf32>
    %329 = arith.mulf %325, %324 : vector<2x32xf32>
    %330 = arith.addf %328, %329 : vector<2x32xf32>
    %331 = math.tanh %330 : vector<2x32xf32>
    %332 = arith.mulf %327, %331 : vector<2x32xf32>
    %333 = arith.index_cast %312 : i32 to index
    %c0_95 = arith.constant 0 : index
    %334 = vector.load %arg9[%333, %c0_95] : memref<16x32xf32, #tpu.memory_space<vmem>>, vector<2x32xf32>
    tpu.vector_store %arg9[%333, %c0_95], %332 {strides = array<i32>} : memref<16x32xf32, #tpu.memory_space<vmem>>, vector<2x32xf32>,
    %c5_i32_96 = arith.constant 5 : i32
    %c2_i32_97 = arith.constant 2 : i32
    %335 = arith.muli %c5_i32_96, %c2_i32_97 : i32
    %336 = tpu.assume_multiple %335, 2 : i32
    %337 = arith.index_cast %336 : i32 to index
    %c0_98 = arith.constant 0 : index
    %338 = vector.load %arg10[%337, %c0_98] : memref<16x128xf32, #tpu.memory_space<vmem>>, vector<2x128xf32>
    %cst_99 = arith.constant dense<0.000000e+00> : vector<2x128xf32>
    %339 = tpu.matmul %332, %213, %cst_99 {dimension_numbers = #tpu.dot_dimension_numbers<[1], [0], [0], [1], [0, 0, 1, 1], [], []>} : vector<2x32xf32>, vector<32x128xf32>, vector<2x128xf32> -> vector<2x128xf32>
    %340 = arith.addf %338, %339 : vector<2x128xf32>
    %341 = vector.extract_strided_slice %340 {offsets = [0, 0], sizes = [2, 96], strides = [1, 1]} : vector<2x128xf32> to vector<2x96xf32>
    %342 = arith.negf %341 : vector<2x96xf32>
    %343 = math.exp %342 : vector<2x96xf32>
    %cst_100 = arith.constant 1.000000e+00 : f32
    %344 = vector.broadcast %cst_100 : f32 to vector<2x96xf32>
    %345 = arith.addf %344, %343 : vector<2x96xf32>
    %346 = arith.divf %344, %345 : vector<2x96xf32>
    %347 = vector.extract_strided_slice %340 {offsets = [0, 96], sizes = [2, 32], strides = [1, 1]} : vector<2x128xf32> to vector<2x32xf32>
    %348 = math.tanh %347 : vector<2x32xf32>
    %349 = vector.extract_strided_slice %346 {offsets = [0, 0], sizes = [2, 32], strides = [1, 1]} : vector<2x96xf32> to vector<2x32xf32>
    %350 = vector.extract_strided_slice %346 {offsets = [0, 32], sizes = [2, 32], strides = [1, 1]} : vector<2x96xf32> to vector<2x32xf32>
    %351 = vector.extract_strided_slice %346 {offsets = [0, 64], sizes = [2, 32], strides = [1, 1]} : vector<2x96xf32> to vector<2x32xf32>
    %352 = arith.mulf %350, %330 : vector<2x32xf32>
    %353 = arith.mulf %349, %348 : vector<2x32xf32>
    %354 = arith.addf %352, %353 : vector<2x32xf32>
    %355 = math.tanh %354 : vector<2x32xf32>
    %356 = arith.mulf %351, %355 : vector<2x32xf32>
    %357 = arith.index_cast %336 : i32 to index
    %c0_101 = arith.constant 0 : index
    %358 = vector.load %arg9[%357, %c0_101] : memref<16x32xf32, #tpu.memory_space<vmem>>, vector<2x32xf32>
    tpu.vector_store %arg9[%357, %c0_101], %356 {strides = array<i32>} : memref<16x32xf32, #tpu.memory_space<vmem>>, vector<2x32xf32>,
    %c6_i32_102 = arith.constant 6 : i32
    %c2_i32_103 = arith.constant 2 : i32
    %359 = arith.muli %c6_i32_102, %c2_i32_103 : i32
    %360 = tpu.assume_multiple %359, 2 : i32
    %361 = arith.index_cast %360 : i32 to index
    %c0_104 = arith.constant 0 : index
    %362 = vector.load %arg10[%361, %c0_104] : memref<16x128xf32, #tpu.memory_space<vmem>>, vector<2x128xf32>
    %cst_105 = arith.constant dense<0.000000e+00> : vector<2x128xf32>
    %363 = tpu.matmul %356, %213, %cst_105 {dimension_numbers = #tpu.dot_dimension_numbers<[1], [0], [0], [1], [0, 0, 1, 1], [], []>} : vector<2x32xf32>, vector<32x128xf32>, vector<2x128xf32> -> vector<2x128xf32>
    %364 = arith.addf %362, %363 : vector<2x128xf32>
    %365 = vector.extract_strided_slice %364 {offsets = [0, 0], sizes = [2, 96], strides = [1, 1]} : vector<2x128xf32> to vector<2x96xf32>
    %366 = arith.negf %365 : vector<2x96xf32>
    %367 = math.exp %366 : vector<2x96xf32>
    %cst_106 = arith.constant 1.000000e+00 : f32
    %368 = vector.broadcast %cst_106 : f32 to vector<2x96xf32>
    %369 = arith.addf %368, %367 : vector<2x96xf32>
    %370 = arith.divf %368, %369 : vector<2x96xf32>
    %371 = vector.extract_strided_slice %364 {offsets = [0, 96], sizes = [2, 32], strides = [1, 1]} : vector<2x128xf32> to vector<2x32xf32>
    %372 = math.tanh %371 : vector<2x32xf32>
    %373 = vector.extract_strided_slice %370 {offsets = [0, 0], sizes = [2, 32], strides = [1, 1]} : vector<2x96xf32> to vector<2x32xf32>
    %374 = vector.extract_strided_slice %370 {offsets = [0, 32], sizes = [2, 32], strides = [1, 1]} : vector<2x96xf32> to vector<2x32xf32>
    %375 = vector.extract_strided_slice %370 {offsets = [0, 64], sizes = [2, 32], strides = [1, 1]} : vector<2x96xf32> to vector<2x32xf32>
    %376 = arith.mulf %374, %354 : vector<2x32xf32>
    %377 = arith.mulf %373, %372 : vector<2x32xf32>
    %378 = arith.addf %376, %377 : vector<2x32xf32>
    %379 = math.tanh %378 : vector<2x32xf32>
    %380 = arith.mulf %375, %379 : vector<2x32xf32>
    %381 = arith.index_cast %360 : i32 to index
    %c0_107 = arith.constant 0 : index
    %382 = vector.load %arg9[%381, %c0_107] : memref<16x32xf32, #tpu.memory_space<vmem>>, vector<2x32xf32>
    tpu.vector_store %arg9[%381, %c0_107], %380 {strides = array<i32>} : memref<16x32xf32, #tpu.memory_space<vmem>>, vector<2x32xf32>,
    %c7_i32_108 = arith.constant 7 : i32
    %c2_i32_109 = arith.constant 2 : i32
    %383 = arith.muli %c7_i32_108, %c2_i32_109 : i32
    %384 = tpu.assume_multiple %383, 2 : i32
    %385 = arith.index_cast %384 : i32 to index
    %c0_110 = arith.constant 0 : index
    %386 = vector.load %arg10[%385, %c0_110] : memref<16x128xf32, #tpu.memory_space<vmem>>, vector<2x128xf32>
    %cst_111 = arith.constant dense<0.000000e+00> : vector<2x128xf32>
    %387 = tpu.matmul %380, %213, %cst_111 {dimension_numbers = #tpu.dot_dimension_numbers<[1], [0], [0], [1], [0, 0, 1, 1], [], []>} : vector<2x32xf32>, vector<32x128xf32>, vector<2x128xf32> -> vector<2x128xf32>
    %388 = arith.addf %386, %387 : vector<2x128xf32>
    %389 = vector.extract_strided_slice %388 {offsets = [0, 0], sizes = [2, 96], strides = [1, 1]} : vector<2x128xf32> to vector<2x96xf32>
    %390 = arith.negf %389 : vector<2x96xf32>
    %391 = math.exp %390 : vector<2x96xf32>
    %cst_112 = arith.constant 1.000000e+00 : f32
    %392 = vector.broadcast %cst_112 : f32 to vector<2x96xf32>
    %393 = arith.addf %392, %391 : vector<2x96xf32>
    %394 = arith.divf %392, %393 : vector<2x96xf32>
    %395 = vector.extract_strided_slice %388 {offsets = [0, 96], sizes = [2, 32], strides = [1, 1]} : vector<2x128xf32> to vector<2x32xf32>
    %396 = math.tanh %395 : vector<2x32xf32>
    %397 = vector.extract_strided_slice %394 {offsets = [0, 0], sizes = [2, 32], strides = [1, 1]} : vector<2x96xf32> to vector<2x32xf32>
    %398 = vector.extract_strided_slice %394 {offsets = [0, 32], sizes = [2, 32], strides = [1, 1]} : vector<2x96xf32> to vector<2x32xf32>
    %399 = vector.extract_strided_slice %394 {offsets = [0, 64], sizes = [2, 32], strides = [1, 1]} : vector<2x96xf32> to vector<2x32xf32>
    %400 = arith.mulf %398, %378 : vector<2x32xf32>
    %401 = arith.mulf %397, %396 : vector<2x32xf32>
    %402 = arith.addf %400, %401 : vector<2x32xf32>
    %403 = math.tanh %402 : vector<2x32xf32>
    %404 = arith.mulf %399, %403 : vector<2x32xf32>
    %405 = arith.index_cast %384 : i32 to index
    %c0_113 = arith.constant 0 : index
    %406 = vector.load %arg9[%405, %c0_113] : memref<16x32xf32, #tpu.memory_space<vmem>>, vector<2x32xf32>
    tpu.vector_store %arg9[%405, %c0_113], %404 {strides = array<i32>} : memref<16x32xf32, #tpu.memory_space<vmem>>, vector<2x32xf32>,
    %c8_i32_114 = arith.constant 8 : i32
    %c0_115 = arith.constant 0 : index
    %c0_116 = arith.constant 0 : index
    %407 = vector.load %arg9[%c0_115, %c0_116] : memref<16x32xf32, #tpu.memory_space<vmem>>, vector<16x32xf32>
    %c1_117 = arith.constant 1 : index
    %c0_118 = arith.constant 0 : index
    %c0_119 = arith.constant 0 : index
    %408 = vector.load %arg3[%c1_117, %c0_118, %c0_119] : memref<4x32x128xf32, #tpu.memory_space<vmem>>, vector<1x32x128xf32>
    %409 = vector.shape_cast %408 : vector<1x32x128xf32> to vector<32x128xf32>
    %cst_120 = arith.constant dense<0.000000e+00> : vector<16x128xf32>
    %410 = tpu.matmul %407, %409, %cst_120 {dimension_numbers = #tpu.dot_dimension_numbers<[1], [0], [0], [1], [0, 0, 1, 1], [], []>} : vector<16x32xf32>, vector<32x128xf32>, vector<16x128xf32> -> vector<16x128xf32>
    %c2 = arith.constant 2 : index
    %c0_121 = arith.constant 0 : index
    %c0_122 = arith.constant 0 : index
    %411 = vector.load %arg5[%c2, %c0_121, %c0_122] : memref<5x1x128xf32, #tpu.memory_space<vmem>>, vector<1x1x128xf32>
    %412 = vector.shape_cast %411 : vector<1x1x128xf32> to vector<1x128xf32>
    %413 = vector.broadcast %412 : vector<1x128xf32> to vector<16x128xf32>
    %414 = arith.addf %410, %413 : vector<16x128xf32>
    %c0_123 = arith.constant 0 : index
    %c0_124 = arith.constant 0 : index
    %415 = vector.load %arg10[%c0_123, %c0_124] : memref<16x128xf32, #tpu.memory_space<vmem>>, vector<16x128xf32>
    tpu.vector_store %arg10[%c0_123, %c0_124], %414 {strides = array<i32>} : memref<16x128xf32, #tpu.memory_space<vmem>>, vector<16x128xf32>,
    %c2_125 = arith.constant 2 : index
    %c0_126 = arith.constant 0 : index
    %c0_127 = arith.constant 0 : index
    %416 = vector.load %arg4[%c2_125, %c0_126, %c0_127] : memref<5x32x128xf32, #tpu.memory_space<vmem>>, vector<1x32x128xf32>
    %417 = vector.shape_cast %416 : vector<1x32x128xf32> to vector<32x128xf32>
    %cst_128 = arith.constant 0.000000e+00 : f32
    %418 = vector.broadcast %cst_128 : f32 to vector<2x32xf32>
    %c0_i32_129 = arith.constant 0 : i32
    %c2_i32_130 = arith.constant 2 : i32
    %419 = arith.muli %c0_i32_129, %c2_i32_130 : i32
    %420 = tpu.assume_multiple %419, 2 : i32
    %421 = arith.index_cast %420 : i32 to index
    %c0_131 = arith.constant 0 : index
    %422 = vector.load %arg10[%421, %c0_131] : memref<16x128xf32, #tpu.memory_space<vmem>>, vector<2x128xf32>
    %cst_132 = arith.constant dense<0.000000e+00> : vector<2x128xf32>
    %423 = tpu.matmul %418, %417, %cst_132 {dimension_numbers = #tpu.dot_dimension_numbers<[1], [0], [0], [1], [0, 0, 1, 1], [], []>} : vector<2x32xf32>, vector<32x128xf32>, vector<2x128xf32> -> vector<2x128xf32>
    %424 = arith.addf %422, %423 : vector<2x128xf32>
    %425 = vector.extract_strided_slice %424 {offsets = [0, 0], sizes = [2, 96], strides = [1, 1]} : vector<2x128xf32> to vector<2x96xf32>
    %426 = arith.negf %425 : vector<2x96xf32>
    %427 = math.exp %426 : vector<2x96xf32>
    %cst_133 = arith.constant 1.000000e+00 : f32
    %428 = vector.broadcast %cst_133 : f32 to vector<2x96xf32>
    %429 = arith.addf %428, %427 : vector<2x96xf32>
    %430 = arith.divf %428, %429 : vector<2x96xf32>
    %431 = vector.extract_strided_slice %424 {offsets = [0, 96], sizes = [2, 32], strides = [1, 1]} : vector<2x128xf32> to vector<2x32xf32>
    %432 = math.tanh %431 : vector<2x32xf32>
    %433 = vector.extract_strided_slice %430 {offsets = [0, 0], sizes = [2, 32], strides = [1, 1]} : vector<2x96xf32> to vector<2x32xf32>
    %434 = vector.extract_strided_slice %430 {offsets = [0, 32], sizes = [2, 32], strides = [1, 1]} : vector<2x96xf32> to vector<2x32xf32>
    %435 = vector.extract_strided_slice %430 {offsets = [0, 64], sizes = [2, 32], strides = [1, 1]} : vector<2x96xf32> to vector<2x32xf32>
    %436 = arith.mulf %434, %418 : vector<2x32xf32>
    %437 = arith.mulf %433, %432 : vector<2x32xf32>
    %438 = arith.addf %436, %437 : vector<2x32xf32>
    %439 = math.tanh %438 : vector<2x32xf32>
    %440 = arith.mulf %435, %439 : vector<2x32xf32>
    %441 = arith.index_cast %420 : i32 to index
    %c0_134 = arith.constant 0 : index
    %442 = vector.load %arg9[%441, %c0_134] : memref<16x32xf32, #tpu.memory_space<vmem>>, vector<2x32xf32>
    tpu.vector_store %arg9[%441, %c0_134], %440 {strides = array<i32>} : memref<16x32xf32, #tpu.memory_space<vmem>>, vector<2x32xf32>,
    %c1_i32_135 = arith.constant 1 : i32
    %c2_i32_136 = arith.constant 2 : i32
    %443 = arith.muli %c1_i32_135, %c2_i32_136 : i32
    %444 = tpu.assume_multiple %443, 2 : i32
    %445 = arith.index_cast %444 : i32 to index
    %c0_137 = arith.constant 0 : index
    %446 = vector.load %arg10[%445, %c0_137] : memref<16x128xf32, #tpu.memory_space<vmem>>, vector<2x128xf32>
    %cst_138 = arith.constant dense<0.000000e+00> : vector<2x128xf32>
    %447 = tpu.matmul %440, %417, %cst_138 {dimension_numbers = #tpu.dot_dimension_numbers<[1], [0], [0], [1], [0, 0, 1, 1], [], []>} : vector<2x32xf32>, vector<32x128xf32>, vector<2x128xf32> -> vector<2x128xf32>
    %448 = arith.addf %446, %447 : vector<2x128xf32>
    %449 = vector.extract_strided_slice %448 {offsets = [0, 0], sizes = [2, 96], strides = [1, 1]} : vector<2x128xf32> to vector<2x96xf32>
    %450 = arith.negf %449 : vector<2x96xf32>
    %451 = math.exp %450 : vector<2x96xf32>
    %cst_139 = arith.constant 1.000000e+00 : f32
    %452 = vector.broadcast %cst_139 : f32 to vector<2x96xf32>
    %453 = arith.addf %452, %451 : vector<2x96xf32>
    %454 = arith.divf %452, %453 : vector<2x96xf32>
    %455 = vector.extract_strided_slice %448 {offsets = [0, 96], sizes = [2, 32], strides = [1, 1]} : vector<2x128xf32> to vector<2x32xf32>
    %456 = math.tanh %455 : vector<2x32xf32>
    %457 = vector.extract_strided_slice %454 {offsets = [0, 0], sizes = [2, 32], strides = [1, 1]} : vector<2x96xf32> to vector<2x32xf32>
    %458 = vector.extract_strided_slice %454 {offsets = [0, 32], sizes = [2, 32], strides = [1, 1]} : vector<2x96xf32> to vector<2x32xf32>
    %459 = vector.extract_strided_slice %454 {offsets = [0, 64], sizes = [2, 32], strides = [1, 1]} : vector<2x96xf32> to vector<2x32xf32>
    %460 = arith.mulf %458, %438 : vector<2x32xf32>
    %461 = arith.mulf %457, %456 : vector<2x32xf32>
    %462 = arith.addf %460, %461 : vector<2x32xf32>
    %463 = math.tanh %462 : vector<2x32xf32>
    %464 = arith.mulf %459, %463 : vector<2x32xf32>
    %465 = arith.index_cast %444 : i32 to index
    %c0_140 = arith.constant 0 : index
    %466 = vector.load %arg9[%465, %c0_140] : memref<16x32xf32, #tpu.memory_space<vmem>>, vector<2x32xf32>
    tpu.vector_store %arg9[%465, %c0_140], %464 {strides = array<i32>} : memref<16x32xf32, #tpu.memory_space<vmem>>, vector<2x32xf32>,
    %c2_i32_141 = arith.constant 2 : i32
    %c2_i32_142 = arith.constant 2 : i32
    %467 = arith.muli %c2_i32_141, %c2_i32_142 : i32
    %468 = tpu.assume_multiple %467, 2 : i32
    %469 = arith.index_cast %468 : i32 to index
    %c0_143 = arith.constant 0 : index
    %470 = vector.load %arg10[%469, %c0_143] : memref<16x128xf32, #tpu.memory_space<vmem>>, vector<2x128xf32>
    %cst_144 = arith.constant dense<0.000000e+00> : vector<2x128xf32>
    %471 = tpu.matmul %464, %417, %cst_144 {dimension_numbers = #tpu.dot_dimension_numbers<[1], [0], [0], [1], [0, 0, 1, 1], [], []>} : vector<2x32xf32>, vector<32x128xf32>, vector<2x128xf32> -> vector<2x128xf32>
    %472 = arith.addf %470, %471 : vector<2x128xf32>
    %473 = vector.extract_strided_slice %472 {offsets = [0, 0], sizes = [2, 96], strides = [1, 1]} : vector<2x128xf32> to vector<2x96xf32>
    %474 = arith.negf %473 : vector<2x96xf32>
    %475 = math.exp %474 : vector<2x96xf32>
    %cst_145 = arith.constant 1.000000e+00 : f32
    %476 = vector.broadcast %cst_145 : f32 to vector<2x96xf32>
    %477 = arith.addf %476, %475 : vector<2x96xf32>
    %478 = arith.divf %476, %477 : vector<2x96xf32>
    %479 = vector.extract_strided_slice %472 {offsets = [0, 96], sizes = [2, 32], strides = [1, 1]} : vector<2x128xf32> to vector<2x32xf32>
    %480 = math.tanh %479 : vector<2x32xf32>
    %481 = vector.extract_strided_slice %478 {offsets = [0, 0], sizes = [2, 32], strides = [1, 1]} : vector<2x96xf32> to vector<2x32xf32>
    %482 = vector.extract_strided_slice %478 {offsets = [0, 32], sizes = [2, 32], strides = [1, 1]} : vector<2x96xf32> to vector<2x32xf32>
    %483 = vector.extract_strided_slice %478 {offsets = [0, 64], sizes = [2, 32], strides = [1, 1]} : vector<2x96xf32> to vector<2x32xf32>
    %484 = arith.mulf %482, %462 : vector<2x32xf32>
    %485 = arith.mulf %481, %480 : vector<2x32xf32>
    %486 = arith.addf %484, %485 : vector<2x32xf32>
    %487 = math.tanh %486 : vector<2x32xf32>
    %488 = arith.mulf %483, %487 : vector<2x32xf32>
    %489 = arith.index_cast %468 : i32 to index
    %c0_146 = arith.constant 0 : index
    %490 = vector.load %arg9[%489, %c0_146] : memref<16x32xf32, #tpu.memory_space<vmem>>, vector<2x32xf32>
    tpu.vector_store %arg9[%489, %c0_146], %488 {strides = array<i32>} : memref<16x32xf32, #tpu.memory_space<vmem>>, vector<2x32xf32>,
    %c3_i32_147 = arith.constant 3 : i32
    %c2_i32_148 = arith.constant 2 : i32
    %491 = arith.muli %c3_i32_147, %c2_i32_148 : i32
    %492 = tpu.assume_multiple %491, 2 : i32
    %493 = arith.index_cast %492 : i32 to index
    %c0_149 = arith.constant 0 : index
    %494 = vector.load %arg10[%493, %c0_149] : memref<16x128xf32, #tpu.memory_space<vmem>>, vector<2x128xf32>
    %cst_150 = arith.constant dense<0.000000e+00> : vector<2x128xf32>
    %495 = tpu.matmul %488, %417, %cst_150 {dimension_numbers = #tpu.dot_dimension_numbers<[1], [0], [0], [1], [0, 0, 1, 1], [], []>} : vector<2x32xf32>, vector<32x128xf32>, vector<2x128xf32> -> vector<2x128xf32>
    %496 = arith.addf %494, %495 : vector<2x128xf32>
    %497 = vector.extract_strided_slice %496 {offsets = [0, 0], sizes = [2, 96], strides = [1, 1]} : vector<2x128xf32> to vector<2x96xf32>
    %498 = arith.negf %497 : vector<2x96xf32>
    %499 = math.exp %498 : vector<2x96xf32>
    %cst_151 = arith.constant 1.000000e+00 : f32
    %500 = vector.broadcast %cst_151 : f32 to vector<2x96xf32>
    %501 = arith.addf %500, %499 : vector<2x96xf32>
    %502 = arith.divf %500, %501 : vector<2x96xf32>
    %503 = vector.extract_strided_slice %496 {offsets = [0, 96], sizes = [2, 32], strides = [1, 1]} : vector<2x128xf32> to vector<2x32xf32>
    %504 = math.tanh %503 : vector<2x32xf32>
    %505 = vector.extract_strided_slice %502 {offsets = [0, 0], sizes = [2, 32], strides = [1, 1]} : vector<2x96xf32> to vector<2x32xf32>
    %506 = vector.extract_strided_slice %502 {offsets = [0, 32], sizes = [2, 32], strides = [1, 1]} : vector<2x96xf32> to vector<2x32xf32>
    %507 = vector.extract_strided_slice %502 {offsets = [0, 64], sizes = [2, 32], strides = [1, 1]} : vector<2x96xf32> to vector<2x32xf32>
    %508 = arith.mulf %506, %486 : vector<2x32xf32>
    %509 = arith.mulf %505, %504 : vector<2x32xf32>
    %510 = arith.addf %508, %509 : vector<2x32xf32>
    %511 = math.tanh %510 : vector<2x32xf32>
    %512 = arith.mulf %507, %511 : vector<2x32xf32>
    %513 = arith.index_cast %492 : i32 to index
    %c0_152 = arith.constant 0 : index
    %514 = vector.load %arg9[%513, %c0_152] : memref<16x32xf32, #tpu.memory_space<vmem>>, vector<2x32xf32>
    tpu.vector_store %arg9[%513, %c0_152], %512 {strides = array<i32>} : memref<16x32xf32, #tpu.memory_space<vmem>>, vector<2x32xf32>,
    %c4_i32_153 = arith.constant 4 : i32
    %c2_i32_154 = arith.constant 2 : i32
    %515 = arith.muli %c4_i32_153, %c2_i32_154 : i32
    %516 = tpu.assume_multiple %515, 2 : i32
    %517 = arith.index_cast %516 : i32 to index
    %c0_155 = arith.constant 0 : index
    %518 = vector.load %arg10[%517, %c0_155] : memref<16x128xf32, #tpu.memory_space<vmem>>, vector<2x128xf32>
    %cst_156 = arith.constant dense<0.000000e+00> : vector<2x128xf32>
    %519 = tpu.matmul %512, %417, %cst_156 {dimension_numbers = #tpu.dot_dimension_numbers<[1], [0], [0], [1], [0, 0, 1, 1], [], []>} : vector<2x32xf32>, vector<32x128xf32>, vector<2x128xf32> -> vector<2x128xf32>
    %520 = arith.addf %518, %519 : vector<2x128xf32>
    %521 = vector.extract_strided_slice %520 {offsets = [0, 0], sizes = [2, 96], strides = [1, 1]} : vector<2x128xf32> to vector<2x96xf32>
    %522 = arith.negf %521 : vector<2x96xf32>
    %523 = math.exp %522 : vector<2x96xf32>
    %cst_157 = arith.constant 1.000000e+00 : f32
    %524 = vector.broadcast %cst_157 : f32 to vector<2x96xf32>
    %525 = arith.addf %524, %523 : vector<2x96xf32>
    %526 = arith.divf %524, %525 : vector<2x96xf32>
    %527 = vector.extract_strided_slice %520 {offsets = [0, 96], sizes = [2, 32], strides = [1, 1]} : vector<2x128xf32> to vector<2x32xf32>
    %528 = math.tanh %527 : vector<2x32xf32>
    %529 = vector.extract_strided_slice %526 {offsets = [0, 0], sizes = [2, 32], strides = [1, 1]} : vector<2x96xf32> to vector<2x32xf32>
    %530 = vector.extract_strided_slice %526 {offsets = [0, 32], sizes = [2, 32], strides = [1, 1]} : vector<2x96xf32> to vector<2x32xf32>
    %531 = vector.extract_strided_slice %526 {offsets = [0, 64], sizes = [2, 32], strides = [1, 1]} : vector<2x96xf32> to vector<2x32xf32>
    %532 = arith.mulf %530, %510 : vector<2x32xf32>
    %533 = arith.mulf %529, %528 : vector<2x32xf32>
    %534 = arith.addf %532, %533 : vector<2x32xf32>
    %535 = math.tanh %534 : vector<2x32xf32>
    %536 = arith.mulf %531, %535 : vector<2x32xf32>
    %537 = arith.index_cast %516 : i32 to index
    %c0_158 = arith.constant 0 : index
    %538 = vector.load %arg9[%537, %c0_158] : memref<16x32xf32, #tpu.memory_space<vmem>>, vector<2x32xf32>
    tpu.vector_store %arg9[%537, %c0_158], %536 {strides = array<i32>} : memref<16x32xf32, #tpu.memory_space<vmem>>, vector<2x32xf32>,
    %c5_i32_159 = arith.constant 5 : i32
    %c2_i32_160 = arith.constant 2 : i32
    %539 = arith.muli %c5_i32_159, %c2_i32_160 : i32
    %540 = tpu.assume_multiple %539, 2 : i32
    %541 = arith.index_cast %540 : i32 to index
    %c0_161 = arith.constant 0 : index
    %542 = vector.load %arg10[%541, %c0_161] : memref<16x128xf32, #tpu.memory_space<vmem>>, vector<2x128xf32>
    %cst_162 = arith.constant dense<0.000000e+00> : vector<2x128xf32>
    %543 = tpu.matmul %536, %417, %cst_162 {dimension_numbers = #tpu.dot_dimension_numbers<[1], [0], [0], [1], [0, 0, 1, 1], [], []>} : vector<2x32xf32>, vector<32x128xf32>, vector<2x128xf32> -> vector<2x128xf32>
    %544 = arith.addf %542, %543 : vector<2x128xf32>
    %545 = vector.extract_strided_slice %544 {offsets = [0, 0], sizes = [2, 96], strides = [1, 1]} : vector<2x128xf32> to vector<2x96xf32>
    %546 = arith.negf %545 : vector<2x96xf32>
    %547 = math.exp %546 : vector<2x96xf32>
    %cst_163 = arith.constant 1.000000e+00 : f32
    %548 = vector.broadcast %cst_163 : f32 to vector<2x96xf32>
    %549 = arith.addf %548, %547 : vector<2x96xf32>
    %550 = arith.divf %548, %549 : vector<2x96xf32>
    %551 = vector.extract_strided_slice %544 {offsets = [0, 96], sizes = [2, 32], strides = [1, 1]} : vector<2x128xf32> to vector<2x32xf32>
    %552 = math.tanh %551 : vector<2x32xf32>
    %553 = vector.extract_strided_slice %550 {offsets = [0, 0], sizes = [2, 32], strides = [1, 1]} : vector<2x96xf32> to vector<2x32xf32>
    %554 = vector.extract_strided_slice %550 {offsets = [0, 32], sizes = [2, 32], strides = [1, 1]} : vector<2x96xf32> to vector<2x32xf32>
    %555 = vector.extract_strided_slice %550 {offsets = [0, 64], sizes = [2, 32], strides = [1, 1]} : vector<2x96xf32> to vector<2x32xf32>
    %556 = arith.mulf %554, %534 : vector<2x32xf32>
    %557 = arith.mulf %553, %552 : vector<2x32xf32>
    %558 = arith.addf %556, %557 : vector<2x32xf32>
    %559 = math.tanh %558 : vector<2x32xf32>
    %560 = arith.mulf %555, %559 : vector<2x32xf32>
    %561 = arith.index_cast %540 : i32 to index
    %c0_164 = arith.constant 0 : index
    %562 = vector.load %arg9[%561, %c0_164] : memref<16x32xf32, #tpu.memory_space<vmem>>, vector<2x32xf32>
    tpu.vector_store %arg9[%561, %c0_164], %560 {strides = array<i32>} : memref<16x32xf32, #tpu.memory_space<vmem>>, vector<2x32xf32>,
    %c6_i32_165 = arith.constant 6 : i32
    %c2_i32_166 = arith.constant 2 : i32
    %563 = arith.muli %c6_i32_165, %c2_i32_166 : i32
    %564 = tpu.assume_multiple %563, 2 : i32
    %565 = arith.index_cast %564 : i32 to index
    %c0_167 = arith.constant 0 : index
    %566 = vector.load %arg10[%565, %c0_167] : memref<16x128xf32, #tpu.memory_space<vmem>>, vector<2x128xf32>
    %cst_168 = arith.constant dense<0.000000e+00> : vector<2x128xf32>
    %567 = tpu.matmul %560, %417, %cst_168 {dimension_numbers = #tpu.dot_dimension_numbers<[1], [0], [0], [1], [0, 0, 1, 1], [], []>} : vector<2x32xf32>, vector<32x128xf32>, vector<2x128xf32> -> vector<2x128xf32>
    %568 = arith.addf %566, %567 : vector<2x128xf32>
    %569 = vector.extract_strided_slice %568 {offsets = [0, 0], sizes = [2, 96], strides = [1, 1]} : vector<2x128xf32> to vector<2x96xf32>
    %570 = arith.negf %569 : vector<2x96xf32>
    %571 = math.exp %570 : vector<2x96xf32>
    %cst_169 = arith.constant 1.000000e+00 : f32
    %572 = vector.broadcast %cst_169 : f32 to vector<2x96xf32>
    %573 = arith.addf %572, %571 : vector<2x96xf32>
    %574 = arith.divf %572, %573 : vector<2x96xf32>
    %575 = vector.extract_strided_slice %568 {offsets = [0, 96], sizes = [2, 32], strides = [1, 1]} : vector<2x128xf32> to vector<2x32xf32>
    %576 = math.tanh %575 : vector<2x32xf32>
    %577 = vector.extract_strided_slice %574 {offsets = [0, 0], sizes = [2, 32], strides = [1, 1]} : vector<2x96xf32> to vector<2x32xf32>
    %578 = vector.extract_strided_slice %574 {offsets = [0, 32], sizes = [2, 32], strides = [1, 1]} : vector<2x96xf32> to vector<2x32xf32>
    %579 = vector.extract_strided_slice %574 {offsets = [0, 64], sizes = [2, 32], strides = [1, 1]} : vector<2x96xf32> to vector<2x32xf32>
    %580 = arith.mulf %578, %558 : vector<2x32xf32>
    %581 = arith.mulf %577, %576 : vector<2x32xf32>
    %582 = arith.addf %580, %581 : vector<2x32xf32>
    %583 = math.tanh %582 : vector<2x32xf32>
    %584 = arith.mulf %579, %583 : vector<2x32xf32>
    %585 = arith.index_cast %564 : i32 to index
    %c0_170 = arith.constant 0 : index
    %586 = vector.load %arg9[%585, %c0_170] : memref<16x32xf32, #tpu.memory_space<vmem>>, vector<2x32xf32>
    tpu.vector_store %arg9[%585, %c0_170], %584 {strides = array<i32>} : memref<16x32xf32, #tpu.memory_space<vmem>>, vector<2x32xf32>,
    %c7_i32_171 = arith.constant 7 : i32
    %c2_i32_172 = arith.constant 2 : i32
    %587 = arith.muli %c7_i32_171, %c2_i32_172 : i32
    %588 = tpu.assume_multiple %587, 2 : i32
    %589 = arith.index_cast %588 : i32 to index
    %c0_173 = arith.constant 0 : index
    %590 = vector.load %arg10[%589, %c0_173] : memref<16x128xf32, #tpu.memory_space<vmem>>, vector<2x128xf32>
    %cst_174 = arith.constant dense<0.000000e+00> : vector<2x128xf32>
    %591 = tpu.matmul %584, %417, %cst_174 {dimension_numbers = #tpu.dot_dimension_numbers<[1], [0], [0], [1], [0, 0, 1, 1], [], []>} : vector<2x32xf32>, vector<32x128xf32>, vector<2x128xf32> -> vector<2x128xf32>
    %592 = arith.addf %590, %591 : vector<2x128xf32>
    %593 = vector.extract_strided_slice %592 {offsets = [0, 0], sizes = [2, 96], strides = [1, 1]} : vector<2x128xf32> to vector<2x96xf32>
    %594 = arith.negf %593 : vector<2x96xf32>
    %595 = math.exp %594 : vector<2x96xf32>
    %cst_175 = arith.constant 1.000000e+00 : f32
    %596 = vector.broadcast %cst_175 : f32 to vector<2x96xf32>
    %597 = arith.addf %596, %595 : vector<2x96xf32>
    %598 = arith.divf %596, %597 : vector<2x96xf32>
    %599 = vector.extract_strided_slice %592 {offsets = [0, 96], sizes = [2, 32], strides = [1, 1]} : vector<2x128xf32> to vector<2x32xf32>
    %600 = math.tanh %599 : vector<2x32xf32>
    %601 = vector.extract_strided_slice %598 {offsets = [0, 0], sizes = [2, 32], strides = [1, 1]} : vector<2x96xf32> to vector<2x32xf32>
    %602 = vector.extract_strided_slice %598 {offsets = [0, 32], sizes = [2, 32], strides = [1, 1]} : vector<2x96xf32> to vector<2x32xf32>
    %603 = vector.extract_strided_slice %598 {offsets = [0, 64], sizes = [2, 32], strides = [1, 1]} : vector<2x96xf32> to vector<2x32xf32>
    %604 = arith.mulf %602, %582 : vector<2x32xf32>
    %605 = arith.mulf %601, %600 : vector<2x32xf32>
    %606 = arith.addf %604, %605 : vector<2x32xf32>
    %607 = math.tanh %606 : vector<2x32xf32>
    %608 = arith.mulf %603, %607 : vector<2x32xf32>
    %609 = arith.index_cast %588 : i32 to index
    %c0_176 = arith.constant 0 : index
    %610 = vector.load %arg9[%609, %c0_176] : memref<16x32xf32, #tpu.memory_space<vmem>>, vector<2x32xf32>
    tpu.vector_store %arg9[%609, %c0_176], %608 {strides = array<i32>} : memref<16x32xf32, #tpu.memory_space<vmem>>, vector<2x32xf32>,
    %c8_i32_177 = arith.constant 8 : i32
    %c0_178 = arith.constant 0 : index
    %c0_179 = arith.constant 0 : index
    %611 = vector.load %arg9[%c0_178, %c0_179] : memref<16x32xf32, #tpu.memory_space<vmem>>, vector<16x32xf32>
    %c2_180 = arith.constant 2 : index
    %c0_181 = arith.constant 0 : index
    %c0_182 = arith.constant 0 : index
    %612 = vector.load %arg3[%c2_180, %c0_181, %c0_182] : memref<4x32x128xf32, #tpu.memory_space<vmem>>, vector<1x32x128xf32>
    %613 = vector.shape_cast %612 : vector<1x32x128xf32> to vector<32x128xf32>
    %cst_183 = arith.constant dense<0.000000e+00> : vector<16x128xf32>
    %614 = tpu.matmul %611, %613, %cst_183 {dimension_numbers = #tpu.dot_dimension_numbers<[1], [0], [0], [1], [0, 0, 1, 1], [], []>} : vector<16x32xf32>, vector<32x128xf32>, vector<16x128xf32> -> vector<16x128xf32>
    %c3 = arith.constant 3 : index
    %c0_184 = arith.constant 0 : index
    %c0_185 = arith.constant 0 : index
    %615 = vector.load %arg5[%c3, %c0_184, %c0_185] : memref<5x1x128xf32, #tpu.memory_space<vmem>>, vector<1x1x128xf32>
    %616 = vector.shape_cast %615 : vector<1x1x128xf32> to vector<1x128xf32>
    %617 = vector.broadcast %616 : vector<1x128xf32> to vector<16x128xf32>
    %618 = arith.addf %614, %617 : vector<16x128xf32>
    %c0_186 = arith.constant 0 : index
    %c0_187 = arith.constant 0 : index
    %619 = vector.load %arg10[%c0_186, %c0_187] : memref<16x128xf32, #tpu.memory_space<vmem>>, vector<16x128xf32>
    tpu.vector_store %arg10[%c0_186, %c0_187], %618 {strides = array<i32>} : memref<16x128xf32, #tpu.memory_space<vmem>>, vector<16x128xf32>,
    %c3_188 = arith.constant 3 : index
    %c0_189 = arith.constant 0 : index
    %c0_190 = arith.constant 0 : index
    %620 = vector.load %arg4[%c3_188, %c0_189, %c0_190] : memref<5x32x128xf32, #tpu.memory_space<vmem>>, vector<1x32x128xf32>
    %621 = vector.shape_cast %620 : vector<1x32x128xf32> to vector<32x128xf32>
    %cst_191 = arith.constant 0.000000e+00 : f32
    %622 = vector.broadcast %cst_191 : f32 to vector<2x32xf32>
    %c0_i32_192 = arith.constant 0 : i32
    %c2_i32_193 = arith.constant 2 : i32
    %623 = arith.muli %c0_i32_192, %c2_i32_193 : i32
    %624 = tpu.assume_multiple %623, 2 : i32
    %625 = arith.index_cast %624 : i32 to index
    %c0_194 = arith.constant 0 : index
    %626 = vector.load %arg10[%625, %c0_194] : memref<16x128xf32, #tpu.memory_space<vmem>>, vector<2x128xf32>
    %cst_195 = arith.constant dense<0.000000e+00> : vector<2x128xf32>
    %627 = tpu.matmul %622, %621, %cst_195 {dimension_numbers = #tpu.dot_dimension_numbers<[1], [0], [0], [1], [0, 0, 1, 1], [], []>} : vector<2x32xf32>, vector<32x128xf32>, vector<2x128xf32> -> vector<2x128xf32>
    %628 = arith.addf %626, %627 : vector<2x128xf32>
    %629 = vector.extract_strided_slice %628 {offsets = [0, 0], sizes = [2, 96], strides = [1, 1]} : vector<2x128xf32> to vector<2x96xf32>
    %630 = arith.negf %629 : vector<2x96xf32>
    %631 = math.exp %630 : vector<2x96xf32>
    %cst_196 = arith.constant 1.000000e+00 : f32
    %632 = vector.broadcast %cst_196 : f32 to vector<2x96xf32>
    %633 = arith.addf %632, %631 : vector<2x96xf32>
    %634 = arith.divf %632, %633 : vector<2x96xf32>
    %635 = vector.extract_strided_slice %628 {offsets = [0, 96], sizes = [2, 32], strides = [1, 1]} : vector<2x128xf32> to vector<2x32xf32>
    %636 = math.tanh %635 : vector<2x32xf32>
    %637 = vector.extract_strided_slice %634 {offsets = [0, 0], sizes = [2, 32], strides = [1, 1]} : vector<2x96xf32> to vector<2x32xf32>
    %638 = vector.extract_strided_slice %634 {offsets = [0, 32], sizes = [2, 32], strides = [1, 1]} : vector<2x96xf32> to vector<2x32xf32>
    %639 = vector.extract_strided_slice %634 {offsets = [0, 64], sizes = [2, 32], strides = [1, 1]} : vector<2x96xf32> to vector<2x32xf32>
    %640 = arith.mulf %638, %622 : vector<2x32xf32>
    %641 = arith.mulf %637, %636 : vector<2x32xf32>
    %642 = arith.addf %640, %641 : vector<2x32xf32>
    %643 = math.tanh %642 : vector<2x32xf32>
    %644 = arith.mulf %639, %643 : vector<2x32xf32>
    %645 = arith.index_cast %624 : i32 to index
    %c0_197 = arith.constant 0 : index
    %646 = vector.load %arg9[%645, %c0_197] : memref<16x32xf32, #tpu.memory_space<vmem>>, vector<2x32xf32>
    tpu.vector_store %arg9[%645, %c0_197], %644 {strides = array<i32>} : memref<16x32xf32, #tpu.memory_space<vmem>>, vector<2x32xf32>,
    %c1_i32_198 = arith.constant 1 : i32
    %c2_i32_199 = arith.constant 2 : i32
    %647 = arith.muli %c1_i32_198, %c2_i32_199 : i32
    %648 = tpu.assume_multiple %647, 2 : i32
    %649 = arith.index_cast %648 : i32 to index
    %c0_200 = arith.constant 0 : index
    %650 = vector.load %arg10[%649, %c0_200] : memref<16x128xf32, #tpu.memory_space<vmem>>, vector<2x128xf32>
    %cst_201 = arith.constant dense<0.000000e+00> : vector<2x128xf32>
    %651 = tpu.matmul %644, %621, %cst_201 {dimension_numbers = #tpu.dot_dimension_numbers<[1], [0], [0], [1], [0, 0, 1, 1], [], []>} : vector<2x32xf32>, vector<32x128xf32>, vector<2x128xf32> -> vector<2x128xf32>
    %652 = arith.addf %650, %651 : vector<2x128xf32>
    %653 = vector.extract_strided_slice %652 {offsets = [0, 0], sizes = [2, 96], strides = [1, 1]} : vector<2x128xf32> to vector<2x96xf32>
    %654 = arith.negf %653 : vector<2x96xf32>
    %655 = math.exp %654 : vector<2x96xf32>
    %cst_202 = arith.constant 1.000000e+00 : f32
    %656 = vector.broadcast %cst_202 : f32 to vector<2x96xf32>
    %657 = arith.addf %656, %655 : vector<2x96xf32>
    %658 = arith.divf %656, %657 : vector<2x96xf32>
    %659 = vector.extract_strided_slice %652 {offsets = [0, 96], sizes = [2, 32], strides = [1, 1]} : vector<2x128xf32> to vector<2x32xf32>
    %660 = math.tanh %659 : vector<2x32xf32>
    %661 = vector.extract_strided_slice %658 {offsets = [0, 0], sizes = [2, 32], strides = [1, 1]} : vector<2x96xf32> to vector<2x32xf32>
    %662 = vector.extract_strided_slice %658 {offsets = [0, 32], sizes = [2, 32], strides = [1, 1]} : vector<2x96xf32> to vector<2x32xf32>
    %663 = vector.extract_strided_slice %658 {offsets = [0, 64], sizes = [2, 32], strides = [1, 1]} : vector<2x96xf32> to vector<2x32xf32>
    %664 = arith.mulf %662, %642 : vector<2x32xf32>
    %665 = arith.mulf %661, %660 : vector<2x32xf32>
    %666 = arith.addf %664, %665 : vector<2x32xf32>
    %667 = math.tanh %666 : vector<2x32xf32>
    %668 = arith.mulf %663, %667 : vector<2x32xf32>
    %669 = arith.index_cast %648 : i32 to index
    %c0_203 = arith.constant 0 : index
    %670 = vector.load %arg9[%669, %c0_203] : memref<16x32xf32, #tpu.memory_space<vmem>>, vector<2x32xf32>
    tpu.vector_store %arg9[%669, %c0_203], %668 {strides = array<i32>} : memref<16x32xf32, #tpu.memory_space<vmem>>, vector<2x32xf32>,
    %c2_i32_204 = arith.constant 2 : i32
    %c2_i32_205 = arith.constant 2 : i32
    %671 = arith.muli %c2_i32_204, %c2_i32_205 : i32
    %672 = tpu.assume_multiple %671, 2 : i32
    %673 = arith.index_cast %672 : i32 to index
    %c0_206 = arith.constant 0 : index
    %674 = vector.load %arg10[%673, %c0_206] : memref<16x128xf32, #tpu.memory_space<vmem>>, vector<2x128xf32>
    %cst_207 = arith.constant dense<0.000000e+00> : vector<2x128xf32>
    %675 = tpu.matmul %668, %621, %cst_207 {dimension_numbers = #tpu.dot_dimension_numbers<[1], [0], [0], [1], [0, 0, 1, 1], [], []>} : vector<2x32xf32>, vector<32x128xf32>, vector<2x128xf32> -> vector<2x128xf32>
    %676 = arith.addf %674, %675 : vector<2x128xf32>
    %677 = vector.extract_strided_slice %676 {offsets = [0, 0], sizes = [2, 96], strides = [1, 1]} : vector<2x128xf32> to vector<2x96xf32>
    %678 = arith.negf %677 : vector<2x96xf32>
    %679 = math.exp %678 : vector<2x96xf32>
    %cst_208 = arith.constant 1.000000e+00 : f32
    %680 = vector.broadcast %cst_208 : f32 to vector<2x96xf32>
    %681 = arith.addf %680, %679 : vector<2x96xf32>
    %682 = arith.divf %680, %681 : vector<2x96xf32>
    %683 = vector.extract_strided_slice %676 {offsets = [0, 96], sizes = [2, 32], strides = [1, 1]} : vector<2x128xf32> to vector<2x32xf32>
    %684 = math.tanh %683 : vector<2x32xf32>
    %685 = vector.extract_strided_slice %682 {offsets = [0, 0], sizes = [2, 32], strides = [1, 1]} : vector<2x96xf32> to vector<2x32xf32>
    %686 = vector.extract_strided_slice %682 {offsets = [0, 32], sizes = [2, 32], strides = [1, 1]} : vector<2x96xf32> to vector<2x32xf32>
    %687 = vector.extract_strided_slice %682 {offsets = [0, 64], sizes = [2, 32], strides = [1, 1]} : vector<2x96xf32> to vector<2x32xf32>
    %688 = arith.mulf %686, %666 : vector<2x32xf32>
    %689 = arith.mulf %685, %684 : vector<2x32xf32>
    %690 = arith.addf %688, %689 : vector<2x32xf32>
    %691 = math.tanh %690 : vector<2x32xf32>
    %692 = arith.mulf %687, %691 : vector<2x32xf32>
    %693 = arith.index_cast %672 : i32 to index
    %c0_209 = arith.constant 0 : index
    %694 = vector.load %arg9[%693, %c0_209] : memref<16x32xf32, #tpu.memory_space<vmem>>, vector<2x32xf32>
    tpu.vector_store %arg9[%693, %c0_209], %692 {strides = array<i32>} : memref<16x32xf32, #tpu.memory_space<vmem>>, vector<2x32xf32>,
    %c3_i32_210 = arith.constant 3 : i32
    %c2_i32_211 = arith.constant 2 : i32
    %695 = arith.muli %c3_i32_210, %c2_i32_211 : i32
    %696 = tpu.assume_multiple %695, 2 : i32
    %697 = arith.index_cast %696 : i32 to index
    %c0_212 = arith.constant 0 : index
    %698 = vector.load %arg10[%697, %c0_212] : memref<16x128xf32, #tpu.memory_space<vmem>>, vector<2x128xf32>
    %cst_213 = arith.constant dense<0.000000e+00> : vector<2x128xf32>
    %699 = tpu.matmul %692, %621, %cst_213 {dimension_numbers = #tpu.dot_dimension_numbers<[1], [0], [0], [1], [0, 0, 1, 1], [], []>} : vector<2x32xf32>, vector<32x128xf32>, vector<2x128xf32> -> vector<2x128xf32>
    %700 = arith.addf %698, %699 : vector<2x128xf32>
    %701 = vector.extract_strided_slice %700 {offsets = [0, 0], sizes = [2, 96], strides = [1, 1]} : vector<2x128xf32> to vector<2x96xf32>
    %702 = arith.negf %701 : vector<2x96xf32>
    %703 = math.exp %702 : vector<2x96xf32>
    %cst_214 = arith.constant 1.000000e+00 : f32
    %704 = vector.broadcast %cst_214 : f32 to vector<2x96xf32>
    %705 = arith.addf %704, %703 : vector<2x96xf32>
    %706 = arith.divf %704, %705 : vector<2x96xf32>
    %707 = vector.extract_strided_slice %700 {offsets = [0, 96], sizes = [2, 32], strides = [1, 1]} : vector<2x128xf32> to vector<2x32xf32>
    %708 = math.tanh %707 : vector<2x32xf32>
    %709 = vector.extract_strided_slice %706 {offsets = [0, 0], sizes = [2, 32], strides = [1, 1]} : vector<2x96xf32> to vector<2x32xf32>
    %710 = vector.extract_strided_slice %706 {offsets = [0, 32], sizes = [2, 32], strides = [1, 1]} : vector<2x96xf32> to vector<2x32xf32>
    %711 = vector.extract_strided_slice %706 {offsets = [0, 64], sizes = [2, 32], strides = [1, 1]} : vector<2x96xf32> to vector<2x32xf32>
    %712 = arith.mulf %710, %690 : vector<2x32xf32>
    %713 = arith.mulf %709, %708 : vector<2x32xf32>
    %714 = arith.addf %712, %713 : vector<2x32xf32>
    %715 = math.tanh %714 : vector<2x32xf32>
    %716 = arith.mulf %711, %715 : vector<2x32xf32>
    %717 = arith.index_cast %696 : i32 to index
    %c0_215 = arith.constant 0 : index
    %718 = vector.load %arg9[%717, %c0_215] : memref<16x32xf32, #tpu.memory_space<vmem>>, vector<2x32xf32>
    tpu.vector_store %arg9[%717, %c0_215], %716 {strides = array<i32>} : memref<16x32xf32, #tpu.memory_space<vmem>>, vector<2x32xf32>,
    %c4_i32_216 = arith.constant 4 : i32
    %c2_i32_217 = arith.constant 2 : i32
    %719 = arith.muli %c4_i32_216, %c2_i32_217 : i32
    %720 = tpu.assume_multiple %719, 2 : i32
    %721 = arith.index_cast %720 : i32 to index
    %c0_218 = arith.constant 0 : index
    %722 = vector.load %arg10[%721, %c0_218] : memref<16x128xf32, #tpu.memory_space<vmem>>, vector<2x128xf32>
    %cst_219 = arith.constant dense<0.000000e+00> : vector<2x128xf32>
    %723 = tpu.matmul %716, %621, %cst_219 {dimension_numbers = #tpu.dot_dimension_numbers<[1], [0], [0], [1], [0, 0, 1, 1], [], []>} : vector<2x32xf32>, vector<32x128xf32>, vector<2x128xf32> -> vector<2x128xf32>
    %724 = arith.addf %722, %723 : vector<2x128xf32>
    %725 = vector.extract_strided_slice %724 {offsets = [0, 0], sizes = [2, 96], strides = [1, 1]} : vector<2x128xf32> to vector<2x96xf32>
    %726 = arith.negf %725 : vector<2x96xf32>
    %727 = math.exp %726 : vector<2x96xf32>
    %cst_220 = arith.constant 1.000000e+00 : f32
    %728 = vector.broadcast %cst_220 : f32 to vector<2x96xf32>
    %729 = arith.addf %728, %727 : vector<2x96xf32>
    %730 = arith.divf %728, %729 : vector<2x96xf32>
    %731 = vector.extract_strided_slice %724 {offsets = [0, 96], sizes = [2, 32], strides = [1, 1]} : vector<2x128xf32> to vector<2x32xf32>
    %732 = math.tanh %731 : vector<2x32xf32>
    %733 = vector.extract_strided_slice %730 {offsets = [0, 0], sizes = [2, 32], strides = [1, 1]} : vector<2x96xf32> to vector<2x32xf32>
    %734 = vector.extract_strided_slice %730 {offsets = [0, 32], sizes = [2, 32], strides = [1, 1]} : vector<2x96xf32> to vector<2x32xf32>
    %735 = vector.extract_strided_slice %730 {offsets = [0, 64], sizes = [2, 32], strides = [1, 1]} : vector<2x96xf32> to vector<2x32xf32>
    %736 = arith.mulf %734, %714 : vector<2x32xf32>
    %737 = arith.mulf %733, %732 : vector<2x32xf32>
    %738 = arith.addf %736, %737 : vector<2x32xf32>
    %739 = math.tanh %738 : vector<2x32xf32>
    %740 = arith.mulf %735, %739 : vector<2x32xf32>
    %741 = arith.index_cast %720 : i32 to index
    %c0_221 = arith.constant 0 : index
    %742 = vector.load %arg9[%741, %c0_221] : memref<16x32xf32, #tpu.memory_space<vmem>>, vector<2x32xf32>
    tpu.vector_store %arg9[%741, %c0_221], %740 {strides = array<i32>} : memref<16x32xf32, #tpu.memory_space<vmem>>, vector<2x32xf32>,
    %c5_i32_222 = arith.constant 5 : i32
    %c2_i32_223 = arith.constant 2 : i32
    %743 = arith.muli %c5_i32_222, %c2_i32_223 : i32
    %744 = tpu.assume_multiple %743, 2 : i32
    %745 = arith.index_cast %744 : i32 to index
    %c0_224 = arith.constant 0 : index
    %746 = vector.load %arg10[%745, %c0_224] : memref<16x128xf32, #tpu.memory_space<vmem>>, vector<2x128xf32>
    %cst_225 = arith.constant dense<0.000000e+00> : vector<2x128xf32>
    %747 = tpu.matmul %740, %621, %cst_225 {dimension_numbers = #tpu.dot_dimension_numbers<[1], [0], [0], [1], [0, 0, 1, 1], [], []>} : vector<2x32xf32>, vector<32x128xf32>, vector<2x128xf32> -> vector<2x128xf32>
    %748 = arith.addf %746, %747 : vector<2x128xf32>
    %749 = vector.extract_strided_slice %748 {offsets = [0, 0], sizes = [2, 96], strides = [1, 1]} : vector<2x128xf32> to vector<2x96xf32>
    %750 = arith.negf %749 : vector<2x96xf32>
    %751 = math.exp %750 : vector<2x96xf32>
    %cst_226 = arith.constant 1.000000e+00 : f32
    %752 = vector.broadcast %cst_226 : f32 to vector<2x96xf32>
    %753 = arith.addf %752, %751 : vector<2x96xf32>
    %754 = arith.divf %752, %753 : vector<2x96xf32>
    %755 = vector.extract_strided_slice %748 {offsets = [0, 96], sizes = [2, 32], strides = [1, 1]} : vector<2x128xf32> to vector<2x32xf32>
    %756 = math.tanh %755 : vector<2x32xf32>
    %757 = vector.extract_strided_slice %754 {offsets = [0, 0], sizes = [2, 32], strides = [1, 1]} : vector<2x96xf32> to vector<2x32xf32>
    %758 = vector.extract_strided_slice %754 {offsets = [0, 32], sizes = [2, 32], strides = [1, 1]} : vector<2x96xf32> to vector<2x32xf32>
    %759 = vector.extract_strided_slice %754 {offsets = [0, 64], sizes = [2, 32], strides = [1, 1]} : vector<2x96xf32> to vector<2x32xf32>
    %760 = arith.mulf %758, %738 : vector<2x32xf32>
    %761 = arith.mulf %757, %756 : vector<2x32xf32>
    %762 = arith.addf %760, %761 : vector<2x32xf32>
    %763 = math.tanh %762 : vector<2x32xf32>
    %764 = arith.mulf %759, %763 : vector<2x32xf32>
    %765 = arith.index_cast %744 : i32 to index
    %c0_227 = arith.constant 0 : index
    %766 = vector.load %arg9[%765, %c0_227] : memref<16x32xf32, #tpu.memory_space<vmem>>, vector<2x32xf32>
    tpu.vector_store %arg9[%765, %c0_227], %764 {strides = array<i32>} : memref<16x32xf32, #tpu.memory_space<vmem>>, vector<2x32xf32>,
    %c6_i32_228 = arith.constant 6 : i32
    %c2_i32_229 = arith.constant 2 : i32
    %767 = arith.muli %c6_i32_228, %c2_i32_229 : i32
    %768 = tpu.assume_multiple %767, 2 : i32
    %769 = arith.index_cast %768 : i32 to index
    %c0_230 = arith.constant 0 : index
    %770 = vector.load %arg10[%769, %c0_230] : memref<16x128xf32, #tpu.memory_space<vmem>>, vector<2x128xf32>
    %cst_231 = arith.constant dense<0.000000e+00> : vector<2x128xf32>
    %771 = tpu.matmul %764, %621, %cst_231 {dimension_numbers = #tpu.dot_dimension_numbers<[1], [0], [0], [1], [0, 0, 1, 1], [], []>} : vector<2x32xf32>, vector<32x128xf32>, vector<2x128xf32> -> vector<2x128xf32>
    %772 = arith.addf %770, %771 : vector<2x128xf32>
    %773 = vector.extract_strided_slice %772 {offsets = [0, 0], sizes = [2, 96], strides = [1, 1]} : vector<2x128xf32> to vector<2x96xf32>
    %774 = arith.negf %773 : vector<2x96xf32>
    %775 = math.exp %774 : vector<2x96xf32>
    %cst_232 = arith.constant 1.000000e+00 : f32
    %776 = vector.broadcast %cst_232 : f32 to vector<2x96xf32>
    %777 = arith.addf %776, %775 : vector<2x96xf32>
    %778 = arith.divf %776, %777 : vector<2x96xf32>
    %779 = vector.extract_strided_slice %772 {offsets = [0, 96], sizes = [2, 32], strides = [1, 1]} : vector<2x128xf32> to vector<2x32xf32>
    %780 = math.tanh %779 : vector<2x32xf32>
    %781 = vector.extract_strided_slice %778 {offsets = [0, 0], sizes = [2, 32], strides = [1, 1]} : vector<2x96xf32> to vector<2x32xf32>
    %782 = vector.extract_strided_slice %778 {offsets = [0, 32], sizes = [2, 32], strides = [1, 1]} : vector<2x96xf32> to vector<2x32xf32>
    %783 = vector.extract_strided_slice %778 {offsets = [0, 64], sizes = [2, 32], strides = [1, 1]} : vector<2x96xf32> to vector<2x32xf32>
    %784 = arith.mulf %782, %762 : vector<2x32xf32>
    %785 = arith.mulf %781, %780 : vector<2x32xf32>
    %786 = arith.addf %784, %785 : vector<2x32xf32>
    %787 = math.tanh %786 : vector<2x32xf32>
    %788 = arith.mulf %783, %787 : vector<2x32xf32>
    %789 = arith.index_cast %768 : i32 to index
    %c0_233 = arith.constant 0 : index
    %790 = vector.load %arg9[%789, %c0_233] : memref<16x32xf32, #tpu.memory_space<vmem>>, vector<2x32xf32>
    tpu.vector_store %arg9[%789, %c0_233], %788 {strides = array<i32>} : memref<16x32xf32, #tpu.memory_space<vmem>>, vector<2x32xf32>,
    %c7_i32_234 = arith.constant 7 : i32
    %c2_i32_235 = arith.constant 2 : i32
    %791 = arith.muli %c7_i32_234, %c2_i32_235 : i32
    %792 = tpu.assume_multiple %791, 2 : i32
    %793 = arith.index_cast %792 : i32 to index
    %c0_236 = arith.constant 0 : index
    %794 = vector.load %arg10[%793, %c0_236] : memref<16x128xf32, #tpu.memory_space<vmem>>, vector<2x128xf32>
    %cst_237 = arith.constant dense<0.000000e+00> : vector<2x128xf32>
    %795 = tpu.matmul %788, %621, %cst_237 {dimension_numbers = #tpu.dot_dimension_numbers<[1], [0], [0], [1], [0, 0, 1, 1], [], []>} : vector<2x32xf32>, vector<32x128xf32>, vector<2x128xf32> -> vector<2x128xf32>
    %796 = arith.addf %794, %795 : vector<2x128xf32>
    %797 = vector.extract_strided_slice %796 {offsets = [0, 0], sizes = [2, 96], strides = [1, 1]} : vector<2x128xf32> to vector<2x96xf32>
    %798 = arith.negf %797 : vector<2x96xf32>
    %799 = math.exp %798 : vector<2x96xf32>
    %cst_238 = arith.constant 1.000000e+00 : f32
    %800 = vector.broadcast %cst_238 : f32 to vector<2x96xf32>
    %801 = arith.addf %800, %799 : vector<2x96xf32>
    %802 = arith.divf %800, %801 : vector<2x96xf32>
    %803 = vector.extract_strided_slice %796 {offsets = [0, 96], sizes = [2, 32], strides = [1, 1]} : vector<2x128xf32> to vector<2x32xf32>
    %804 = math.tanh %803 : vector<2x32xf32>
    %805 = vector.extract_strided_slice %802 {offsets = [0, 0], sizes = [2, 32], strides = [1, 1]} : vector<2x96xf32> to vector<2x32xf32>
    %806 = vector.extract_strided_slice %802 {offsets = [0, 32], sizes = [2, 32], strides = [1, 1]} : vector<2x96xf32> to vector<2x32xf32>
    %807 = vector.extract_strided_slice %802 {offsets = [0, 64], sizes = [2, 32], strides = [1, 1]} : vector<2x96xf32> to vector<2x32xf32>
    %808 = arith.mulf %806, %786 : vector<2x32xf32>
    %809 = arith.mulf %805, %804 : vector<2x32xf32>
    %810 = arith.addf %808, %809 : vector<2x32xf32>
    %811 = math.tanh %810 : vector<2x32xf32>
    %812 = arith.mulf %807, %811 : vector<2x32xf32>
    %813 = arith.index_cast %792 : i32 to index
    %c0_239 = arith.constant 0 : index
    %814 = vector.load %arg9[%813, %c0_239] : memref<16x32xf32, #tpu.memory_space<vmem>>, vector<2x32xf32>
    tpu.vector_store %arg9[%813, %c0_239], %812 {strides = array<i32>} : memref<16x32xf32, #tpu.memory_space<vmem>>, vector<2x32xf32>,
    %c8_i32_240 = arith.constant 8 : i32
    %c0_241 = arith.constant 0 : index
    %c0_242 = arith.constant 0 : index
    %815 = vector.load %arg9[%c0_241, %c0_242] : memref<16x32xf32, #tpu.memory_space<vmem>>, vector<16x32xf32>
    %c3_243 = arith.constant 3 : index
    %c0_244 = arith.constant 0 : index
    %c0_245 = arith.constant 0 : index
    %816 = vector.load %arg3[%c3_243, %c0_244, %c0_245] : memref<4x32x128xf32, #tpu.memory_space<vmem>>, vector<1x32x128xf32>
    %817 = vector.shape_cast %816 : vector<1x32x128xf32> to vector<32x128xf32>
    %cst_246 = arith.constant dense<0.000000e+00> : vector<16x128xf32>
    %818 = tpu.matmul %815, %817, %cst_246 {dimension_numbers = #tpu.dot_dimension_numbers<[1], [0], [0], [1], [0, 0, 1, 1], [], []>} : vector<16x32xf32>, vector<32x128xf32>, vector<16x128xf32> -> vector<16x128xf32>
    %c4 = arith.constant 4 : index
    %c0_247 = arith.constant 0 : index
    %c0_248 = arith.constant 0 : index
    %819 = vector.load %arg5[%c4, %c0_247, %c0_248] : memref<5x1x128xf32, #tpu.memory_space<vmem>>, vector<1x1x128xf32>
    %820 = vector.shape_cast %819 : vector<1x1x128xf32> to vector<1x128xf32>
    %821 = vector.broadcast %820 : vector<1x128xf32> to vector<16x128xf32>
    %822 = arith.addf %818, %821 : vector<16x128xf32>
    %c0_249 = arith.constant 0 : index
    %c0_250 = arith.constant 0 : index
    %823 = vector.load %arg10[%c0_249, %c0_250] : memref<16x128xf32, #tpu.memory_space<vmem>>, vector<16x128xf32>
    tpu.vector_store %arg10[%c0_249, %c0_250], %822 {strides = array<i32>} : memref<16x128xf32, #tpu.memory_space<vmem>>, vector<16x128xf32>,
    %c4_251 = arith.constant 4 : index
    %c0_252 = arith.constant 0 : index
    %c0_253 = arith.constant 0 : index
    %824 = vector.load %arg4[%c4_251, %c0_252, %c0_253] : memref<5x32x128xf32, #tpu.memory_space<vmem>>, vector<1x32x128xf32>
    %825 = vector.shape_cast %824 : vector<1x32x128xf32> to vector<32x128xf32>
    %cst_254 = arith.constant 0.000000e+00 : f32
    %826 = vector.broadcast %cst_254 : f32 to vector<2x32xf32>
    %c0_i32_255 = arith.constant 0 : i32
    %c2_i32_256 = arith.constant 2 : i32
    %827 = arith.muli %c0_i32_255, %c2_i32_256 : i32
    %828 = tpu.assume_multiple %827, 2 : i32
    %829 = arith.index_cast %828 : i32 to index
    %c0_257 = arith.constant 0 : index
    %830 = vector.load %arg10[%829, %c0_257] : memref<16x128xf32, #tpu.memory_space<vmem>>, vector<2x128xf32>
    %cst_258 = arith.constant dense<0.000000e+00> : vector<2x128xf32>
    %831 = tpu.matmul %826, %825, %cst_258 {dimension_numbers = #tpu.dot_dimension_numbers<[1], [0], [0], [1], [0, 0, 1, 1], [], []>} : vector<2x32xf32>, vector<32x128xf32>, vector<2x128xf32> -> vector<2x128xf32>
    %832 = arith.addf %830, %831 : vector<2x128xf32>
    %833 = vector.extract_strided_slice %832 {offsets = [0, 0], sizes = [2, 96], strides = [1, 1]} : vector<2x128xf32> to vector<2x96xf32>
    %834 = arith.negf %833 : vector<2x96xf32>
    %835 = math.exp %834 : vector<2x96xf32>
    %cst_259 = arith.constant 1.000000e+00 : f32
    %836 = vector.broadcast %cst_259 : f32 to vector<2x96xf32>
    %837 = arith.addf %836, %835 : vector<2x96xf32>
    %838 = arith.divf %836, %837 : vector<2x96xf32>
    %839 = vector.extract_strided_slice %832 {offsets = [0, 96], sizes = [2, 32], strides = [1, 1]} : vector<2x128xf32> to vector<2x32xf32>
    %840 = math.tanh %839 : vector<2x32xf32>
    %841 = vector.extract_strided_slice %838 {offsets = [0, 0], sizes = [2, 32], strides = [1, 1]} : vector<2x96xf32> to vector<2x32xf32>
    %842 = vector.extract_strided_slice %838 {offsets = [0, 32], sizes = [2, 32], strides = [1, 1]} : vector<2x96xf32> to vector<2x32xf32>
    %843 = vector.extract_strided_slice %838 {offsets = [0, 64], sizes = [2, 32], strides = [1, 1]} : vector<2x96xf32> to vector<2x32xf32>
    %844 = arith.mulf %842, %826 : vector<2x32xf32>
    %845 = arith.mulf %841, %840 : vector<2x32xf32>
    %846 = arith.addf %844, %845 : vector<2x32xf32>
    %847 = math.tanh %846 : vector<2x32xf32>
    %848 = arith.mulf %843, %847 : vector<2x32xf32>
    %849 = arith.index_cast %828 : i32 to index
    %c0_260 = arith.constant 0 : index
    %850 = vector.load %arg9[%849, %c0_260] : memref<16x32xf32, #tpu.memory_space<vmem>>, vector<2x32xf32>
    tpu.vector_store %arg9[%849, %c0_260], %848 {strides = array<i32>} : memref<16x32xf32, #tpu.memory_space<vmem>>, vector<2x32xf32>,
    %c1_i32_261 = arith.constant 1 : i32
    %c2_i32_262 = arith.constant 2 : i32
    %851 = arith.muli %c1_i32_261, %c2_i32_262 : i32
    %852 = tpu.assume_multiple %851, 2 : i32
    %853 = arith.index_cast %852 : i32 to index
    %c0_263 = arith.constant 0 : index
    %854 = vector.load %arg10[%853, %c0_263] : memref<16x128xf32, #tpu.memory_space<vmem>>, vector<2x128xf32>
    %cst_264 = arith.constant dense<0.000000e+00> : vector<2x128xf32>
    %855 = tpu.matmul %848, %825, %cst_264 {dimension_numbers = #tpu.dot_dimension_numbers<[1], [0], [0], [1], [0, 0, 1, 1], [], []>} : vector<2x32xf32>, vector<32x128xf32>, vector<2x128xf32> -> vector<2x128xf32>
    %856 = arith.addf %854, %855 : vector<2x128xf32>
    %857 = vector.extract_strided_slice %856 {offsets = [0, 0], sizes = [2, 96], strides = [1, 1]} : vector<2x128xf32> to vector<2x96xf32>
    %858 = arith.negf %857 : vector<2x96xf32>
    %859 = math.exp %858 : vector<2x96xf32>
    %cst_265 = arith.constant 1.000000e+00 : f32
    %860 = vector.broadcast %cst_265 : f32 to vector<2x96xf32>
    %861 = arith.addf %860, %859 : vector<2x96xf32>
    %862 = arith.divf %860, %861 : vector<2x96xf32>
    %863 = vector.extract_strided_slice %856 {offsets = [0, 96], sizes = [2, 32], strides = [1, 1]} : vector<2x128xf32> to vector<2x32xf32>
    %864 = math.tanh %863 : vector<2x32xf32>
    %865 = vector.extract_strided_slice %862 {offsets = [0, 0], sizes = [2, 32], strides = [1, 1]} : vector<2x96xf32> to vector<2x32xf32>
    %866 = vector.extract_strided_slice %862 {offsets = [0, 32], sizes = [2, 32], strides = [1, 1]} : vector<2x96xf32> to vector<2x32xf32>
    %867 = vector.extract_strided_slice %862 {offsets = [0, 64], sizes = [2, 32], strides = [1, 1]} : vector<2x96xf32> to vector<2x32xf32>
    %868 = arith.mulf %866, %846 : vector<2x32xf32>
    %869 = arith.mulf %865, %864 : vector<2x32xf32>
    %870 = arith.addf %868, %869 : vector<2x32xf32>
    %871 = math.tanh %870 : vector<2x32xf32>
    %872 = arith.mulf %867, %871 : vector<2x32xf32>
    %873 = arith.index_cast %852 : i32 to index
    %c0_266 = arith.constant 0 : index
    %874 = vector.load %arg9[%873, %c0_266] : memref<16x32xf32, #tpu.memory_space<vmem>>, vector<2x32xf32>
    tpu.vector_store %arg9[%873, %c0_266], %872 {strides = array<i32>} : memref<16x32xf32, #tpu.memory_space<vmem>>, vector<2x32xf32>,
    %c2_i32_267 = arith.constant 2 : i32
    %c2_i32_268 = arith.constant 2 : i32
    %875 = arith.muli %c2_i32_267, %c2_i32_268 : i32
    %876 = tpu.assume_multiple %875, 2 : i32
    %877 = arith.index_cast %876 : i32 to index
    %c0_269 = arith.constant 0 : index
    %878 = vector.load %arg10[%877, %c0_269] : memref<16x128xf32, #tpu.memory_space<vmem>>, vector<2x128xf32>
    %cst_270 = arith.constant dense<0.000000e+00> : vector<2x128xf32>
    %879 = tpu.matmul %872, %825, %cst_270 {dimension_numbers = #tpu.dot_dimension_numbers<[1], [0], [0], [1], [0, 0, 1, 1], [], []>} : vector<2x32xf32>, vector<32x128xf32>, vector<2x128xf32> -> vector<2x128xf32>
    %880 = arith.addf %878, %879 : vector<2x128xf32>
    %881 = vector.extract_strided_slice %880 {offsets = [0, 0], sizes = [2, 96], strides = [1, 1]} : vector<2x128xf32> to vector<2x96xf32>
    %882 = arith.negf %881 : vector<2x96xf32>
    %883 = math.exp %882 : vector<2x96xf32>
    %cst_271 = arith.constant 1.000000e+00 : f32
    %884 = vector.broadcast %cst_271 : f32 to vector<2x96xf32>
    %885 = arith.addf %884, %883 : vector<2x96xf32>
    %886 = arith.divf %884, %885 : vector<2x96xf32>
    %887 = vector.extract_strided_slice %880 {offsets = [0, 96], sizes = [2, 32], strides = [1, 1]} : vector<2x128xf32> to vector<2x32xf32>
    %888 = math.tanh %887 : vector<2x32xf32>
    %889 = vector.extract_strided_slice %886 {offsets = [0, 0], sizes = [2, 32], strides = [1, 1]} : vector<2x96xf32> to vector<2x32xf32>
    %890 = vector.extract_strided_slice %886 {offsets = [0, 32], sizes = [2, 32], strides = [1, 1]} : vector<2x96xf32> to vector<2x32xf32>
    %891 = vector.extract_strided_slice %886 {offsets = [0, 64], sizes = [2, 32], strides = [1, 1]} : vector<2x96xf32> to vector<2x32xf32>
    %892 = arith.mulf %890, %870 : vector<2x32xf32>
    %893 = arith.mulf %889, %888 : vector<2x32xf32>
    %894 = arith.addf %892, %893 : vector<2x32xf32>
    %895 = math.tanh %894 : vector<2x32xf32>
    %896 = arith.mulf %891, %895 : vector<2x32xf32>
    %897 = arith.index_cast %876 : i32 to index
    %c0_272 = arith.constant 0 : index
    %898 = vector.load %arg9[%897, %c0_272] : memref<16x32xf32, #tpu.memory_space<vmem>>, vector<2x32xf32>
    tpu.vector_store %arg9[%897, %c0_272], %896 {strides = array<i32>} : memref<16x32xf32, #tpu.memory_space<vmem>>, vector<2x32xf32>,
    %c3_i32_273 = arith.constant 3 : i32
    %c2_i32_274 = arith.constant 2 : i32
    %899 = arith.muli %c3_i32_273, %c2_i32_274 : i32
    %900 = tpu.assume_multiple %899, 2 : i32
    %901 = arith.index_cast %900 : i32 to index
    %c0_275 = arith.constant 0 : index
    %902 = vector.load %arg10[%901, %c0_275] : memref<16x128xf32, #tpu.memory_space<vmem>>, vector<2x128xf32>
    %cst_276 = arith.constant dense<0.000000e+00> : vector<2x128xf32>
    %903 = tpu.matmul %896, %825, %cst_276 {dimension_numbers = #tpu.dot_dimension_numbers<[1], [0], [0], [1], [0, 0, 1, 1], [], []>} : vector<2x32xf32>, vector<32x128xf32>, vector<2x128xf32> -> vector<2x128xf32>
    %904 = arith.addf %902, %903 : vector<2x128xf32>
    %905 = vector.extract_strided_slice %904 {offsets = [0, 0], sizes = [2, 96], strides = [1, 1]} : vector<2x128xf32> to vector<2x96xf32>
    %906 = arith.negf %905 : vector<2x96xf32>
    %907 = math.exp %906 : vector<2x96xf32>
    %cst_277 = arith.constant 1.000000e+00 : f32
    %908 = vector.broadcast %cst_277 : f32 to vector<2x96xf32>
    %909 = arith.addf %908, %907 : vector<2x96xf32>
    %910 = arith.divf %908, %909 : vector<2x96xf32>
    %911 = vector.extract_strided_slice %904 {offsets = [0, 96], sizes = [2, 32], strides = [1, 1]} : vector<2x128xf32> to vector<2x32xf32>
    %912 = math.tanh %911 : vector<2x32xf32>
    %913 = vector.extract_strided_slice %910 {offsets = [0, 0], sizes = [2, 32], strides = [1, 1]} : vector<2x96xf32> to vector<2x32xf32>
    %914 = vector.extract_strided_slice %910 {offsets = [0, 32], sizes = [2, 32], strides = [1, 1]} : vector<2x96xf32> to vector<2x32xf32>
    %915 = vector.extract_strided_slice %910 {offsets = [0, 64], sizes = [2, 32], strides = [1, 1]} : vector<2x96xf32> to vector<2x32xf32>
    %916 = arith.mulf %914, %894 : vector<2x32xf32>
    %917 = arith.mulf %913, %912 : vector<2x32xf32>
    %918 = arith.addf %916, %917 : vector<2x32xf32>
    %919 = math.tanh %918 : vector<2x32xf32>
    %920 = arith.mulf %915, %919 : vector<2x32xf32>
    %921 = arith.index_cast %900 : i32 to index
    %c0_278 = arith.constant 0 : index
    %922 = vector.load %arg9[%921, %c0_278] : memref<16x32xf32, #tpu.memory_space<vmem>>, vector<2x32xf32>
    tpu.vector_store %arg9[%921, %c0_278], %920 {strides = array<i32>} : memref<16x32xf32, #tpu.memory_space<vmem>>, vector<2x32xf32>,
    %c4_i32_279 = arith.constant 4 : i32
    %c2_i32_280 = arith.constant 2 : i32
    %923 = arith.muli %c4_i32_279, %c2_i32_280 : i32
    %924 = tpu.assume_multiple %923, 2 : i32
    %925 = arith.index_cast %924 : i32 to index
    %c0_281 = arith.constant 0 : index
    %926 = vector.load %arg10[%925, %c0_281] : memref<16x128xf32, #tpu.memory_space<vmem>>, vector<2x128xf32>
    %cst_282 = arith.constant dense<0.000000e+00> : vector<2x128xf32>
    %927 = tpu.matmul %920, %825, %cst_282 {dimension_numbers = #tpu.dot_dimension_numbers<[1], [0], [0], [1], [0, 0, 1, 1], [], []>} : vector<2x32xf32>, vector<32x128xf32>, vector<2x128xf32> -> vector<2x128xf32>
    %928 = arith.addf %926, %927 : vector<2x128xf32>
    %929 = vector.extract_strided_slice %928 {offsets = [0, 0], sizes = [2, 96], strides = [1, 1]} : vector<2x128xf32> to vector<2x96xf32>
    %930 = arith.negf %929 : vector<2x96xf32>
    %931 = math.exp %930 : vector<2x96xf32>
    %cst_283 = arith.constant 1.000000e+00 : f32
    %932 = vector.broadcast %cst_283 : f32 to vector<2x96xf32>
    %933 = arith.addf %932, %931 : vector<2x96xf32>
    %934 = arith.divf %932, %933 : vector<2x96xf32>
    %935 = vector.extract_strided_slice %928 {offsets = [0, 96], sizes = [2, 32], strides = [1, 1]} : vector<2x128xf32> to vector<2x32xf32>
    %936 = math.tanh %935 : vector<2x32xf32>
    %937 = vector.extract_strided_slice %934 {offsets = [0, 0], sizes = [2, 32], strides = [1, 1]} : vector<2x96xf32> to vector<2x32xf32>
    %938 = vector.extract_strided_slice %934 {offsets = [0, 32], sizes = [2, 32], strides = [1, 1]} : vector<2x96xf32> to vector<2x32xf32>
    %939 = vector.extract_strided_slice %934 {offsets = [0, 64], sizes = [2, 32], strides = [1, 1]} : vector<2x96xf32> to vector<2x32xf32>
    %940 = arith.mulf %938, %918 : vector<2x32xf32>
    %941 = arith.mulf %937, %936 : vector<2x32xf32>
    %942 = arith.addf %940, %941 : vector<2x32xf32>
    %943 = math.tanh %942 : vector<2x32xf32>
    %944 = arith.mulf %939, %943 : vector<2x32xf32>
    %945 = arith.index_cast %924 : i32 to index
    %c0_284 = arith.constant 0 : index
    %946 = vector.load %arg9[%945, %c0_284] : memref<16x32xf32, #tpu.memory_space<vmem>>, vector<2x32xf32>
    tpu.vector_store %arg9[%945, %c0_284], %944 {strides = array<i32>} : memref<16x32xf32, #tpu.memory_space<vmem>>, vector<2x32xf32>,
    %c5_i32_285 = arith.constant 5 : i32
    %c2_i32_286 = arith.constant 2 : i32
    %947 = arith.muli %c5_i32_285, %c2_i32_286 : i32
    %948 = tpu.assume_multiple %947, 2 : i32
    %949 = arith.index_cast %948 : i32 to index
    %c0_287 = arith.constant 0 : index
    %950 = vector.load %arg10[%949, %c0_287] : memref<16x128xf32, #tpu.memory_space<vmem>>, vector<2x128xf32>
    %cst_288 = arith.constant dense<0.000000e+00> : vector<2x128xf32>
    %951 = tpu.matmul %944, %825, %cst_288 {dimension_numbers = #tpu.dot_dimension_numbers<[1], [0], [0], [1], [0, 0, 1, 1], [], []>} : vector<2x32xf32>, vector<32x128xf32>, vector<2x128xf32> -> vector<2x128xf32>
    %952 = arith.addf %950, %951 : vector<2x128xf32>
    %953 = vector.extract_strided_slice %952 {offsets = [0, 0], sizes = [2, 96], strides = [1, 1]} : vector<2x128xf32> to vector<2x96xf32>
    %954 = arith.negf %953 : vector<2x96xf32>
    %955 = math.exp %954 : vector<2x96xf32>
    %cst_289 = arith.constant 1.000000e+00 : f32
    %956 = vector.broadcast %cst_289 : f32 to vector<2x96xf32>
    %957 = arith.addf %956, %955 : vector<2x96xf32>
    %958 = arith.divf %956, %957 : vector<2x96xf32>
    %959 = vector.extract_strided_slice %952 {offsets = [0, 96], sizes = [2, 32], strides = [1, 1]} : vector<2x128xf32> to vector<2x32xf32>
    %960 = math.tanh %959 : vector<2x32xf32>
    %961 = vector.extract_strided_slice %958 {offsets = [0, 0], sizes = [2, 32], strides = [1, 1]} : vector<2x96xf32> to vector<2x32xf32>
    %962 = vector.extract_strided_slice %958 {offsets = [0, 32], sizes = [2, 32], strides = [1, 1]} : vector<2x96xf32> to vector<2x32xf32>
    %963 = vector.extract_strided_slice %958 {offsets = [0, 64], sizes = [2, 32], strides = [1, 1]} : vector<2x96xf32> to vector<2x32xf32>
    %964 = arith.mulf %962, %942 : vector<2x32xf32>
    %965 = arith.mulf %961, %960 : vector<2x32xf32>
    %966 = arith.addf %964, %965 : vector<2x32xf32>
    %967 = math.tanh %966 : vector<2x32xf32>
    %968 = arith.mulf %963, %967 : vector<2x32xf32>
    %969 = arith.index_cast %948 : i32 to index
    %c0_290 = arith.constant 0 : index
    %970 = vector.load %arg9[%969, %c0_290] : memref<16x32xf32, #tpu.memory_space<vmem>>, vector<2x32xf32>
    tpu.vector_store %arg9[%969, %c0_290], %968 {strides = array<i32>} : memref<16x32xf32, #tpu.memory_space<vmem>>, vector<2x32xf32>,
    %c6_i32_291 = arith.constant 6 : i32
    %c2_i32_292 = arith.constant 2 : i32
    %971 = arith.muli %c6_i32_291, %c2_i32_292 : i32
    %972 = tpu.assume_multiple %971, 2 : i32
    %973 = arith.index_cast %972 : i32 to index
    %c0_293 = arith.constant 0 : index
    %974 = vector.load %arg10[%973, %c0_293] : memref<16x128xf32, #tpu.memory_space<vmem>>, vector<2x128xf32>
    %cst_294 = arith.constant dense<0.000000e+00> : vector<2x128xf32>
    %975 = tpu.matmul %968, %825, %cst_294 {dimension_numbers = #tpu.dot_dimension_numbers<[1], [0], [0], [1], [0, 0, 1, 1], [], []>} : vector<2x32xf32>, vector<32x128xf32>, vector<2x128xf32> -> vector<2x128xf32>
    %976 = arith.addf %974, %975 : vector<2x128xf32>
    %977 = vector.extract_strided_slice %976 {offsets = [0, 0], sizes = [2, 96], strides = [1, 1]} : vector<2x128xf32> to vector<2x96xf32>
    %978 = arith.negf %977 : vector<2x96xf32>
    %979 = math.exp %978 : vector<2x96xf32>
    %cst_295 = arith.constant 1.000000e+00 : f32
    %980 = vector.broadcast %cst_295 : f32 to vector<2x96xf32>
    %981 = arith.addf %980, %979 : vector<2x96xf32>
    %982 = arith.divf %980, %981 : vector<2x96xf32>
    %983 = vector.extract_strided_slice %976 {offsets = [0, 96], sizes = [2, 32], strides = [1, 1]} : vector<2x128xf32> to vector<2x32xf32>
    %984 = math.tanh %983 : vector<2x32xf32>
    %985 = vector.extract_strided_slice %982 {offsets = [0, 0], sizes = [2, 32], strides = [1, 1]} : vector<2x96xf32> to vector<2x32xf32>
    %986 = vector.extract_strided_slice %982 {offsets = [0, 32], sizes = [2, 32], strides = [1, 1]} : vector<2x96xf32> to vector<2x32xf32>
    %987 = vector.extract_strided_slice %982 {offsets = [0, 64], sizes = [2, 32], strides = [1, 1]} : vector<2x96xf32> to vector<2x32xf32>
    %988 = arith.mulf %986, %966 : vector<2x32xf32>
    %989 = arith.mulf %985, %984 : vector<2x32xf32>
    %990 = arith.addf %988, %989 : vector<2x32xf32>
    %991 = math.tanh %990 : vector<2x32xf32>
    %992 = arith.mulf %987, %991 : vector<2x32xf32>
    %993 = arith.index_cast %972 : i32 to index
    %c0_296 = arith.constant 0 : index
    %994 = vector.load %arg9[%993, %c0_296] : memref<16x32xf32, #tpu.memory_space<vmem>>, vector<2x32xf32>
    tpu.vector_store %arg9[%993, %c0_296], %992 {strides = array<i32>} : memref<16x32xf32, #tpu.memory_space<vmem>>, vector<2x32xf32>,
    %c7_i32_297 = arith.constant 7 : i32
    %c2_i32_298 = arith.constant 2 : i32
    %995 = arith.muli %c7_i32_297, %c2_i32_298 : i32
    %996 = tpu.assume_multiple %995, 2 : i32
    %997 = arith.index_cast %996 : i32 to index
    %c0_299 = arith.constant 0 : index
    %998 = vector.load %arg10[%997, %c0_299] : memref<16x128xf32, #tpu.memory_space<vmem>>, vector<2x128xf32>
    %cst_300 = arith.constant dense<0.000000e+00> : vector<2x128xf32>
    %999 = tpu.matmul %992, %825, %cst_300 {dimension_numbers = #tpu.dot_dimension_numbers<[1], [0], [0], [1], [0, 0, 1, 1], [], []>} : vector<2x32xf32>, vector<32x128xf32>, vector<2x128xf32> -> vector<2x128xf32>
    %1000 = arith.addf %998, %999 : vector<2x128xf32>
    %1001 = vector.extract_strided_slice %1000 {offsets = [0, 0], sizes = [2, 96], strides = [1, 1]} : vector<2x128xf32> to vector<2x96xf32>
    %1002 = arith.negf %1001 : vector<2x96xf32>
    %1003 = math.exp %1002 : vector<2x96xf32>
    %cst_301 = arith.constant 1.000000e+00 : f32
    %1004 = vector.broadcast %cst_301 : f32 to vector<2x96xf32>
    %1005 = arith.addf %1004, %1003 : vector<2x96xf32>
    %1006 = arith.divf %1004, %1005 : vector<2x96xf32>
    %1007 = vector.extract_strided_slice %1000 {offsets = [0, 96], sizes = [2, 32], strides = [1, 1]} : vector<2x128xf32> to vector<2x32xf32>
    %1008 = math.tanh %1007 : vector<2x32xf32>
    %1009 = vector.extract_strided_slice %1006 {offsets = [0, 0], sizes = [2, 32], strides = [1, 1]} : vector<2x96xf32> to vector<2x32xf32>
    %1010 = vector.extract_strided_slice %1006 {offsets = [0, 32], sizes = [2, 32], strides = [1, 1]} : vector<2x96xf32> to vector<2x32xf32>
    %1011 = vector.extract_strided_slice %1006 {offsets = [0, 64], sizes = [2, 32], strides = [1, 1]} : vector<2x96xf32> to vector<2x32xf32>
    %1012 = arith.mulf %1010, %990 : vector<2x32xf32>
    %1013 = arith.mulf %1009, %1008 : vector<2x32xf32>
    %1014 = arith.addf %1012, %1013 : vector<2x32xf32>
    %1015 = math.tanh %1014 : vector<2x32xf32>
    %1016 = arith.mulf %1011, %1015 : vector<2x32xf32>
    %1017 = arith.index_cast %996 : i32 to index
    %c0_302 = arith.constant 0 : index
    %1018 = vector.load %arg9[%1017, %c0_302] : memref<16x32xf32, #tpu.memory_space<vmem>>, vector<2x32xf32>
    tpu.vector_store %arg9[%1017, %c0_302], %1016 {strides = array<i32>} : memref<16x32xf32, #tpu.memory_space<vmem>>, vector<2x32xf32>,
    %c8_i32_303 = arith.constant 8 : i32
    %c0_304 = arith.constant 0 : index
    %c0_305 = arith.constant 0 : index
    %1019 = vector.load %arg9[%c0_304, %c0_305] : memref<16x32xf32, #tpu.memory_space<vmem>>, vector<16x32xf32>
    %c0_306 = arith.constant 0 : index
    %c0_307 = arith.constant 0 : index
    %1020 = vector.load %arg6[%c0_306, %c0_307] : memref<32x8xf32, #tpu.memory_space<vmem>>, vector<32x8xf32>
    %cst_308 = arith.constant dense<0.000000e+00> : vector<16x8xf32>
    %1021 = tpu.matmul %1019, %1020, %cst_308 {dimension_numbers = #tpu.dot_dimension_numbers<[1], [0], [0], [1], [0, 0, 1, 1], [], []>} : vector<16x32xf32>, vector<32x8xf32>, vector<16x8xf32> -> vector<16x8xf32>
    %c0_309 = arith.constant 0 : index
    %c0_310 = arith.constant 0 : index
    %1022 = vector.load %arg7[%c0_309, %c0_310] : memref<1x8xf32, #tpu.memory_space<vmem>>, vector<1x8xf32>
    %1023 = vector.broadcast %1022 : vector<1x8xf32> to vector<16x8xf32>
    %1024 = arith.addf %1021, %1023 : vector<16x8xf32>
    %c0_311 = arith.constant 0 : index
    %c0_312 = arith.constant 0 : index
    %1025 = vector.load %arg8[%c0_311, %c0_312] : memref<16x8xf32, #tpu.memory_space<vmem>>, vector<16x8xf32>
    tpu.vector_store %arg8[%c0_311, %c0_312], %1024 {strides = array<i32>} : memref<16x8xf32, #tpu.memory_space<vmem>>, vector<16x8xf32>,
    return
  }
  func.func @transform_0(%arg0: i32) -> (i32, i32) {
    %c0_i32 = arith.constant 0 : i32
    %c0_i32_0 = arith.constant 0 : i32
    %c0_i32_1 = arith.constant 0 : i32
    return %c0_i32, %c0_i32_0 : i32, i32
  }
  func.func @transform_1(%arg0: i32) -> (i32, i32) {
    %c0_i32 = arith.constant 0 : i32
    %c0_i32_0 = arith.constant 0 : i32
    %c0_i32_1 = arith.constant 0 : i32
    return %c0_i32, %c0_i32_0 : i32, i32
  }
  func.func @transform_2(%arg0: i32) -> (i32, i32, i32) {
    %c0_i32 = arith.constant 0 : i32
    %c0_i32_0 = arith.constant 0 : i32
    %c0_i32_1 = arith.constant 0 : i32
    %c0_i32_2 = arith.constant 0 : i32
    return %c0_i32, %c0_i32_0, %c0_i32_1 : i32, i32, i32
  }
  func.func @transform_3(%arg0: i32) -> (i32, i32, i32) {
    %c0_i32 = arith.constant 0 : i32
    %c0_i32_0 = arith.constant 0 : i32
    %c0_i32_1 = arith.constant 0 : i32
    %c0_i32_2 = arith.constant 0 : i32
    return %c0_i32, %c0_i32_0, %c0_i32_1 : i32, i32, i32
  }
  func.func @transform_4(%arg0: i32) -> (i32, i32, i32) {
    %c0_i32 = arith.constant 0 : i32
    %c0_i32_0 = arith.constant 0 : i32
    %c0_i32_1 = arith.constant 0 : i32
    %c0_i32_2 = arith.constant 0 : i32
    return %c0_i32, %c0_i32_0, %c0_i32_1 : i32, i32, i32
  }
  func.func @transform_5(%arg0: i32) -> (i32, i32) {
    %c0_i32 = arith.constant 0 : i32
    %c0_i32_0 = arith.constant 0 : i32
    %c0_i32_1 = arith.constant 0 : i32
    return %c0_i32, %c0_i32_0 : i32, i32
  }
  func.func @transform_6(%arg0: i32) -> (i32, i32) {
    %c0_i32 = arith.constant 0 : i32
    %c0_i32_0 = arith.constant 0 : i32
    %c0_i32_1 = arith.constant 0 : i32
    return %c0_i32, %c0_i32_0 : i32, i32
  }
  func.func @transform_7(%arg0: i32) -> (i32, i32) {
    %c0_i32 = arith.constant 0 : i32
    %c0_i32_0 = arith.constant 0 : i32
    %c0_i32_1 = arith.constant 0 : i32
    return %c0_i32, %c0_i32_0 : i32, i32
  }
}

</mosaic_0001>

<bundles_post_ra>
// kernel: tpu_custom_call.1
= control target key start
LH: loop header
LB: loop body
LE: loop exit
PB: predicated region body
PF: predicated region fallthrough
CT: control target
= control target key end

     0   :  { %12 = vsyncpa [#allocation5], 0  ;;  %s6923_s0 = inlined_call_operand.vmem [shape: f32[16,16], index: 0, kind: input, shape index: {}]   ;;  %s6924_s1 = inlined_call_operand.vmem [shape: f32[16,128], index: 1, kind: input, shape index: {}]   ;;  %s6925_s2 = inlined_call_operand.hbm [shape: f32[4,32,128], index: 2, kind: input, shape index: {}]   ;;  %s6926_s3 = inlined_call_operand.hbm [shape: f32[5,32,128], index: 3, kind: input, shape index: {}]   ;;  %s6927_s4 = inlined_call_operand.vmem [shape: f32[5,1,128], index: 4, kind: input, shape index: {}]   ;;  %s6928_s5 = inlined_call_operand.vmem [shape: f32[32,8], index: 5, kind: input, shape index: {}]   ;;  %s6929_s6 = inlined_call_operand.vmem [shape: f32[1,8], index: 6, kind: input, shape index: {}]   ;;  %s6930_s7 = inlined_call_operand.vmem [shape: f32[16,8], index: 7, kind: output, shape index: {}]  }
   0x1   :  { %13 = vsyncpa [#allocation7], 0  ;;  %s6290_s24 = smov [#allocation4]   ;;  %s6242_s28 = scalar_lea.hbm %s6925_s2, 2048 }
   0x2   :  { %s23_s25 = sshll.u32 %s6290_s24, 4  ;;  %p6243_p0 = scmp.ne.s32.totalorder %s6925_s2, %s6242_s28  ;;  %s24_s25 = int_to_ptr.vmem [resolvable:$true] %s23_s25 }
   0x3   :  { %p6246_p1 = scmp.lt.u32.totalorder %s6242_s28, %s6925_s2 }
   0x5   :  { %p6248_p2 = pnand %p6246_p1, %p6243_p0 }
   0x7   :  { %6251 = shalt.err (!%p6248_p2)
}
   0x8   :  { %s6252_s10 = scalar_lea.vmem %s24_s25, 2048  ;;  %p6257_p4 = scmp.lt.s32.totalorder %s24_s25, %s24_s25 }
   0x9   :  { %p6253_p3 = scmp.ne.s32.totalorder %s24_s25, %s6252_s10  ;;  %p6258_p5 = scmp.lt.s32.totalorder %s6252_s10, %s6252_s10 }
   0xb   :  { %p6259_p6 = por %p6258_p5, %p6257_p4 }
   0xd   :  { %p6260_p7 = pnand %p6259_p6, %p6253_p3 }
   0xf   :  { %6263 = shalt.err (!%p6260_p7)
}
  0x10   :  { %s6291_s11 = smov 128   ;;  %s6292_s12 = smov 8  }
  0x11   :  { %29 = dma.hbm_to_vmem [thread:$0]  %s6925_s2, 2048, %s24_s25, [#allocation5], %s6291_s11, %s6291_s11, %s6292_s12  }
  0x12   :  { %s6293_s15 = smov [#allocation6]   ;;  %s6264_s19 = scalar_lea.hbm %s6926_s3, 2560 }
  0x13   :  { %s35_s16 = sshll.u32 %s6293_s15, 4  ;;  %p6265_p8 = scmp.ne.s32.totalorder %s6926_s3, %s6264_s19  ;;  %s36_s16 = int_to_ptr.vmem [resolvable:$true] %s35_s16 }
  0x14   :  { %p6268_p9 = scmp.lt.u32.totalorder %s6264_s19, %s6926_s3 }
  0x16   :  { %p6270_p10 = pnand %p6268_p9, %p6265_p8 }
  0x18   :  { %6273 = shalt.err (!%p6270_p10)
}
  0x19   :  { %s6274_s24 = scalar_lea.vmem %s36_s16, 2560  ;;  %p6279_p12 = scmp.lt.s32.totalorder %s36_s16, %s36_s16 }
  0x1a   :  { %p6275_p11 = scmp.ne.s32.totalorder %s36_s16, %s6274_s24  ;;  %p6280_p13 = scmp.lt.s32.totalorder %s6274_s24, %s6274_s24 }
  0x1c   :  { %p6281_p0 = por %p6280_p13, %p6279_p12 }
  0x1e   :  { %p6282_p1 = pnand %p6281_p0, %p6275_p11 }
  0x20   :  { %6285 = shalt.err (!%p6282_p1)
}
  0x21   :  { %41 = dma.hbm_to_vmem [thread:$0]  %s6926_s3, 2560, %s36_s16, [#allocation7], %s6291_s11, %s6291_s11, %s6292_s12  }
  0x22   :  { %6286 = dma.done.wait [#allocation5], 2048  }
  0x23   :  { %6287 = vsyncadd [#allocation5], 4294965248 }
  0x24   :  { %6288 = dma.done.wait [#allocation7], 2560  }
  0x25   :  { %6289 = vsyncadd [#allocation7], 4294964736  ;;  %v6294_v0 = vmov 0.0|0.0   ;;  %vm6295_vm0 = vmmov 0   ;;  %v6296_v1 = vmov 0.0   ;;  %vm65_vm1 = vcmask 130048  }
  0x26   :  { %5633 = vmatprep.subr.bf16.mxu1 %v6294_v0  ;;  %5142 = vmatprep.mubr.msk.f32.mxu1 %vm6295_vm0, %v6296_v1  ;;  %v56_v2 = vld [vmem:[%s6924_s1] sm:$0xff]  ;;  %v57_v3 = vld [vmem:[%s6924_s1 + $0x8] sm:$0xff]  ;;  %v151_v9 = vld [vmem:[#allocation6 + $0x10] sm:$0xff]  ;;  %s6297_s10 = smov 32   ;;  %s6298_s11 = smov 64   ;;  %vm257_vm2 = vcmask 254976  }
  0x27   :  { %v54_v4 = vld [vmem:[%s6923_s0] sm:$0xff]  ;;  %v5629_v5 = vpack.c.bf16 %v57_v3, %v56_v2  ;;  %v150_v7 = vld [vmem:[#allocation6 + $0x8] sm:$0xff]  ;;  %v152_v10 = vld [vmem:[#allocation6 + $0x18] sm:$0xff]  ;;  %vm154_vm3 = vcmask 261120   ;;  %vm4787_vm4 = vcmask 64512  }
  0x28   :  { %5131 = vmatprep.mubr.msk.f32.mxu0 %vm65_vm1, %v54_v4  ;;  %v149_v6 = vld [vmem:[#allocation6] sm:$0xff]  ;;  %v55_v11 = vld [vmem:[%s6923_s0 + $0x8] sm:$0xff]  ;;  %v6382_v12 = vpack.c.bf16 %v152_v10, %v151_v9 }
  0x29   :  { %v6376_v8 = vpack.c.bf16 %v150_v7, %v149_v6  ;;  %5630 = vmatprep.subr.bf16.mxu0 %v5629_v5  ;;  %v4796_v13 = vld [vmem:[%s6927_s4] ss:$0 sm:$0xff] }
  0x2a   :  { %5632 = vmatpush3.bf16.msra.mxu0 %v5629_v5 }
  0x2b   :  { %5635 = vmatpush3.bf16.msra.mxu1 %v6376_v8  ;;  %5639 = vmatprep.subr.bf16.mxu0 %v6294_v0 }
  0x2c   :  { %5636 = vmatprep.subr.bf16.mxu1 %v6294_v0 }
  0x2d   :  { %5132 = vmatmul.mubr.msk.f32.vlgmr.msra.gmra.mrb[0].mxu0 %vm65_vm1, %v55_v11 }
  0x2e   :  { %5641 = vmatpush3.bf16.msra.mxu0 %v6376_v8  ;;  %5153 = vmatprep.mubr.msk.f32.mxu0 %vm6295_vm0, %v6296_v1 }
  0x2f   :  { %5638 = vmatpush3.bf16.msra.mxu1 %v6382_v12  ;;  %5642 = vmatprep.subr.bf16.mxu0 %v6294_v0 }
  0x30   :  { %5645 = vmatprep.subr.bf16.mxu1 %v6294_v0 }
  0x32   :  { %5143 = vmatmul.mubr.f32.vlgmr.msra.gmra.mrb[0].mxu1 %v6296_v1  ;;  %5644 = vmatpush3.bf16.msra.mxu0 %v6382_v12 }
  0x33   :  { %5647 = vmatpush3.bf16.msra.mxu1 %v6376_v8  ;;  %5164 = vmatprep.mubr.msk.f32.mxu1 %vm6295_vm0, %v6296_v1 }
  0x34   :  { %5648 = vmatprep.subr.bf16.mxu1 %v6294_v0  ;;  %5651 = vmatprep.subr.bf16.mxu0 %v6294_v0 }
  0x37   :  { %5650 = vmatpush3.bf16.msra.mxu1 %v6382_v12 }
  0x38   :  { %5657 = vmatprep.subr.bf16.mxu1 %v6294_v0 }
 0x100   :  { %v5133_v14 = vpop.f32.mrb[0].mxu0 }
 0x101   :  { %v144_v15 = vadd.f32 %v5133_v14, %v4796_v13  ;;  %v138_v16 = vpop.f32.mrb[1].mxu0 }
 0x102   :  { %v139_v17 = vadd.f32 %v4796_v13, %v138_v16 }
 0x103   :  { %148 = vst [vmem:[#allocation3 + $0x8] sm:$0xff] %v144_v15 }
 0x104   :  { %147 = vst [vmem:[#allocation3] sm:$0xff] %v139_v17 }
 0x105   :  { %v224_v18 = vpop.f32.mrb[0].mxu1 }
 0x106   :  { %v5144_v19 = vpop.f32.mrb[1].mxu1 }
 0x10b   :  { %v153_v20 = vld [vmem:[#allocation3] sm:$0x3]  ;;  %v260_v36 = vld [vmem:[#allocation3 + $0x2] sm:$0x3]  ;;  %v365_v54 = vld [vmem:[#allocation3 + $0x4] sm:$0x3] }
 0x10c   :  { %v228_v21 = vadd.f32 %v224_v18, %v153_v20  ;;  %v470_v11 = vld [vmem:[#allocation3 + $0x6] sm:$0x3] }
 0x10e   :  { %5922 = vtanh.f32 %v228_v21  ;;  %v4799_v23 = vmul.f32 -1.442695, %v228_v21 }
 0x110   :  { %5924 = vpow2.f32 %v4799_v23 }
 0x118   :  { %v5923_v22 = vpop.eup %5922 }
 0x119   :  { %238 = vrot.lane.b32.xlu0 %v5923_v22, %s6297_s10 }
 0x11a   :  { %v5925_v24 = vpop.eup %5924 }
 0x11b   :  { %v232_v25 = vadd.f32 1.0, %v5925_v24 }
 0x11d   :  { %5926 = vrcp.f32 %v232_v25 }
 0x127   :  { %v5927_v26 = vpop.eup %5926 }
 0x128   :  { %v236_v29 = vmul.f32 0.0, %v5927_v26 }
 0x18b   :  { %v239_v27 = vpop.permute.xlu0 %238 }
 0x18c   :  { %v241_v28 = vmul.f32 %v5927_v26, %v239_v27 }
 0x18e   :  { %243 = vrot.lane.b32.xlu0 %v241_v28, %s6297_s10 }
 0x200   :  { %v244_v30 = vpop.permute.xlu0 %243 }
 0x201   :  { %v246_v31 = vadd.f32 %v244_v30, %v236_v29  ;;  %v575_v30 = vld [vmem:[#allocation3 + $0x8] sm:$0x3] }
 0x203   :  { %5928 = vtanh.f32 %v246_v31 }
 0x20d   :  { %v5929_v32 = vpop.eup %5928 }
 0x20e   :  { %249 = vrot.lane.b32.xlu1 %v5929_v32, %s6297_s10 }
 0x280   :  { %v250_v33 = vpop.permute.xlu1 %249 }
 0x281   :  { %v252_v34 = vmul.f32 %v5927_v26, %v250_v33 }
 0x283   :  { %254 = vrot.lane.b32.xlu1 %v252_v34, %s6298_s11 }
 0x2f5   :  { %v255_v35 = vpop.permute.xlu1 %254 }
 0x2f6   :  { %258 = vst.msk [vmem:[#allocation2] sm:$0x3] %vm257_vm2, %v255_v35  ;;  %5154 = vmatmul.mubr.msk.f32.vlgmr.msra.gmra.mrb[2].mxu0 %vm154_vm3, %v255_v35 }
 0x2f7   :  { %5653 = vmatpush3.bf16.msra.mxu0 %v6376_v8  ;;  %5175 = vmatprep.mubr.msk.f32.mxu0 %vm6295_vm0, %v6296_v1 }
 0x2f8   :  { %5654 = vmatprep.subr.bf16.mxu0 %v6294_v0 }
 0x2fb   :  { %5656 = vmatpush3.bf16.msra.mxu0 %v6382_v12 }
 0x2fc   :  { %5663 = vmatprep.subr.bf16.mxu0 %v6294_v0 }
 0x3c9   :  { %v329_v37 = vpop.f32.mrb[2].mxu0 }
 0x3ca   :  { %v333_v38 = vadd.f32 %v329_v37, %v260_v36  ;;  %v5155_v39 = vpop.f32.mrb[3].mxu0 }
 0x3cc   :  { %5930 = vtanh.f32 %v333_v38  ;;  %v4801_v41 = vmul.f32 -1.442695, %v333_v38 }
 0x3ce   :  { %5932 = vpow2.f32 %v4801_v41 }
 0x3d6   :  { %v5931_v40 = vpop.eup %5930 }
 0x3d7   :  { %343 = vrot.lane.b32.xlu0 %v5931_v40, %s6297_s10 }
 0x3d8   :  { %v5933_v42 = vpop.eup %5932 }
 0x3d9   :  { %v337_v43 = vadd.f32 1.0, %v5933_v42 }
 0x3db   :  { %5934 = vrcp.f32 %v337_v43 }
 0x3e5   :  { %v5935_v44 = vpop.eup %5934 }
 0x3e6   :  { %v341_v47 = vmul.f32 %v5935_v44, %v246_v31 }
 0x449   :  { %v344_v45 = vpop.permute.xlu0 %343 }
 0x44a   :  { %v346_v46 = vmul.f32 %v5935_v44, %v344_v45 }
 0x44c   :  { %348 = vrot.lane.b32.xlu1 %v346_v46, %s6297_s10 }
 0x4be   :  { %v349_v48 = vpop.permute.xlu1 %348 }
 0x4bf   :  { %v351_v49 = vadd.f32 %v349_v48, %v341_v47  ;;  %v680_v48 = vld [vmem:[#allocation3 + $0xa] sm:$0x3] }
 0x4c1   :  { %5936 = vtanh.f32 %v351_v49 }
 0x4cb   :  { %v5937_v50 = vpop.eup %5936 }
 0x4cc   :  { %354 = vrot.lane.b32.xlu0 %v5937_v50, %s6297_s10 }
 0x53e   :  { %v355_v51 = vpop.permute.xlu0 %354 }
 0x53f   :  { %v357_v52 = vmul.f32 %v5935_v44, %v355_v51 }
 0x541   :  { %359 = vrot.lane.b32.xlu1 %v357_v52, %s6298_s11 }
 0x5b3   :  { %v360_v53 = vpop.permute.xlu1 %359 }
 0x5b4   :  { %363 = vst.msk [vmem:[#allocation2 + $0x2] sm:$0x3] %vm257_vm2, %v360_v53  ;;  %5165 = vmatmul.mubr.msk.f32.vlgmr.msra.gmra.mrb[2].mxu1 %vm154_vm3, %v360_v53 }
 0x5b5   :  { %5659 = vmatpush3.bf16.msra.mxu1 %v6376_v8  ;;  %5186 = vmatprep.mubr.msk.f32.mxu1 %vm6295_vm0, %v6296_v1 }
 0x5b6   :  { %5660 = vmatprep.subr.bf16.mxu1 %v6294_v0 }
 0x5b9   :  { %5662 = vmatpush3.bf16.msra.mxu1 %v6382_v12 }
 0x5ba   :  { %5669 = vmatprep.subr.bf16.mxu1 %v6294_v0 }
 0x687   :  { %v434_v55 = vpop.f32.mrb[2].mxu1 }
 0x688   :  { %v438_v56 = vadd.f32 %v434_v55, %v365_v54  ;;  %v5166_v57 = vpop.f32.mrb[3].mxu1 }
 0x68a   :  { %5938 = vtanh.f32 %v438_v56  ;;  %v4803_v59 = vmul.f32 -1.442695, %v438_v56 }
 0x68c   :  { %5940 = vpow2.f32 %v4803_v59 }
 0x694   :  { %v5939_v58 = vpop.eup %5938 }
 0x695   :  { %448 = vrot.lane.b32.xlu0 %v5939_v58, %s6297_s10 }
 0x696   :  { %v5941_v60 = vpop.eup %5940 }
 0x697   :  { %v442_v61 = vadd.f32 1.0, %v5941_v60 }
 0x699   :  { %5942 = vrcp.f32 %v442_v61 }
 0x6a3   :  { %v5943_v62 = vpop.eup %5942 }
 0x6a4   :  { %v446_v3 = vmul.f32 %v5943_v62, %v351_v49 }
 0x707   :  { %v449_v63 = vpop.permute.xlu0 %448 }
 0x708   :  { %v451_v2 = vmul.f32 %v5943_v62, %v449_v63 }
 0x70a   :  { %453 = vrot.lane.b32.xlu1 %v451_v2, %s6297_s10 }
 0x77c   :  { %v454_v4 = vpop.permute.xlu1 %453 }
 0x77d   :  { %v456_v5 = vadd.f32 %v454_v4, %v446_v3  ;;  %v785_v3 = vld [vmem:[#allocation3 + $0xc] sm:$0x3] }
 0x77f   :  { %5944 = vtanh.f32 %v456_v5 }
 0x789   :  { %v5945_v6 = vpop.eup %5944 }
 0x78a   :  { %459 = vrot.lane.b32.xlu0 %v5945_v6, %s6297_s10 }
 0x7fc   :  { %v460_v7 = vpop.permute.xlu0 %459 }
 0x7fd   :  { %v462_v9 = vmul.f32 %v5943_v62, %v460_v7 }
 0x7ff   :  { %464 = vrot.lane.b32.xlu1 %v462_v9, %s6298_s11 }
 0x871   :  { %v465_v10 = vpop.permute.xlu1 %464 }
 0x872   :  { %468 = vst.msk [vmem:[#allocation2 + $0x4] sm:$0x3] %vm257_vm2, %v465_v10  ;;  %5176 = vmatmul.mubr.msk.f32.vlgmr.msra.gmra.mrb[4].mxu0 %vm154_vm3, %v465_v10 }
 0x873   :  { %5665 = vmatpush3.bf16.msra.mxu0 %v6376_v8  ;;  %5197 = vmatprep.mubr.msk.f32.mxu0 %vm6295_vm0, %v6296_v1 }
 0x874   :  { %5666 = vmatprep.subr.bf16.mxu0 %v6294_v0 }
 0x877   :  { %5668 = vmatpush3.bf16.msra.mxu0 %v6382_v12 }
 0x878   :  { %5675 = vmatprep.subr.bf16.mxu0 %v6294_v0 }
 0x945   :  { %v539_v13 = vpop.f32.mrb[4].mxu0 }
 0x946   :  { %v543_v14 = vadd.f32 %v539_v13, %v470_v11  ;;  %v5177_v15 = vpop.f32.mrb[5].mxu0 }
 0x948   :  { %5946 = vtanh.f32 %v543_v14  ;;  %v4805_v17 = vmul.f32 -1.442695, %v543_v14 }
 0x94a   :  { %5948 = vpow2.f32 %v4805_v17 }
 0x952   :  { %v5947_v16 = vpop.eup %5946 }
 0x953   :  { %553 = vrot.lane.b32.xlu0 %v5947_v16, %s6297_s10 }
 0x954   :  { %v5949_v18 = vpop.eup %5948 }
 0x955   :  { %v547_v19 = vadd.f32 1.0, %v5949_v18 }
 0x957   :  { %5950 = vrcp.f32 %v547_v19 }
 0x961   :  { %v5951_v20 = vpop.eup %5950 }
 0x962   :  { %v551_v23 = vmul.f32 %v5951_v20, %v456_v5 }
 0x9c5   :  { %v554_v21 = vpop.permute.xlu0 %553 }
 0x9c6   :  { %v556_v22 = vmul.f32 %v5951_v20, %v554_v21 }
 0x9c8   :  { %558 = vrot.lane.b32.xlu1 %v556_v22, %s6297_s10 }
 0xa3a   :  { %v559_v24 = vpop.permute.xlu1 %558 }
 0xa3b   :  { %v561_v25 = vadd.f32 %v559_v24, %v551_v23  ;;  %v890_v23 = vld [vmem:[#allocation3 + $0xe] sm:$0x3] }
 0xa3d   :  { %5952 = vtanh.f32 %v561_v25 }
 0xa47   :  { %v5953_v26 = vpop.eup %5952 }
 0xa48   :  { %564 = vrot.lane.b32.xlu0 %v5953_v26, %s6297_s10 }
 0xaba   :  { %v565_v27 = vpop.permute.xlu0 %564 }
 0xabb   :  { %v567_v28 = vmul.f32 %v5951_v20, %v565_v27 }
 0xabd   :  { %569 = vrot.lane.b32.xlu1 %v567_v28, %s6298_s11 }
 0xb2f   :  { %v570_v29 = vpop.permute.xlu1 %569 }
 0xb30   :  { %573 = vst.msk [vmem:[#allocation2 + $0x6] sm:$0x3] %vm257_vm2, %v570_v29  ;;  %5187 = vmatmul.mubr.msk.f32.vlgmr.msra.gmra.mrb[4].mxu1 %vm154_vm3, %v570_v29 }
 0xb31   :  { %5671 = vmatpush3.bf16.msra.mxu1 %v6376_v8  ;;  %5208 = vmatprep.mubr.msk.f32.mxu1 %vm6295_vm0, %v6296_v1 }
 0xb32   :  { %5672 = vmatprep.subr.bf16.mxu1 %v6294_v0 }
 0xb35   :  { %5674 = vmatpush3.bf16.msra.mxu1 %v6382_v12 }
 0xb37   :  { %v994_v2 = vld [vmem:[#allocation2] sm:$0xff] }
 0xc03   :  { %v644_v31 = vpop.f32.mrb[4].mxu1 }
 0xc04   :  { %v648_v32 = vadd.f32 %v644_v31, %v575_v30  ;;  %v5188_v33 = vpop.f32.mrb[5].mxu1 }
 0xc06   :  { %5954 = vtanh.f32 %v648_v32  ;;  %v4807_v35 = vmul.f32 -1.442695, %v648_v32 }
 0xc08   :  { %5956 = vpow2.f32 %v4807_v35 }
 0xc10   :  { %v5955_v34 = vpop.eup %5954 }
 0xc11   :  { %658 = vrot.lane.b32.xlu0 %v5955_v34, %s6297_s10 }
 0xc12   :  { %v5957_v36 = vpop.eup %5956 }
 0xc13   :  { %v652_v37 = vadd.f32 1.0, %v5957_v36 }
 0xc15   :  { %5958 = vrcp.f32 %v652_v37 }
 0xc1f   :  { %v5959_v38 = vpop.eup %5958 }
 0xc20   :  { %v656_v41 = vmul.f32 %v5959_v38, %v561_v25 }
 0xc83   :  { %v659_v39 = vpop.permute.xlu0 %658 }
 0xc84   :  { %v661_v40 = vmul.f32 %v5959_v38, %v659_v39  ;;  %v997_v39 = vld [vmem:[#allocation4 + $0x8] sm:$0xff] }
 0xc86   :  { %663 = vrot.lane.b32.xlu1 %v661_v40, %s6297_s10 }
 0xcf8   :  { %v664_v42 = vpop.permute.xlu1 %663 }
 0xcf9   :  { %v666_v43 = vadd.f32 %v664_v42, %v656_v41  ;;  %v998_v41 = vld [vmem:[#allocation4 + $0x10] sm:$0xff]  ;;  %v999_v42 = vld [vmem:[#allocation4 + $0x18] sm:$0xff] }
 0xcfb   :  { %5960 = vtanh.f32 %v666_v43 }
 0xd05   :  { %v5961_v44 = vpop.eup %5960 }
 0xd06   :  { %669 = vrot.lane.b32.xlu0 %v5961_v44, %s6297_s10  ;;  %v1092_v44 = vld [vmem:[#allocation6 + $0x20] sm:$0xff] }
 0xd78   :  { %v670_v45 = vpop.permute.xlu0 %669 }
 0xd79   :  { %v672_v46 = vmul.f32 %v5959_v38, %v670_v45  ;;  %v996_v38 = vld [vmem:[#allocation4] sm:$0xff]  ;;  %v1093_v45 = vld [vmem:[#allocation6 + $0x28] sm:$0xff] }
 0xd7a   :  { %v5681_v40 = vpack.c.bf16 %v997_v39, %v996_v38 }
 0xd7b   :  { %674 = vrot.lane.b32.xlu1 %v672_v46, %s6298_s11  ;;  %v1094_v46 = vld [vmem:[#allocation6 + $0x30] sm:$0xff] }
 0xd7c   :  { %5682 = vmatprep.subr.bf16.mxu1 %v5681_v40 }
 0xded   :  { %v675_v47 = vpop.permute.xlu1 %674 }
 0xdee   :  { %678 = vst.msk [vmem:[#allocation2 + $0x8] sm:$0x3] %vm257_vm2, %v675_v47  ;;  %5198 = vmatmul.mubr.msk.f32.vlgmr.msra.gmra.mrb[6].mxu0 %vm154_vm3, %v675_v47  ;;  %v6483_v47 = vpack.c.bf16 %v1093_v45, %v1092_v44 }
 0xdef   :  { %5677 = vmatpush3.bf16.msra.mxu0 %v6376_v8  ;;  %5219 = vmatprep.mubr.msk.f32.mxu0 %vm6295_vm0, %v6296_v1 }
 0xdf0   :  { %5678 = vmatprep.subr.bf16.mxu0 %v6294_v0 }
 0xdf3   :  { %5680 = vmatpush3.bf16.msra.mxu0 %v6382_v12 }
 0xdf4   :  { %5689 = vmatprep.subr.bf16.mxu0 %v6294_v0 }
 0xec1   :  { %v749_v49 = vpop.f32.mrb[6].mxu0 }
 0xec2   :  { %v753_v50 = vadd.f32 %v749_v49, %v680_v48  ;;  %v5199_v51 = vpop.f32.mrb[7].mxu0  ;;  %v1095_v48 = vld [vmem:[#allocation6 + $0x38] sm:$0xff] }
 0xec3   :  { %v6486_v51 = vpack.c.bf16 %v1095_v48, %v1094_v46 }
 0xec4   :  { %5962 = vtanh.f32 %v753_v50  ;;  %v4809_v53 = vmul.f32 -1.442695, %v753_v50 }
 0xec6   :  { %5964 = vpow2.f32 %v4809_v53 }
 0xece   :  { %v5963_v52 = vpop.eup %5962 }
 0xecf   :  { %763 = vrot.lane.b32.xlu0 %v5963_v52, %s6297_s10 }
 0xed0   :  { %v5965_v8 = vpop.eup %5964 }
 0xed1   :  { %v757_v54 = vadd.f32 1.0, %v5965_v8 }
 0xed3   :  { %5966 = vrcp.f32 %v757_v54 }
 0xedd   :  { %v5967_v55 = vpop.eup %5966 }
 0xede   :  { %v761_v12 = vmul.f32 %v5967_v55, %v666_v43  ;;  %v5685_v43 = vpack.c.bf16 %v999_v42, %v998_v41 }
 0xf41   :  { %v764_v56 = vpop.permute.xlu0 %763 }
 0xf42   :  { %v766_v57 = vmul.f32 %v5967_v55, %v764_v56 }
 0xf44   :  { %768 = vrot.lane.b32.xlu1 %v766_v57, %s6297_s10 }
 0xfb6   :  { %v769_v58 = vpop.permute.xlu1 %768 }
 0xfb7   :  { %v771_v59 = vadd.f32 %v769_v58, %v761_v12 }
 0xfb9   :  { %5968 = vtanh.f32 %v771_v59 }
 0xfc3   :  { %v5969_v60 = vpop.eup %5968 }
 0xfc4   :  { %774 = vrot.lane.b32.xlu0 %v5969_v60, %s6297_s10 }
0x1036   :  { %v775_v61 = vpop.permute.xlu0 %774 }
0x1037   :  { %v777_v62 = vmul.f32 %v5967_v55, %v775_v61  ;;  %v4815_v55 = vld [vmem:[%s6927_s4 + $0x1] ss:$0 sm:$0xff] }
0x1039   :  { %779 = vrot.lane.b32.xlu1 %v777_v62, %s6298_s11 }
0x10ab   :  { %v780_v63 = vpop.permute.xlu1 %779 }
0x10ac   :  { %783 = vst.msk [vmem:[#allocation2 + $0xa] sm:$0x3] %vm257_vm2, %v780_v63  ;;  %5209 = vmatmul.mubr.msk.f32.vlgmr.msra.gmra.mrb[6].mxu1 %vm154_vm3, %v780_v63 }
0x10ad   :  { %5230 = vmatprep.mubr.msk.f32.mxu1 %vm154_vm3, %v994_v2  ;;  %5684 = vmatpush3.bf16.msra.mxu1 %v5681_v40 }
0x10ae   :  { %5686 = vmatprep.subr.bf16.mxu1 %v5685_v43 }
0x10b1   :  { %5688 = vmatpush3.bf16.msra.mxu1 %v5685_v43 }
0x10b2   :  { %5695 = vmatprep.subr.bf16.mxu1 %v6294_v0 }
0x117f   :  { %v854_v4 = vpop.f32.mrb[6].mxu1 }
0x1180   :  { %v858_v5 = vadd.f32 %v854_v4, %v785_v3  ;;  %v5210_v6 = vpop.f32.mrb[7].mxu1 }
0x1182   :  { %5970 = vtanh.f32 %v858_v5  ;;  %v4811_v9 = vmul.f32 -1.442695, %v858_v5 }
0x1184   :  { %5972 = vpow2.f32 %v4811_v9 }
0x118c   :  { %v5971_v7 = vpop.eup %5970 }
0x118d   :  { %868 = vrot.lane.b32.xlu0 %v5971_v7, %s6297_s10 }
0x118e   :  { %v5973_v10 = vpop.eup %5972 }
0x118f   :  { %v862_v11 = vadd.f32 1.0, %v5973_v10 }
0x1191   :  { %5974 = vrcp.f32 %v862_v11 }
0x119b   :  { %v5975_v13 = vpop.eup %5974 }
0x119c   :  { %v866_v16 = vmul.f32 %v5975_v13, %v771_v59 }
0x11ff   :  { %v869_v14 = vpop.permute.xlu0 %868 }
0x1200   :  { %v871_v15 = vmul.f32 %v5975_v13, %v869_v14 }
0x1202   :  { %873 = vrot.lane.b32.xlu1 %v871_v15, %s6297_s10 }
0x1274   :  { %v874_v17 = vpop.permute.xlu1 %873 }
0x1275   :  { %v876_v18 = vadd.f32 %v874_v17, %v866_v16 }
0x1277   :  { %5976 = vtanh.f32 %v876_v18 }
0x1281   :  { %v5977_v19 = vpop.eup %5976 }
0x1282   :  { %879 = vrot.lane.b32.xlu0 %v5977_v19, %s6297_s10 }
0x12f4   :  { %v880_v20 = vpop.permute.xlu0 %879 }
0x12f5   :  { %v882_v21 = vmul.f32 %v5975_v13, %v880_v20 }
0x12f7   :  { %884 = vrot.lane.b32.xlu1 %v882_v21, %s6298_s11 }
0x1369   :  { %v885_v22 = vpop.permute.xlu1 %884 }
0x136a   :  { %888 = vst.msk [vmem:[#allocation2 + $0xc] sm:$0x3] %vm257_vm2, %v885_v22  ;;  %5220 = vmatmul.mubr.msk.f32.vlgmr.msra.gmra.mrb[8].mxu0 %vm154_vm3, %v885_v22 }
0x136b   :  { %5241 = vmatprep.mubr.msk.f32.mxu0 %vm6295_vm0, %v6296_v1  ;;  %5691 = vmatpush3.bf16.msra.mxu0 %v6483_v47 }
0x136c   :  { %5692 = vmatprep.subr.bf16.mxu0 %v6294_v0 }
0x136f   :  { %5694 = vmatpush3.bf16.msra.mxu0 %v6486_v51 }
0x1370   :  { %5701 = vmatprep.subr.bf16.mxu0 %v6294_v0 }
0x1372   :  { %5242 = vmatmul.mubr.f32.vlgmr.msra.gmra.mrb[10].mxu0 %v6296_v1 }
0x1373   :  { %5703 = vmatpush3.bf16.msra.mxu0 %v6483_v47  ;;  %5263 = vmatprep.mubr.msk.f32.mxu0 %vm6295_vm0, %v6296_v1 }
0x1374   :  { %5704 = vmatprep.subr.bf16.mxu0 %v6294_v0 }
0x1377   :  { %5706 = vmatpush3.bf16.msra.mxu0 %v6486_v51 }
0x1378   :  { %5713 = vmatprep.subr.bf16.mxu0 %v6294_v0 }
0x143d   :  { %v959_v24 = vpop.f32.mrb[8].mxu0 }
0x143e   :  { %v963_v25 = vadd.f32 %v959_v24, %v890_v23  ;;  %v5221_v26 = vpop.f32.mrb[9].mxu0 }
0x1440   :  { %5978 = vtanh.f32 %v963_v25  ;;  %v4813_v28 = vmul.f32 -1.442695, %v963_v25 }
0x1442   :  { %5980 = vpow2.f32 %v4813_v28 }
0x1445   :  { %v1163_v8 = vpop.f32.mrb[10].mxu0 }
0x1446   :  { %v5243_v54 = vpop.f32.mrb[11].mxu0 }
0x144a   :  { %v5979_v27 = vpop.eup %5978 }
0x144b   :  { %973 = vrot.lane.b32.xlu0 %v5979_v27, %s6297_s10 }
0x144c   :  { %v5981_v29 = vpop.eup %5980 }
0x144d   :  { %v967_v30 = vadd.f32 1.0, %v5981_v29 }
0x144f   :  { %5982 = vrcp.f32 %v967_v30 }
0x1459   :  { %v5983_v31 = vpop.eup %5982 }
0x145a   :  { %v971_v34 = vmul.f32 %v5983_v31, %v876_v18 }
0x14bd   :  { %v974_v32 = vpop.permute.xlu0 %973 }
0x14be   :  { %v976_v33 = vmul.f32 %v5983_v31, %v974_v32 }
0x14c0   :  { %978 = vrot.lane.b32.xlu1 %v976_v33, %s6297_s10 }
0x1532   :  { %v979_v35 = vpop.permute.xlu1 %978 }
0x1533   :  { %v981_v36 = vadd.f32 %v979_v35, %v971_v34 }
0x1535   :  { %5984 = vtanh.f32 %v981_v36 }
0x153f   :  { %v5985_v37 = vpop.eup %5984 }
0x1540   :  { %984 = vrot.lane.b32.xlu0 %v5985_v37, %s6297_s10 }
0x15b2   :  { %v985_v49 = vpop.permute.xlu0 %984 }
0x15b3   :  { %v987_v50 = vmul.f32 %v5983_v31, %v985_v49 }
0x15b5   :  { %989 = vrot.lane.b32.xlu1 %v987_v50, %s6298_s11 }
0x1627   :  { %v990_v52 = vpop.permute.xlu1 %989 }
0x1628   :  { %993 = vst.msk [vmem:[#allocation2 + $0xe] sm:$0x3] %vm257_vm2, %v990_v52 }
0x162f   :  { %v995_v53 = vld [vmem:[#allocation2 + $0x8] sm:$0xff] }
0x1630   :  { %5231 = vmatmul.mubr.msk.f32.vlgmr.msra.gmra.mrb[8].mxu1 %vm154_vm3, %v995_v53 }
0x1631   :  { %5697 = vmatpush3.bf16.msra.mxu1 %v6483_v47  ;;  %5252 = vmatprep.mubr.msk.f32.mxu1 %vm6295_vm0, %v6296_v1 }
0x1632   :  { %5698 = vmatprep.subr.bf16.mxu1 %v6294_v0 }
0x1635   :  { %5700 = vmatpush3.bf16.msra.mxu1 %v6486_v51 }
0x1636   :  { %5707 = vmatprep.subr.bf16.mxu1 %v6294_v0 }
0x1703   :  { %v5232_v56 = vpop.f32.mrb[8].mxu1 }
0x1704   :  { %v1086_v57 = vadd.f32 %v5232_v56, %v4815_v55  ;;  %v1080_v12 = vpop.f32.mrb[9].mxu1 }
0x1705   :  { %v1081_v58 = vadd.f32 %v4815_v55, %v1080_v12 }
0x1706   :  { %1090 = vst [vmem:[#allocation3 + $0x8] sm:$0xff] %v1086_v57 }
0x1707   :  { %1089 = vst [vmem:[#allocation3] sm:$0xff] %v1081_v58 }
0x170e   :  { %v1096_v59 = vld [vmem:[#allocation3] sm:$0x3]  ;;  %v1197_v15 = vld [vmem:[#allocation3 + $0x2] sm:$0x3]  ;;  %v1300_v33 = vld [vmem:[#allocation3 + $0x4] sm:$0x3] }
0x170f   :  { %v1167_v60 = vadd.f32 %v1163_v8, %v1096_v59  ;;  %v1403_v53 = vld [vmem:[#allocation3 + $0x6] sm:$0x3] }
0x1711   :  { %5986 = vtanh.f32 %v1167_v60  ;;  %v4818_v62 = vmul.f32 -1.442695, %v1167_v60 }
0x1713   :  { %5988 = vpow2.f32 %v4818_v62 }
0x171b   :  { %v5987_v61 = vpop.eup %5986 }
0x171c   :  { %1177 = vrot.lane.b32.xlu0 %v5987_v61, %s6297_s10 }
0x171d   :  { %v5989_v63 = vpop.eup %5988 }
0x171e   :  { %v1171_v2 = vadd.f32 1.0, %v5989_v63 }
0x1720   :  { %5990 = vrcp.f32 %v1171_v2 }
0x172a   :  { %v5991_v3 = vpop.eup %5990 }
0x172b   :  { %v1175_v6 = vmul.f32 0.0, %v5991_v3 }
0x178e   :  { %v1178_v4 = vpop.permute.xlu0 %1177 }
0x178f   :  { %v1180_v5 = vmul.f32 %v5991_v3, %v1178_v4 }
0x1791   :  { %1182 = vrot.lane.b32.xlu1 %v1180_v5, %s6297_s10 }
0x1803   :  { %v1183_v7 = vpop.permute.xlu1 %1182 }
0x1804   :  { %v1185_v9 = vadd.f32 %v1183_v7, %v1175_v6  ;;  %v1506_v7 = vld [vmem:[#allocation3 + $0x8] sm:$0x3] }
0x1806   :  { %5992 = vtanh.f32 %v1185_v9 }
0x1810   :  { %v5993_v10 = vpop.eup %5992 }
0x1811   :  { %1188 = vrot.lane.b32.xlu0 %v5993_v10, %s6297_s10 }
0x1883   :  { %v1189_v11 = vpop.permute.xlu0 %1188 }
0x1884   :  { %v1191_v13 = vmul.f32 %v5991_v3, %v1189_v11 }
0x1886   :  { %1193 = vrot.lane.b32.xlu1 %v1191_v13, %s6298_s11 }
0x18f8   :  { %v1194_v14 = vpop.permute.xlu1 %1193 }
0x18f9   :  { %1196 = vst.msk [vmem:[#allocation2] sm:$0x3] %vm257_vm2, %v1194_v14  ;;  %5253 = vmatmul.mubr.msk.f32.vlgmr.msra.gmra.mrb[10].mxu1 %vm154_vm3, %v1194_v14 }
0x18fa   :  { %5709 = vmatpush3.bf16.msra.mxu1 %v6483_v47  ;;  %5274 = vmatprep.mubr.msk.f32.mxu1 %vm6295_vm0, %v6296_v1 }
0x18fb   :  { %5710 = vmatprep.subr.bf16.mxu1 %v6294_v0 }
0x18fe   :  { %5712 = vmatpush3.bf16.msra.mxu1 %v6486_v51 }
0x18ff   :  { %5719 = vmatprep.subr.bf16.mxu1 %v6294_v0 }
0x19cc   :  { %v1266_v16 = vpop.f32.mrb[10].mxu1 }
0x19cd   :  { %v1270_v17 = vadd.f32 %v1266_v16, %v1197_v15  ;;  %v5254_v18 = vpop.f32.mrb[11].mxu1 }
0x19cf   :  { %5994 = vtanh.f32 %v1270_v17  ;;  %v4820_v20 = vmul.f32 -1.442695, %v1270_v17 }
0x19d1   :  { %5996 = vpow2.f32 %v4820_v20 }
0x19d9   :  { %v5995_v19 = vpop.eup %5994 }
0x19da   :  { %1280 = vrot.lane.b32.xlu0 %v5995_v19, %s6297_s10 }
0x19db   :  { %v5997_v21 = vpop.eup %5996 }
0x19dc   :  { %v1274_v22 = vadd.f32 1.0, %v5997_v21 }
0x19de   :  { %5998 = vrcp.f32 %v1274_v22 }
0x19e8   :  { %v5999_v23 = vpop.eup %5998 }
0x19e9   :  { %v1278_v26 = vmul.f32 %v5999_v23, %v1185_v9 }
0x1a4c   :  { %v1281_v24 = vpop.permute.xlu0 %1280 }
0x1a4d   :  { %v1283_v25 = vmul.f32 %v5999_v23, %v1281_v24 }
0x1a4f   :  { %1285 = vrot.lane.b32.xlu1 %v1283_v25, %s6297_s10 }
0x1ac1   :  { %v1286_v27 = vpop.permute.xlu1 %1285 }
0x1ac2   :  { %v1288_v28 = vadd.f32 %v1286_v27, %v1278_v26  ;;  %v1609_v27 = vld [vmem:[#allocation3 + $0xa] sm:$0x3] }
0x1ac4   :  { %6000 = vtanh.f32 %v1288_v28 }
0x1ace   :  { %v6001_v29 = vpop.eup %6000 }
0x1acf   :  { %1291 = vrot.lane.b32.xlu0 %v6001_v29, %s6297_s10 }
0x1b41   :  { %v1292_v30 = vpop.permute.xlu0 %1291 }
0x1b42   :  { %v1294_v31 = vmul.f32 %v5999_v23, %v1292_v30 }
0x1b44   :  { %1296 = vrot.lane.b32.xlu1 %v1294_v31, %s6298_s11 }
0x1bb6   :  { %v1297_v32 = vpop.permute.xlu1 %1296 }
0x1bb7   :  { %1299 = vst.msk [vmem:[#allocation2 + $0x2] sm:$0x3] %vm257_vm2, %v1297_v32  ;;  %5264 = vmatmul.mubr.msk.f32.vlgmr.msra.gmra.mrb[12].mxu0 %vm154_vm3, %v1297_v32 }
0x1bb8   :  { %5715 = vmatpush3.bf16.msra.mxu0 %v6483_v47  ;;  %5285 = vmatprep.mubr.msk.f32.mxu0 %vm6295_vm0, %v6296_v1 }
0x1bb9   :  { %5716 = vmatprep.subr.bf16.mxu0 %v6294_v0 }
0x1bbc   :  { %5718 = vmatpush3.bf16.msra.mxu0 %v6486_v51 }
0x1bbd   :  { %5725 = vmatprep.subr.bf16.mxu0 %v6294_v0 }
0x1c8a   :  { %v1369_v34 = vpop.f32.mrb[12].mxu0 }
0x1c8b   :  { %v1373_v35 = vadd.f32 %v1369_v34, %v1300_v33  ;;  %v5265_v36 = vpop.f32.mrb[13].mxu0 }
0x1c8d   :  { %6002 = vtanh.f32 %v1373_v35  ;;  %v4822_v38 = vmul.f32 -1.442695, %v1373_v35 }
0x1c8f   :  { %6004 = vpow2.f32 %v4822_v38 }
0x1c97   :  { %v6003_v37 = vpop.eup %6002 }
0x1c98   :  { %1383 = vrot.lane.b32.xlu0 %v6003_v37, %s6297_s10 }
0x1c99   :  { %v6005_v39 = vpop.eup %6004 }
0x1c9a   :  { %v1377_v40 = vadd.f32 1.0, %v6005_v39 }
0x1c9c   :  { %6006 = vrcp.f32 %v1377_v40 }
0x1ca6   :  { %v6007_v41 = vpop.eup %6006 }
0x1ca7   :  { %v1381_v44 = vmul.f32 %v6007_v41, %v1288_v28 }
0x1d0a   :  { %v1384_v42 = vpop.permute.xlu0 %1383 }
0x1d0b   :  { %v1386_v43 = vmul.f32 %v6007_v41, %v1384_v42 }
0x1d0d   :  { %1388 = vrot.lane.b32.xlu1 %v1386_v43, %s6297_s10 }
0x1d7f   :  { %v1389_v45 = vpop.permute.xlu1 %1388 }
0x1d80   :  { %v1391_v46 = vadd.f32 %v1389_v45, %v1381_v44  ;;  %v1712_v44 = vld [vmem:[#allocation3 + $0xc] sm:$0x3] }
0x1d82   :  { %6008 = vtanh.f32 %v1391_v46 }
0x1d8c   :  { %v6009_v48 = vpop.eup %6008 }
0x1d8d   :  { %1394 = vrot.lane.b32.xlu0 %v6009_v48, %s6297_s10 }
0x1dff   :  { %v1395_v49 = vpop.permute.xlu0 %1394 }
0x1e00   :  { %v1397_v50 = vmul.f32 %v6007_v41, %v1395_v49 }
0x1e02   :  { %1399 = vrot.lane.b32.xlu1 %v1397_v50, %s6298_s11 }
0x1e74   :  { %v1400_v52 = vpop.permute.xlu1 %1399 }
0x1e75   :  { %1402 = vst.msk [vmem:[#allocation2 + $0x4] sm:$0x3] %vm257_vm2, %v1400_v52  ;;  %5275 = vmatmul.mubr.msk.f32.vlgmr.msra.gmra.mrb[12].mxu1 %vm154_vm3, %v1400_v52 }
0x1e76   :  { %5721 = vmatpush3.bf16.msra.mxu1 %v6483_v47  ;;  %5296 = vmatprep.mubr.msk.f32.mxu1 %vm6295_vm0, %v6296_v1 }
0x1e77   :  { %5722 = vmatprep.subr.bf16.mxu1 %v6294_v0 }
0x1e7a   :  { %5724 = vmatpush3.bf16.msra.mxu1 %v6486_v51 }
0x1e7b   :  { %5731 = vmatprep.subr.bf16.mxu1 %v6294_v0 }
0x1f48   :  { %v1472_v8 = vpop.f32.mrb[12].mxu1 }
0x1f49   :  { %v1476_v54 = vadd.f32 %v1472_v8, %v1403_v53  ;;  %v5276_v55 = vpop.f32.mrb[13].mxu1 }
0x1f4b   :  { %6010 = vtanh.f32 %v1476_v54  ;;  %v4824_v57 = vmul.f32 -1.442695, %v1476_v54 }
0x1f4d   :  { %6012 = vpow2.f32 %v4824_v57 }
0x1f55   :  { %v6011_v56 = vpop.eup %6010 }
0x1f56   :  { %1486 = vrot.lane.b32.xlu0 %v6011_v56, %s6297_s10 }
0x1f57   :  { %v6013_v12 = vpop.eup %6012 }
0x1f58   :  { %v1480_v58 = vadd.f32 1.0, %v6013_v12 }
0x1f5a   :  { %6014 = vrcp.f32 %v1480_v58 }
0x1f64   :  { %v6015_v59 = vpop.eup %6014 }
0x1f65   :  { %v1484_v62 = vmul.f32 %v6015_v59, %v1391_v46 }
0x1fc8   :  { %v1487_v60 = vpop.permute.xlu0 %1486 }
0x1fc9   :  { %v1489_v61 = vmul.f32 %v6015_v59, %v1487_v60 }
0x1fcb   :  { %1491 = vrot.lane.b32.xlu1 %v1489_v61, %s6297_s10 }
0x203d   :  { %v1492_v63 = vpop.permute.xlu1 %1491 }
0x203e   :  { %v1494_v2 = vadd.f32 %v1492_v63, %v1484_v62  ;;  %v1815_v62 = vld [vmem:[#allocation3 + $0xe] sm:$0x3] }
0x2040   :  { %6016 = vtanh.f32 %v1494_v2 }
0x204a   :  { %v6017_v3 = vpop.eup %6016 }
0x204b   :  { %1497 = vrot.lane.b32.xlu0 %v6017_v3, %s6297_s10 }
0x20bd   :  { %v1498_v4 = vpop.permute.xlu0 %1497 }
0x20be   :  { %v1500_v5 = vmul.f32 %v6015_v59, %v1498_v4 }
0x20c0   :  { %1502 = vrot.lane.b32.xlu1 %v1500_v5, %s6298_s11 }
0x2132   :  { %v1503_v6 = vpop.permute.xlu1 %1502 }
0x2133   :  { %1505 = vst.msk [vmem:[#allocation2 + $0x6] sm:$0x3] %vm257_vm2, %v1503_v6  ;;  %5286 = vmatmul.mubr.msk.f32.vlgmr.msra.gmra.mrb[14].mxu0 %vm154_vm3, %v1503_v6 }
0x2134   :  { %5727 = vmatpush3.bf16.msra.mxu0 %v6483_v47  ;;  %5307 = vmatprep.mubr.msk.f32.mxu0 %vm6295_vm0, %v6296_v1 }
0x2135   :  { %5728 = vmatprep.subr.bf16.mxu0 %v6294_v0 }
0x2138   :  { %5730 = vmatpush3.bf16.msra.mxu0 %v6486_v51 }
0x213a   :  { %v1918_v43 = vld [vmem:[#allocation2] sm:$0xff] }
0x2206   :  { %v1575_v9 = vpop.f32.mrb[14].mxu0 }
0x2207   :  { %v1579_v10 = vadd.f32 %v1575_v9, %v1506_v7  ;;  %v5287_v11 = vpop.f32.mrb[15].mxu0 }
0x2209   :  { %6018 = vtanh.f32 %v1579_v10  ;;  %v4826_v14 = vmul.f32 -1.442695, %v1579_v10 }
0x220b   :  { %6020 = vpow2.f32 %v4826_v14 }
0x2213   :  { %v6019_v13 = vpop.eup %6018 }
0x2214   :  { %1589 = vrot.lane.b32.xlu0 %v6019_v13, %s6297_s10 }
0x2215   :  { %v6021_v15 = vpop.eup %6020 }
0x2216   :  { %v1583_v16 = vadd.f32 1.0, %v6021_v15 }
0x2218   :  { %6022 = vrcp.f32 %v1583_v16 }
0x2222   :  { %v6023_v17 = vpop.eup %6022 }
0x2223   :  { %v1587_v20 = vmul.f32 %v6023_v17, %v1494_v2 }
0x2286   :  { %v1590_v18 = vpop.permute.xlu0 %1589 }
0x2287   :  { %v1592_v19 = vmul.f32 %v6023_v17, %v1590_v18  ;;  %v1922_v18 = vld [vmem:[#allocation4 + $0x28] sm:$0xff] }
0x2289   :  { %1594 = vrot.lane.b32.xlu1 %v1592_v19, %s6297_s10 }
0x22fb   :  { %v1595_v21 = vpop.permute.xlu1 %1594 }
0x22fc   :  { %v1597_v22 = vadd.f32 %v1595_v21, %v1587_v20  ;;  %v1923_v20 = vld [vmem:[#allocation4 + $0x30] sm:$0xff]  ;;  %v1924_v21 = vld [vmem:[#allocation4 + $0x38] sm:$0xff] }
0x22fe   :  { %6024 = vtanh.f32 %v1597_v22 }
0x2308   :  { %v6025_v23 = vpop.eup %6024 }
0x2309   :  { %1600 = vrot.lane.b32.xlu0 %v6025_v23, %s6297_s10  ;;  %v2017_v23 = vld [vmem:[#allocation6 + $0x40] sm:$0xff] }
0x237b   :  { %v1601_v24 = vpop.permute.xlu0 %1600 }
0x237c   :  { %v1603_v25 = vmul.f32 %v6023_v17, %v1601_v24  ;;  %v1921_v17 = vld [vmem:[#allocation4 + $0x20] sm:$0xff]  ;;  %v2018_v24 = vld [vmem:[#allocation6 + $0x48] sm:$0xff] }
0x237d   :  { %v5737_v19 = vpack.c.bf16 %v1922_v18, %v1921_v17 }
0x237e   :  { %1605 = vrot.lane.b32.xlu1 %v1603_v25, %s6298_s11  ;;  %v2019_v25 = vld [vmem:[#allocation6 + $0x50] sm:$0xff] }
0x237f   :  { %5738 = vmatprep.subr.bf16.mxu0 %v5737_v19 }
0x23f0   :  { %v1606_v26 = vpop.permute.xlu1 %1605 }
0x23f1   :  { %1608 = vst.msk [vmem:[#allocation2 + $0x8] sm:$0x3] %vm257_vm2, %v1606_v26  ;;  %5297 = vmatmul.mubr.msk.f32.vlgmr.msra.gmra.mrb[14].mxu1 %vm154_vm3, %v1606_v26  ;;  %v6588_v26 = vpack.c.bf16 %v2018_v24, %v2017_v23 }
0x23f2   :  { %5733 = vmatpush3.bf16.msra.mxu1 %v6483_v47  ;;  %5318 = vmatprep.mubr.msk.f32.mxu1 %vm6295_vm0, %v6296_v1 }
0x23f3   :  { %5734 = vmatprep.subr.bf16.mxu1 %v6294_v0 }
0x23f6   :  { %5736 = vmatpush3.bf16.msra.mxu1 %v6486_v51 }
0x23f7   :  { %5745 = vmatprep.subr.bf16.mxu1 %v6294_v0 }
0x24c4   :  { %v1678_v28 = vpop.f32.mrb[14].mxu1 }
0x24c5   :  { %v1682_v29 = vadd.f32 %v1678_v28, %v1609_v27  ;;  %v5298_v30 = vpop.f32.mrb[15].mxu1  ;;  %v2020_v27 = vld [vmem:[#allocation6 + $0x58] sm:$0xff] }
0x24c6   :  { %v6591_v30 = vpack.c.bf16 %v2020_v27, %v2019_v25 }
0x24c7   :  { %6026 = vtanh.f32 %v1682_v29  ;;  %v4828_v32 = vmul.f32 -1.442695, %v1682_v29 }
0x24c9   :  { %6028 = vpow2.f32 %v4828_v32 }
0x24d1   :  { %v6027_v31 = vpop.eup %6026 }
0x24d2   :  { %1692 = vrot.lane.b32.xlu0 %v6027_v31, %s6297_s10 }
0x24d3   :  { %v6029_v47 = vpop.eup %6028 }
0x24d4   :  { %v1686_v33 = vadd.f32 1.0, %v6029_v47 }
0x24d6   :  { %6030 = vrcp.f32 %v1686_v33 }
0x24e0   :  { %v6031_v34 = vpop.eup %6030 }
0x24e1   :  { %v1690_v51 = vmul.f32 %v6031_v34, %v1597_v22  ;;  %v5741_v22 = vpack.c.bf16 %v1924_v21, %v1923_v20 }
0x2544   :  { %v1693_v35 = vpop.permute.xlu0 %1692 }
0x2545   :  { %v1695_v36 = vmul.f32 %v6031_v34, %v1693_v35 }
0x2547   :  { %1697 = vrot.lane.b32.xlu1 %v1695_v36, %s6297_s10 }
0x25b9   :  { %v1698_v37 = vpop.permute.xlu1 %1697 }
0x25ba   :  { %v1700_v38 = vadd.f32 %v1698_v37, %v1690_v51 }
0x25bc   :  { %6032 = vtanh.f32 %v1700_v38 }
0x25c6   :  { %v6033_v39 = vpop.eup %6032 }
0x25c7   :  { %1703 = vrot.lane.b32.xlu0 %v6033_v39, %s6297_s10 }
0x2639   :  { %v1704_v40 = vpop.permute.xlu0 %1703 }
0x263a   :  { %v1706_v41 = vmul.f32 %v6031_v34, %v1704_v40  ;;  %v4834_v34 = vld [vmem:[%s6927_s4 + $0x2] ss:$0 sm:$0xff] }
0x263c   :  { %1708 = vrot.lane.b32.xlu1 %v1706_v41, %s6298_s11 }
0x26ae   :  { %v1709_v42 = vpop.permute.xlu1 %1708 }
0x26af   :  { %1711 = vst.msk [vmem:[#allocation2 + $0xa] sm:$0x3] %vm257_vm2, %v1709_v42  ;;  %5308 = vmatmul.mubr.msk.f32.vlgmr.msra.gmra.mrb[16].mxu0 %vm154_vm3, %v1709_v42 }
0x26b0   :  { %5329 = vmatprep.mubr.msk.f32.mxu0 %vm154_vm3, %v1918_v43  ;;  %5740 = vmatpush3.bf16.msra.mxu0 %v5737_v19 }
0x26b1   :  { %5742 = vmatprep.subr.bf16.mxu0 %v5741_v22 }
0x26b4   :  { %5744 = vmatpush3.bf16.msra.mxu0 %v5741_v22 }
0x26b5   :  { %5751 = vmatprep.subr.bf16.mxu0 %v6294_v0 }
0x2782   :  { %v1781_v45 = vpop.f32.mrb[16].mxu0 }
0x2783   :  { %v1785_v46 = vadd.f32 %v1781_v45, %v1712_v44  ;;  %v5309_v48 = vpop.f32.mrb[17].mxu0 }
0x2785   :  { %6034 = vtanh.f32 %v1785_v46  ;;  %v4830_v50 = vmul.f32 -1.442695, %v1785_v46 }
0x2787   :  { %6036 = vpow2.f32 %v4830_v50 }
0x278f   :  { %v6035_v49 = vpop.eup %6034 }
0x2790   :  { %1795 = vrot.lane.b32.xlu0 %v6035_v49, %s6297_s10 }
0x2791   :  { %v6037_v52 = vpop.eup %6036 }
0x2792   :  { %v1789_v53 = vadd.f32 1.0, %v6037_v52 }
0x2794   :  { %6038 = vrcp.f32 %v1789_v53 }
0x279e   :  { %v6039_v8 = vpop.eup %6038 }
0x279f   :  { %v1793_v56 = vmul.f32 %v6039_v8, %v1700_v38 }
0x2802   :  { %v1796_v54 = vpop.permute.xlu0 %1795 }
0x2803   :  { %v1798_v55 = vmul.f32 %v6039_v8, %v1796_v54 }
0x2805   :  { %1800 = vrot.lane.b32.xlu1 %v1798_v55, %s6297_s10 }
0x2877   :  { %v1801_v57 = vpop.permute.xlu1 %1800 }
0x2878   :  { %v1803_v12 = vadd.f32 %v1801_v57, %v1793_v56 }
0x287a   :  { %6040 = vtanh.f32 %v1803_v12 }
0x2884   :  { %v6041_v58 = vpop.eup %6040 }
0x2885   :  { %1806 = vrot.lane.b32.xlu0 %v6041_v58, %s6297_s10 }
0x28f7   :  { %v1807_v59 = vpop.permute.xlu0 %1806 }
0x28f8   :  { %v1809_v60 = vmul.f32 %v6039_v8, %v1807_v59 }
0x28fa   :  { %1811 = vrot.lane.b32.xlu1 %v1809_v60, %s6298_s11 }
0x296c   :  { %v1812_v61 = vpop.permute.xlu1 %1811 }
0x296d   :  { %1814 = vst.msk [vmem:[#allocation2 + $0xc] sm:$0x3] %vm257_vm2, %v1812_v61  ;;  %5319 = vmatmul.mubr.msk.f32.vlgmr.msra.gmra.mrb[16].mxu1 %vm154_vm3, %v1812_v61 }
0x296e   :  { %5340 = vmatprep.mubr.msk.f32.mxu1 %vm6295_vm0, %v6296_v1  ;;  %5747 = vmatpush3.bf16.msra.mxu1 %v6588_v26 }
0x296f   :  { %5748 = vmatprep.subr.bf16.mxu1 %v6294_v0 }
0x2972   :  { %5750 = vmatpush3.bf16.msra.mxu1 %v6591_v30 }
0x2973   :  { %5757 = vmatprep.subr.bf16.mxu1 %v6294_v0 }
0x2975   :  { %5341 = vmatmul.mubr.f32.vlgmr.msra.gmra.mrb[18].mxu1 %v6296_v1 }
0x2976   :  { %5759 = vmatpush3.bf16.msra.mxu1 %v6588_v26  ;;  %5362 = vmatprep.mubr.msk.f32.mxu1 %vm6295_vm0, %v6296_v1 }
0x2977   :  { %5760 = vmatprep.subr.bf16.mxu1 %v6294_v0 }
0x297a   :  { %5762 = vmatpush3.bf16.msra.mxu1 %v6591_v30 }
0x297b   :  { %5769 = vmatprep.subr.bf16.mxu1 %v6294_v0 }
0x2a40   :  { %v1884_v63 = vpop.f32.mrb[16].mxu1 }
0x2a41   :  { %v1888_v2 = vadd.f32 %v1884_v63, %v1815_v62  ;;  %v5320_v3 = vpop.f32.mrb[17].mxu1 }
0x2a43   :  { %6042 = vtanh.f32 %v1888_v2  ;;  %v4832_v5 = vmul.f32 -1.442695, %v1888_v2 }
0x2a45   :  { %6044 = vpow2.f32 %v4832_v5 }
0x2a48   :  { %v2088_v47 = vpop.f32.mrb[18].mxu1 }
0x2a49   :  { %v5342_v33 = vpop.f32.mrb[19].mxu1 }
0x2a4d   :  { %v6043_v4 = vpop.eup %6042 }
0x2a4e   :  { %1898 = vrot.lane.b32.xlu0 %v6043_v4, %s6297_s10 }
0x2a4f   :  { %v6045_v6 = vpop.eup %6044 }
0x2a50   :  { %v1892_v7 = vadd.f32 1.0, %v6045_v6 }
0x2a52   :  { %6046 = vrcp.f32 %v1892_v7 }
0x2a5c   :  { %v6047_v9 = vpop.eup %6046 }
0x2a5d   :  { %v1896_v13 = vmul.f32 %v6047_v9, %v1803_v12 }
0x2ac0   :  { %v1899_v10 = vpop.permute.xlu0 %1898 }
0x2ac1   :  { %v1901_v11 = vmul.f32 %v6047_v9, %v1899_v10 }
0x2ac3   :  { %1903 = vrot.lane.b32.xlu1 %v1901_v11, %s6297_s10 }
0x2b35   :  { %v1904_v14 = vpop.permute.xlu1 %1903 }
0x2b36   :  { %v1906_v15 = vadd.f32 %v1904_v14, %v1896_v13 }
0x2b38   :  { %6048 = vtanh.f32 %v1906_v15 }
0x2b42   :  { %v6049_v16 = vpop.eup %6048 }
0x2b43   :  { %1909 = vrot.lane.b32.xlu0 %v6049_v16, %s6297_s10 }
0x2bb5   :  { %v1910_v28 = vpop.permute.xlu0 %1909 }
0x2bb6   :  { %v1912_v29 = vmul.f32 %v6047_v9, %v1910_v28 }
0x2bb8   :  { %1914 = vrot.lane.b32.xlu1 %v1912_v29, %s6298_s11 }
0x2c2a   :  { %v1915_v31 = vpop.permute.xlu1 %1914 }
0x2c2b   :  { %1917 = vst.msk [vmem:[#allocation2 + $0xe] sm:$0x3] %vm257_vm2, %v1915_v31 }
0x2c32   :  { %v1919_v32 = vld [vmem:[#allocation2 + $0x8] sm:$0xff] }
0x2c33   :  { %5330 = vmatmul.mubr.msk.f32.vlgmr.msra.gmra.mrb[18].mxu0 %vm154_vm3, %v1919_v32 }
0x2c34   :  { %5753 = vmatpush3.bf16.msra.mxu0 %v6588_v26  ;;  %5351 = vmatprep.mubr.msk.f32.mxu0 %vm6295_vm0, %v6296_v1 }
0x2c35   :  { %5754 = vmatprep.subr.bf16.mxu0 %v6294_v0 }
0x2c38   :  { %5756 = vmatpush3.bf16.msra.mxu0 %v6591_v30 }
0x2c39   :  { %5763 = vmatprep.subr.bf16.mxu0 %v6294_v0 }
0x2d06   :  { %v5331_v35 = vpop.f32.mrb[18].mxu0 }
0x2d07   :  { %v2011_v36 = vadd.f32 %v5331_v35, %v4834_v34  ;;  %v2005_v51 = vpop.f32.mrb[19].mxu0 }
0x2d08   :  { %v2006_v37 = vadd.f32 %v4834_v34, %v2005_v51 }
0x2d09   :  { %2015 = vst [vmem:[#allocation3 + $0x8] sm:$0xff] %v2011_v36 }
0x2d0a   :  { %2014 = vst [vmem:[#allocation3] sm:$0xff] %v2006_v37 }
0x2d11   :  { %v2021_v38 = vld [vmem:[#allocation3] sm:$0x3]  ;;  %v2122_v55 = vld [vmem:[#allocation3 + $0x2] sm:$0x3]  ;;  %v2225_v11 = vld [vmem:[#allocation3 + $0x4] sm:$0x3] }
0x2d12   :  { %v2092_v39 = vadd.f32 %v2088_v47, %v2021_v38  ;;  %v2328_v32 = vld [vmem:[#allocation3 + $0x6] sm:$0x3] }
0x2d14   :  { %6050 = vtanh.f32 %v2092_v39  ;;  %v4837_v41 = vmul.f32 -1.442695, %v2092_v39 }
0x2d16   :  { %6052 = vpow2.f32 %v4837_v41 }
0x2d1e   :  { %v6051_v40 = vpop.eup %6050 }
0x2d1f   :  { %2102 = vrot.lane.b32.xlu0 %v6051_v40, %s6297_s10 }
0x2d20   :  { %v6053_v42 = vpop.eup %6052 }
0x2d21   :  { %v2096_v43 = vadd.f32 1.0, %v6053_v42 }
0x2d23   :  { %6054 = vrcp.f32 %v2096_v43 }
0x2d2d   :  { %v6055_v44 = vpop.eup %6054 }
0x2d2e   :  { %v2100_v48 = vmul.f32 0.0, %v6055_v44 }
0x2d91   :  { %v2103_v45 = vpop.permute.xlu0 %2102 }
0x2d92   :  { %v2105_v46 = vmul.f32 %v6055_v44, %v2103_v45 }
0x2d94   :  { %2107 = vrot.lane.b32.xlu1 %v2105_v46, %s6297_s10 }
0x2e06   :  { %v2108_v49 = vpop.permute.xlu1 %2107 }
0x2e07   :  { %v2110_v50 = vadd.f32 %v2108_v49, %v2100_v48  ;;  %v2431_v49 = vld [vmem:[#allocation3 + $0x8] sm:$0x3] }
0x2e09   :  { %6056 = vtanh.f32 %v2110_v50 }
0x2e13   :  { %v6057_v52 = vpop.eup %6056 }
0x2e14   :  { %2113 = vrot.lane.b32.xlu0 %v6057_v52, %s6297_s10 }
0x2e86   :  { %v2114_v53 = vpop.permute.xlu0 %2113 }
0x2e87   :  { %v2116_v8 = vmul.f32 %v6055_v44, %v2114_v53 }
0x2e89   :  { %2118 = vrot.lane.b32.xlu1 %v2116_v8, %s6298_s11 }
0x2efb   :  { %v2119_v54 = vpop.permute.xlu1 %2118 }
0x2efc   :  { %2121 = vst.msk [vmem:[#allocation2] sm:$0x3] %vm257_vm2, %v2119_v54  ;;  %5352 = vmatmul.mubr.msk.f32.vlgmr.msra.gmra.mrb[20].mxu0 %vm154_vm3, %v2119_v54 }
0x2efd   :  { %5765 = vmatpush3.bf16.msra.mxu0 %v6588_v26  ;;  %5373 = vmatprep.mubr.msk.f32.mxu0 %vm6295_vm0, %v6296_v1 }
0x2efe   :  { %5766 = vmatprep.subr.bf16.mxu0 %v6294_v0 }
0x2f01   :  { %5768 = vmatpush3.bf16.msra.mxu0 %v6591_v30 }
0x2f02   :  { %5775 = vmatprep.subr.bf16.mxu0 %v6294_v0 }
0x2fcf   :  { %v2191_v56 = vpop.f32.mrb[20].mxu0 }
0x2fd0   :  { %v2195_v57 = vadd.f32 %v2191_v56, %v2122_v55  ;;  %v5353_v12 = vpop.f32.mrb[21].mxu0 }
0x2fd2   :  { %6058 = vtanh.f32 %v2195_v57  ;;  %v4839_v59 = vmul.f32 -1.442695, %v2195_v57 }
0x2fd4   :  { %6060 = vpow2.f32 %v4839_v59 }
0x2fdc   :  { %v6059_v58 = vpop.eup %6058 }
0x2fdd   :  { %2205 = vrot.lane.b32.xlu0 %v6059_v58, %s6297_s10 }
0x2fde   :  { %v6061_v60 = vpop.eup %6060 }
0x2fdf   :  { %v2199_v61 = vadd.f32 1.0, %v6061_v60 }
0x2fe1   :  { %6062 = vrcp.f32 %v2199_v61 }
0x2feb   :  { %v6063_v62 = vpop.eup %6062 }
0x2fec   :  { %v2203_v3 = vmul.f32 %v6063_v62, %v2110_v50 }
0x304f   :  { %v2206_v63 = vpop.permute.xlu0 %2205 }
0x3050   :  { %v2208_v2 = vmul.f32 %v6063_v62, %v2206_v63 }
0x3052   :  { %2210 = vrot.lane.b32.xlu1 %v2208_v2, %s6297_s10 }
0x30c4   :  { %v2211_v4 = vpop.permute.xlu1 %2210 }
0x30c5   :  { %v2213_v5 = vadd.f32 %v2211_v4, %v2203_v3  ;;  %v2534_v4 = vld [vmem:[#allocation3 + $0xa] sm:$0x3] }
0x30c7   :  { %6064 = vtanh.f32 %v2213_v5 }
0x30d1   :  { %v6065_v6 = vpop.eup %6064 }
0x30d2   :  { %2216 = vrot.lane.b32.xlu0 %v6065_v6, %s6297_s10 }
0x3144   :  { %v2217_v7 = vpop.permute.xlu0 %2216 }
0x3145   :  { %v2219_v9 = vmul.f32 %v6063_v62, %v2217_v7 }
0x3147   :  { %2221 = vrot.lane.b32.xlu1 %v2219_v9, %s6298_s11 }
0x31b9   :  { %v2222_v10 = vpop.permute.xlu1 %2221 }
0x31ba   :  { %2224 = vst.msk [vmem:[#allocation2 + $0x2] sm:$0x3] %vm257_vm2, %v2222_v10  ;;  %5363 = vmatmul.mubr.msk.f32.vlgmr.msra.gmra.mrb[20].mxu1 %vm154_vm3, %v2222_v10 }
0x31bb   :  { %5771 = vmatpush3.bf16.msra.mxu1 %v6588_v26  ;;  %5384 = vmatprep.mubr.msk.f32.mxu1 %vm6295_vm0, %v6296_v1 }
0x31bc   :  { %5772 = vmatprep.subr.bf16.mxu1 %v6294_v0 }
0x31bf   :  { %5774 = vmatpush3.bf16.msra.mxu1 %v6591_v30 }
0x31c0   :  { %5781 = vmatprep.subr.bf16.mxu1 %v6294_v0 }
0x328d   :  { %v2294_v13 = vpop.f32.mrb[20].mxu1 }
0x328e   :  { %v2298_v14 = vadd.f32 %v2294_v13, %v2225_v11  ;;  %v5364_v15 = vpop.f32.mrb[21].mxu1 }
0x3290   :  { %6066 = vtanh.f32 %v2298_v14  ;;  %v4841_v17 = vmul.f32 -1.442695, %v2298_v14 }
0x3292   :  { %6068 = vpow2.f32 %v4841_v17 }
0x329a   :  { %v6067_v16 = vpop.eup %6066 }
0x329b   :  { %2308 = vrot.lane.b32.xlu0 %v6067_v16, %s6297_s10 }
0x329c   :  { %v6069_v18 = vpop.eup %6068 }
0x329d   :  { %v2302_v19 = vadd.f32 1.0, %v6069_v18 }
0x329f   :  { %6070 = vrcp.f32 %v2302_v19 }
0x32a9   :  { %v6071_v20 = vpop.eup %6070 }
0x32aa   :  { %v2306_v23 = vmul.f32 %v6071_v20, %v2213_v5 }
0x330d   :  { %v2309_v21 = vpop.permute.xlu0 %2308 }
0x330e   :  { %v2311_v22 = vmul.f32 %v6071_v20, %v2309_v21 }
0x3310   :  { %2313 = vrot.lane.b32.xlu1 %v2311_v22, %s6297_s10 }
0x3382   :  { %v2314_v24 = vpop.permute.xlu1 %2313 }
0x3383   :  { %v2316_v25 = vadd.f32 %v2314_v24, %v2306_v23  ;;  %v2637_v23 = vld [vmem:[#allocation3 + $0xc] sm:$0x3] }
0x3385   :  { %6072 = vtanh.f32 %v2316_v25 }
0x338f   :  { %v6073_v27 = vpop.eup %6072 }
0x3390   :  { %2319 = vrot.lane.b32.xlu0 %v6073_v27, %s6297_s10 }
0x3402   :  { %v2320_v28 = vpop.permute.xlu0 %2319 }
0x3403   :  { %v2322_v29 = vmul.f32 %v6071_v20, %v2320_v28 }
0x3405   :  { %2324 = vrot.lane.b32.xlu1 %v2322_v29, %s6298_s11 }
0x3477   :  { %v2325_v31 = vpop.permute.xlu1 %2324 }
0x3478   :  { %2327 = vst.msk [vmem:[#allocation2 + $0x4] sm:$0x3] %vm257_vm2, %v2325_v31  ;;  %5374 = vmatmul.mubr.msk.f32.vlgmr.msra.gmra.mrb[22].mxu0 %vm154_vm3, %v2325_v31 }
0x3479   :  { %5777 = vmatpush3.bf16.msra.mxu0 %v6588_v26  ;;  %5395 = vmatprep.mubr.msk.f32.mxu0 %vm6295_vm0, %v6296_v1 }
0x347a   :  { %5778 = vmatprep.subr.bf16.mxu0 %v6294_v0 }
0x347d   :  { %5780 = vmatpush3.bf16.msra.mxu0 %v6591_v30 }
0x347e   :  { %5787 = vmatprep.subr.bf16.mxu0 %v6294_v0 }
0x354b   :  { %v2397_v47 = vpop.f32.mrb[22].mxu0 }
0x354c   :  { %v2401_v33 = vadd.f32 %v2397_v47, %v2328_v32  ;;  %v5375_v34 = vpop.f32.mrb[23].mxu0 }
0x354e   :  { %6074 = vtanh.f32 %v2401_v33  ;;  %v4843_v36 = vmul.f32 -1.442695, %v2401_v33 }
0x3550   :  { %6076 = vpow2.f32 %v4843_v36 }
0x3558   :  { %v6075_v35 = vpop.eup %6074 }
0x3559   :  { %2411 = vrot.lane.b32.xlu0 %v6075_v35, %s6297_s10 }
0x355a   :  { %v6077_v51 = vpop.eup %6076 }
0x355b   :  { %v2405_v37 = vadd.f32 1.0, %v6077_v51 }
0x355d   :  { %6078 = vrcp.f32 %v2405_v37 }
0x3567   :  { %v6079_v38 = vpop.eup %6078 }
0x3568   :  { %v2409_v41 = vmul.f32 %v6079_v38, %v2316_v25 }
0x35cb   :  { %v2412_v39 = vpop.permute.xlu0 %2411 }
0x35cc   :  { %v2414_v40 = vmul.f32 %v6079_v38, %v2412_v39 }
0x35ce   :  { %2416 = vrot.lane.b32.xlu1 %v2414_v40, %s6297_s10 }
0x3640   :  { %v2417_v42 = vpop.permute.xlu1 %2416 }
0x3641   :  { %v2419_v43 = vadd.f32 %v2417_v42, %v2409_v41  ;;  %v2740_v41 = vld [vmem:[#allocation3 + $0xe] sm:$0x3] }
0x3643   :  { %6080 = vtanh.f32 %v2419_v43 }
0x364d   :  { %v6081_v44 = vpop.eup %6080 }
0x364e   :  { %2422 = vrot.lane.b32.xlu0 %v6081_v44, %s6297_s10 }
0x36c0   :  { %v2423_v45 = vpop.permute.xlu0 %2422 }
0x36c1   :  { %v2425_v46 = vmul.f32 %v6079_v38, %v2423_v45 }
0x36c3   :  { %2427 = vrot.lane.b32.xlu1 %v2425_v46, %s6298_s11 }
0x3735   :  { %v2428_v48 = vpop.permute.xlu1 %2427 }
0x3736   :  { %2430 = vst.msk [vmem:[#allocation2 + $0x6] sm:$0x3] %vm257_vm2, %v2428_v48  ;;  %5385 = vmatmul.mubr.msk.f32.vlgmr.msra.gmra.mrb[22].mxu1 %vm154_vm3, %v2428_v48 }
0x3737   :  { %5783 = vmatpush3.bf16.msra.mxu1 %v6588_v26  ;;  %5406 = vmatprep.mubr.msk.f32.mxu1 %vm6295_vm0, %v6296_v1 }
0x3738   :  { %5784 = vmatprep.subr.bf16.mxu1 %v6294_v0 }
0x373b   :  { %5786 = vmatpush3.bf16.msra.mxu1 %v6591_v30 }
0x373d   :  { %v2843_v22 = vld [vmem:[#allocation2] sm:$0xff] }
0x3809   :  { %v2500_v50 = vpop.f32.mrb[22].mxu1 }
0x380a   :  { %v2504_v52 = vadd.f32 %v2500_v50, %v2431_v49  ;;  %v5386_v53 = vpop.f32.mrb[23].mxu1 }
0x380c   :  { %6082 = vtanh.f32 %v2504_v52  ;;  %v4845_v54 = vmul.f32 -1.442695, %v2504_v52 }
0x380e   :  { %6084 = vpow2.f32 %v4845_v54 }
0x3816   :  { %v6083_v8 = vpop.eup %6082 }
0x3817   :  { %2514 = vrot.lane.b32.xlu0 %v6083_v8, %s6297_s10 }
0x3818   :  { %v6085_v55 = vpop.eup %6084 }
0x3819   :  { %v2508_v56 = vadd.f32 1.0, %v6085_v55 }
0x381b   :  { %6086 = vrcp.f32 %v2508_v56 }
0x3825   :  { %v6087_v57 = vpop.eup %6086 }
0x3826   :  { %v2512_v59 = vmul.f32 %v6087_v57, %v2419_v43 }
0x3889   :  { %v2515_v12 = vpop.permute.xlu0 %2514 }
0x388a   :  { %v2517_v58 = vmul.f32 %v6087_v57, %v2515_v12  ;;  %v2847_v12 = vld [vmem:[#allocation4 + $0x48] sm:$0xff] }
0x388c   :  { %2519 = vrot.lane.b32.xlu1 %v2517_v58, %s6297_s10 }
0x38fe   :  { %v2520_v60 = vpop.permute.xlu1 %2519 }
0x38ff   :  { %v2522_v61 = vadd.f32 %v2520_v60, %v2512_v59  ;;  %v2848_v59 = vld [vmem:[#allocation4 + $0x50] sm:$0xff]  ;;  %v2849_v60 = vld [vmem:[#allocation4 + $0x58] sm:$0xff] }
0x3901   :  { %6088 = vtanh.f32 %v2522_v61 }
0x390b   :  { %v6089_v62 = vpop.eup %6088 }
0x390c   :  { %2525 = vrot.lane.b32.xlu0 %v6089_v62, %s6297_s10  ;;  %v2942_v62 = vld [vmem:[#allocation6 + $0x60] sm:$0xff] }
0x397e   :  { %v2526_v63 = vpop.permute.xlu0 %2525 }
0x397f   :  { %v2528_v2 = vmul.f32 %v6087_v57, %v2526_v63  ;;  %v2846_v57 = vld [vmem:[#allocation4 + $0x40] sm:$0xff]  ;;  %v2943_v63 = vld [vmem:[#allocation6 + $0x68] sm:$0xff] }
0x3980   :  { %v5793_v58 = vpack.c.bf16 %v2847_v12, %v2846_v57 }
0x3981   :  { %2530 = vrot.lane.b32.xlu1 %v2528_v2, %s6298_s11  ;;  %v2944_v2 = vld [vmem:[#allocation6 + $0x70] sm:$0xff] }
0x3982   :  { %5794 = vmatprep.subr.bf16.mxu1 %v5793_v58 }
0x39f3   :  { %v2531_v3 = vpop.permute.xlu1 %2530 }
0x39f4   :  { %2533 = vst.msk [vmem:[#allocation2 + $0x8] sm:$0x3] %vm257_vm2, %v2531_v3  ;;  %5396 = vmatmul.mubr.msk.f32.vlgmr.msra.gmra.mrb[24].mxu0 %vm154_vm3, %v2531_v3  ;;  %v6693_v3 = vpack.c.bf16 %v2943_v63, %v2942_v62 }
0x39f5   :  { %5789 = vmatpush3.bf16.msra.mxu0 %v6588_v26  ;;  %5417 = vmatprep.mubr.msk.f32.mxu0 %vm6295_vm0, %v6296_v1 }
0x39f6   :  { %5790 = vmatprep.subr.bf16.mxu0 %v6294_v0 }
0x39f9   :  { %5792 = vmatpush3.bf16.msra.mxu0 %v6591_v30 }
0x39fa   :  { %5801 = vmatprep.subr.bf16.mxu0 %v6294_v0 }
0x3ac7   :  { %v2603_v5 = vpop.f32.mrb[24].mxu0 }
0x3ac8   :  { %v2607_v6 = vadd.f32 %v2603_v5, %v2534_v4  ;;  %v5397_v7 = vpop.f32.mrb[25].mxu0  ;;  %v2945_v4 = vld [vmem:[#allocation6 + $0x78] sm:$0xff] }
0x3ac9   :  { %v6696_v7 = vpack.c.bf16 %v2945_v4, %v2944_v2 }
0x3aca   :  { %6090 = vtanh.f32 %v2607_v6  ;;  %v4847_v10 = vmul.f32 -1.442695, %v2607_v6 }
0x3acc   :  { %6092 = vpow2.f32 %v4847_v10 }
0x3ad4   :  { %v6091_v9 = vpop.eup %6090 }
0x3ad5   :  { %2617 = vrot.lane.b32.xlu0 %v6091_v9, %s6297_s10 }
0x3ad6   :  { %v6093_v26 = vpop.eup %6092 }
0x3ad7   :  { %v2611_v11 = vadd.f32 1.0, %v6093_v26 }
0x3ad9   :  { %6094 = vrcp.f32 %v2611_v11 }
0x3ae3   :  { %v6095_v13 = vpop.eup %6094 }
0x3ae4   :  { %v2615_v30 = vmul.f32 %v6095_v13, %v2522_v61  ;;  %v5797_v61 = vpack.c.bf16 %v2849_v60, %v2848_v59 }
0x3b47   :  { %v2618_v14 = vpop.permute.xlu0 %2617 }
0x3b48   :  { %v2620_v15 = vmul.f32 %v6095_v13, %v2618_v14 }
0x3b4a   :  { %2622 = vrot.lane.b32.xlu1 %v2620_v15, %s6297_s10 }
0x3bbc   :  { %v2623_v16 = vpop.permute.xlu1 %2622 }
0x3bbd   :  { %v2625_v17 = vadd.f32 %v2623_v16, %v2615_v30 }
0x3bbf   :  { %6096 = vtanh.f32 %v2625_v17 }
0x3bc9   :  { %v6097_v18 = vpop.eup %6096 }
0x3bca   :  { %2628 = vrot.lane.b32.xlu0 %v6097_v18, %s6297_s10 }
0x3c3c   :  { %v2629_v19 = vpop.permute.xlu0 %2628 }
0x3c3d   :  { %v2631_v20 = vmul.f32 %v6095_v13, %v2629_v19  ;;  %v4853_v13 = vld [vmem:[%s6927_s4 + $0x3] ss:$0 sm:$0xff] }
0x3c3f   :  { %2633 = vrot.lane.b32.xlu1 %v2631_v20, %s6298_s11 }
0x3cb1   :  { %v2634_v21 = vpop.permute.xlu1 %2633 }
0x3cb2   :  { %2636 = vst.msk [vmem:[#allocation2 + $0xa] sm:$0x3] %vm257_vm2, %v2634_v21  ;;  %5407 = vmatmul.mubr.msk.f32.vlgmr.msra.gmra.mrb[24].mxu1 %vm154_vm3, %v2634_v21 }
0x3cb3   :  { %5428 = vmatprep.mubr.msk.f32.mxu1 %vm154_vm3, %v2843_v22  ;;  %5796 = vmatpush3.bf16.msra.mxu1 %v5793_v58 }
0x3cb4   :  { %5798 = vmatprep.subr.bf16.mxu1 %v5797_v61 }
0x3cb7   :  { %5800 = vmatpush3.bf16.msra.mxu1 %v5797_v61 }
0x3cb8   :  { %5807 = vmatprep.subr.bf16.mxu1 %v6294_v0 }
0x3d85   :  { %v2706_v24 = vpop.f32.mrb[24].mxu1 }
0x3d86   :  { %v2710_v25 = vadd.f32 %v2706_v24, %v2637_v23  ;;  %v5408_v27 = vpop.f32.mrb[25].mxu1 }
0x3d88   :  { %6098 = vtanh.f32 %v2710_v25  ;;  %v4849_v29 = vmul.f32 -1.442695, %v2710_v25 }
0x3d8a   :  { %6100 = vpow2.f32 %v4849_v29 }
0x3d92   :  { %v6099_v28 = vpop.eup %6098 }
0x3d93   :  { %2720 = vrot.lane.b32.xlu0 %v6099_v28, %s6297_s10 }
0x3d94   :  { %v6101_v31 = vpop.eup %6100 }
0x3d95   :  { %v2714_v32 = vadd.f32 1.0, %v6101_v31 }
0x3d97   :  { %6102 = vrcp.f32 %v2714_v32 }
0x3da1   :  { %v6103_v47 = vpop.eup %6102 }
0x3da2   :  { %v2718_v35 = vmul.f32 %v6103_v47, %v2625_v17 }
0x3e05   :  { %v2721_v33 = vpop.permute.xlu0 %2720 }
0x3e06   :  { %v2723_v34 = vmul.f32 %v6103_v47, %v2721_v33 }
0x3e08   :  { %2725 = vrot.lane.b32.xlu1 %v2723_v34, %s6297_s10 }
0x3e7a   :  { %v2726_v36 = vpop.permute.xlu1 %2725 }
0x3e7b   :  { %v2728_v51 = vadd.f32 %v2726_v36, %v2718_v35 }
0x3e7d   :  { %6104 = vtanh.f32 %v2728_v51 }
0x3e87   :  { %v6105_v37 = vpop.eup %6104 }
0x3e88   :  { %2731 = vrot.lane.b32.xlu0 %v6105_v37, %s6297_s10 }
0x3efa   :  { %v2732_v38 = vpop.permute.xlu0 %2731 }
0x3efb   :  { %v2734_v39 = vmul.f32 %v6103_v47, %v2732_v38 }
0x3efd   :  { %2736 = vrot.lane.b32.xlu1 %v2734_v39, %s6298_s11 }
0x3f6f   :  { %v2737_v40 = vpop.permute.xlu1 %2736 }
0x3f70   :  { %2739 = vst.msk [vmem:[#allocation2 + $0xc] sm:$0x3] %vm257_vm2, %v2737_v40  ;;  %5418 = vmatmul.mubr.msk.f32.vlgmr.msra.gmra.mrb[26].mxu0 %vm154_vm3, %v2737_v40 }
0x3f71   :  { %5439 = vmatprep.mubr.msk.f32.mxu0 %vm6295_vm0, %v6296_v1  ;;  %5803 = vmatpush3.bf16.msra.mxu0 %v6693_v3 }
0x3f72   :  { %5804 = vmatprep.subr.bf16.mxu0 %v6294_v0 }
0x3f75   :  { %5806 = vmatpush3.bf16.msra.mxu0 %v6696_v7 }
0x3f76   :  { %5813 = vmatprep.subr.bf16.mxu0 %v6294_v0 }
0x3f78   :  { %5440 = vmatmul.mubr.f32.vlgmr.msra.gmra.mrb[28].mxu0 %v6296_v1 }
0x3f79   :  { %5815 = vmatpush3.bf16.msra.mxu0 %v6693_v3  ;;  %5461 = vmatprep.mubr.msk.f32.mxu0 %vm6295_vm0, %v6296_v1 }
0x3f7a   :  { %5816 = vmatprep.subr.bf16.mxu0 %v6294_v0 }
0x3f7d   :  { %5818 = vmatpush3.bf16.msra.mxu0 %v6696_v7 }
0x3f7e   :  { %5825 = vmatprep.subr.bf16.mxu0 %v6294_v0 }
0x4043   :  { %v2809_v42 = vpop.f32.mrb[26].mxu0 }
0x4044   :  { %v2813_v43 = vadd.f32 %v2809_v42, %v2740_v41  ;;  %v5419_v44 = vpop.f32.mrb[27].mxu0 }
0x4046   :  { %6106 = vtanh.f32 %v2813_v43  ;;  %v4851_v46 = vmul.f32 -1.442695, %v2813_v43 }
0x4048   :  { %6108 = vpow2.f32 %v4851_v46 }
0x404b   :  { %v3013_v26 = vpop.f32.mrb[28].mxu0 }
0x404c   :  { %v5441_v11 = vpop.f32.mrb[29].mxu0 }
0x4050   :  { %v6107_v45 = vpop.eup %6106 }
0x4051   :  { %2823 = vrot.lane.b32.xlu0 %v6107_v45, %s6297_s10 }
0x4052   :  { %v6109_v48 = vpop.eup %6108 }
0x4053   :  { %v2817_v49 = vadd.f32 1.0, %v6109_v48 }
0x4055   :  { %6110 = vrcp.f32 %v2817_v49 }
0x405f   :  { %v6111_v50 = vpop.eup %6110 }
0x4060   :  { %v2821_v8 = vmul.f32 %v6111_v50, %v2728_v51 }
0x40c3   :  { %v2824_v52 = vpop.permute.xlu0 %2823 }
0x40c4   :  { %v2826_v53 = vmul.f32 %v6111_v50, %v2824_v52 }
0x40c6   :  { %2828 = vrot.lane.b32.xlu1 %v2826_v53, %s6297_s10 }
0x4138   :  { %v2829_v54 = vpop.permute.xlu1 %2828 }
0x4139   :  { %v2831_v55 = vadd.f32 %v2829_v54, %v2821_v8 }
0x413b   :  { %6112 = vtanh.f32 %v2831_v55 }
0x4145   :  { %v6113_v56 = vpop.eup %6112 }
0x4146   :  { %2834 = vrot.lane.b32.xlu0 %v6113_v56, %s6297_s10 }
0x41b8   :  { %v2835_v5 = vpop.permute.xlu0 %2834 }
0x41b9   :  { %v2837_v6 = vmul.f32 %v6111_v50, %v2835_v5 }
0x41bb   :  { %2839 = vrot.lane.b32.xlu1 %v2837_v6, %s6298_s11 }
0x422d   :  { %v2840_v9 = vpop.permute.xlu1 %2839 }
0x422e   :  { %2842 = vst.msk [vmem:[#allocation2 + $0xe] sm:$0x3] %vm257_vm2, %v2840_v9 }
0x4235   :  { %v2844_v10 = vld [vmem:[#allocation2 + $0x8] sm:$0xff] }
0x4236   :  { %5429 = vmatmul.mubr.msk.f32.vlgmr.msra.gmra.mrb[26].mxu1 %vm154_vm3, %v2844_v10 }
0x4237   :  { %5809 = vmatpush3.bf16.msra.mxu1 %v6693_v3  ;;  %5450 = vmatprep.mubr.msk.f32.mxu1 %vm6295_vm0, %v6296_v1 }
0x4238   :  { %5810 = vmatprep.subr.bf16.mxu1 %v6294_v0 }
0x423b   :  { %5812 = vmatpush3.bf16.msra.mxu1 %v6696_v7 }
0x423c   :  { %5819 = vmatprep.subr.bf16.mxu1 %v6294_v0 }
0x4309   :  { %v5430_v14 = vpop.f32.mrb[26].mxu1 }
0x430a   :  { %v2936_v15 = vadd.f32 %v5430_v14, %v4853_v13  ;;  %v2930_v30 = vpop.f32.mrb[27].mxu1 }
0x430b   :  { %v2931_v16 = vadd.f32 %v4853_v13, %v2930_v30 }
0x430c   :  { %2940 = vst [vmem:[#allocation3 + $0x8] sm:$0xff] %v2936_v15 }
0x430d   :  { %2939 = vst [vmem:[#allocation3] sm:$0xff] %v2931_v16 }
0x4314   :  { %v2946_v17 = vld [vmem:[#allocation3] sm:$0x3]  ;;  %v3047_v34 = vld [vmem:[#allocation3 + $0x2] sm:$0x3]  ;;  %v3150_v53 = vld [vmem:[#allocation3 + $0x4] sm:$0x3] }
0x4315   :  { %v3017_v18 = vadd.f32 %v3013_v26, %v2946_v17  ;;  %v3253_v10 = vld [vmem:[#allocation3 + $0x6] sm:$0x3] }
0x4317   :  { %6114 = vtanh.f32 %v3017_v18  ;;  %v4856_v20 = vmul.f32 -1.442695, %v3017_v18 }
0x4319   :  { %6116 = vpow2.f32 %v4856_v20 }
0x4321   :  { %v6115_v19 = vpop.eup %6114 }
0x4322   :  { %3027 = vrot.lane.b32.xlu0 %v6115_v19, %s6297_s10 }
0x4323   :  { %v6117_v21 = vpop.eup %6116 }
0x4324   :  { %v3021_v22 = vadd.f32 1.0, %v6117_v21 }
0x4326   :  { %6118 = vrcp.f32 %v3021_v22 }
0x4330   :  { %v6119_v23 = vpop.eup %6118 }
0x4331   :  { %v3025_v27 = vmul.f32 0.0, %v6119_v23 }
0x4394   :  { %v3028_v24 = vpop.permute.xlu0 %3027 }
0x4395   :  { %v3030_v25 = vmul.f32 %v6119_v23, %v3028_v24 }
0x4397   :  { %3032 = vrot.lane.b32.xlu1 %v3030_v25, %s6297_s10 }
0x4409   :  { %v3033_v28 = vpop.permute.xlu1 %3032 }
0x440a   :  { %v3035_v29 = vadd.f32 %v3033_v28, %v3025_v27  ;;  %v3356_v28 = vld [vmem:[#allocation3 + $0x8] sm:$0x3] }
0x440c   :  { %6120 = vtanh.f32 %v3035_v29 }
0x4416   :  { %v6121_v31 = vpop.eup %6120 }
0x4417   :  { %3038 = vrot.lane.b32.xlu0 %v6121_v31, %s6297_s10 }
0x4489   :  { %v3039_v32 = vpop.permute.xlu0 %3038 }
0x448a   :  { %v3041_v47 = vmul.f32 %v6119_v23, %v3039_v32 }
0x448c   :  { %3043 = vrot.lane.b32.xlu1 %v3041_v47, %s6298_s11 }
0x44fe   :  { %v3044_v33 = vpop.permute.xlu1 %3043 }
0x44ff   :  { %3046 = vst.msk [vmem:[#allocation2] sm:$0x3] %vm257_vm2, %v3044_v33  ;;  %5451 = vmatmul.mubr.msk.f32.vlgmr.msra.gmra.mrb[28].mxu1 %vm154_vm3, %v3044_v33 }
0x4500   :  { %5821 = vmatpush3.bf16.msra.mxu1 %v6693_v3  ;;  %5472 = vmatprep.mubr.msk.f32.mxu1 %vm6295_vm0, %v6296_v1 }
0x4501   :  { %5822 = vmatprep.subr.bf16.mxu1 %v6294_v0 }
0x4504   :  { %5824 = vmatpush3.bf16.msra.mxu1 %v6696_v7 }
0x4505   :  { %5831 = vmatprep.subr.bf16.mxu1 %v6294_v0 }
0x45d2   :  { %v3116_v35 = vpop.f32.mrb[28].mxu1 }
0x45d3   :  { %v3120_v36 = vadd.f32 %v3116_v35, %v3047_v34  ;;  %v5452_v51 = vpop.f32.mrb[29].mxu1 }
0x45d5   :  { %6122 = vtanh.f32 %v3120_v36  ;;  %v4858_v38 = vmul.f32 -1.442695, %v3120_v36 }
0x45d7   :  { %6124 = vpow2.f32 %v4858_v38 }
0x45df   :  { %v6123_v37 = vpop.eup %6122 }
0x45e0   :  { %3130 = vrot.lane.b32.xlu0 %v6123_v37, %s6297_s10 }
0x45e1   :  { %v6125_v39 = vpop.eup %6124 }
0x45e2   :  { %v3124_v40 = vadd.f32 1.0, %v6125_v39 }
0x45e4   :  { %6126 = vrcp.f32 %v3124_v40 }
0x45ee   :  { %v6127_v41 = vpop.eup %6126 }
0x45ef   :  { %v3128_v44 = vmul.f32 %v6127_v41, %v3035_v29 }
0x4652   :  { %v3131_v42 = vpop.permute.xlu0 %3130 }
0x4653   :  { %v3133_v43 = vmul.f32 %v6127_v41, %v3131_v42 }
0x4655   :  { %3135 = vrot.lane.b32.xlu1 %v3133_v43, %s6297_s10 }
0x46c7   :  { %v3136_v45 = vpop.permute.xlu1 %3135 }
0x46c8   :  { %v3138_v46 = vadd.f32 %v3136_v45, %v3128_v44  ;;  %v3459_v45 = vld [vmem:[#allocation3 + $0xa] sm:$0x3] }
0x46ca   :  { %6128 = vtanh.f32 %v3138_v46 }
0x46d4   :  { %v6129_v48 = vpop.eup %6128 }
0x46d5   :  { %3141 = vrot.lane.b32.xlu0 %v6129_v48, %s6297_s10 }
0x4747   :  { %v3142_v49 = vpop.permute.xlu0 %3141 }
0x4748   :  { %v3144_v50 = vmul.f32 %v6127_v41, %v3142_v49 }
0x474a   :  { %3146 = vrot.lane.b32.xlu1 %v3144_v50, %s6298_s11 }
0x47bc   :  { %v3147_v52 = vpop.permute.xlu1 %3146 }
0x47bd   :  { %3149 = vst.msk [vmem:[#allocation2 + $0x2] sm:$0x3] %vm257_vm2, %v3147_v52  ;;  %5462 = vmatmul.mubr.msk.f32.vlgmr.msra.gmra.mrb[30].mxu0 %vm154_vm3, %v3147_v52 }
0x47be   :  { %5827 = vmatpush3.bf16.msra.mxu0 %v6693_v3  ;;  %5483 = vmatprep.mubr.msk.f32.mxu0 %vm6295_vm0, %v6296_v1 }
0x47bf   :  { %5828 = vmatprep.subr.bf16.mxu0 %v6294_v0 }
0x47c2   :  { %5830 = vmatpush3.bf16.msra.mxu0 %v6696_v7 }
0x47c3   :  { %5837 = vmatprep.subr.bf16.mxu0 %v6294_v0 }
0x4890   :  { %v3219_v8 = vpop.f32.mrb[30].mxu0 }
0x4891   :  { %v3223_v54 = vadd.f32 %v3219_v8, %v3150_v53  ;;  %v5463_v55 = vpop.f32.mrb[31].mxu0 }
0x4893   :  { %6130 = vtanh.f32 %v3223_v54  ;;  %v4860_v57 = vmul.f32 -1.442695, %v3223_v54 }
0x4895   :  { %6132 = vpow2.f32 %v4860_v57 }
0x489d   :  { %v6131_v56 = vpop.eup %6130 }
0x489e   :  { %3233 = vrot.lane.b32.xlu0 %v6131_v56, %s6297_s10 }
0x489f   :  { %v6133_v12 = vpop.eup %6132 }
0x48a0   :  { %v3227_v58 = vadd.f32 1.0, %v6133_v12 }
0x48a2   :  { %6134 = vrcp.f32 %v3227_v58 }
0x48ac   :  { %v6135_v59 = vpop.eup %6134 }
0x48ad   :  { %v3231_v62 = vmul.f32 %v6135_v59, %v3138_v46 }
0x4910   :  { %v3234_v60 = vpop.permute.xlu0 %3233 }
0x4911   :  { %v3236_v61 = vmul.f32 %v6135_v59, %v3234_v60 }
0x4913   :  { %3238 = vrot.lane.b32.xlu1 %v3236_v61, %s6297_s10 }
0x4985   :  { %v3239_v63 = vpop.permute.xlu1 %3238 }
0x4986   :  { %v3241_v2 = vadd.f32 %v3239_v63, %v3231_v62  ;;  %v3562_v62 = vld [vmem:[#allocation3 + $0xc] sm:$0x3] }
0x4988   :  { %6136 = vtanh.f32 %v3241_v2 }
0x4992   :  { %v6137_v4 = vpop.eup %6136 }
0x4993   :  { %3244 = vrot.lane.b32.xlu0 %v6137_v4, %s6297_s10 }
0x4a05   :  { %v3245_v5 = vpop.permute.xlu0 %3244 }
0x4a06   :  { %v3247_v6 = vmul.f32 %v6135_v59, %v3245_v5 }
0x4a08   :  { %3249 = vrot.lane.b32.xlu1 %v3247_v6, %s6298_s11 }
0x4a7a   :  { %v3250_v9 = vpop.permute.xlu1 %3249 }
0x4a7b   :  { %3252 = vst.msk [vmem:[#allocation2 + $0x4] sm:$0x3] %vm257_vm2, %v3250_v9  ;;  %5473 = vmatmul.mubr.msk.f32.vlgmr.msra.gmra.mrb[30].mxu1 %vm154_vm3, %v3250_v9 }
0x4a7c   :  { %5833 = vmatpush3.bf16.msra.mxu1 %v6693_v3  ;;  %5494 = vmatprep.mubr.msk.f32.mxu1 %vm6295_vm0, %v6296_v1 }
0x4a7d   :  { %5834 = vmatprep.subr.bf16.mxu1 %v6294_v0 }
0x4a80   :  { %5836 = vmatpush3.bf16.msra.mxu1 %v6696_v7 }
0x4a81   :  { %5843 = vmatprep.subr.bf16.mxu1 %v6294_v0 }
0x4b4e   :  { %v3322_v26 = vpop.f32.mrb[30].mxu1 }
0x4b4f   :  { %v3326_v11 = vadd.f32 %v3322_v26, %v3253_v10  ;;  %v5474_v13 = vpop.f32.mrb[31].mxu1 }
0x4b51   :  { %6138 = vtanh.f32 %v3326_v11  ;;  %v4862_v15 = vmul.f32 -1.442695, %v3326_v11 }
0x4b53   :  { %6140 = vpow2.f32 %v4862_v15 }
0x4b5b   :  { %v6139_v14 = vpop.eup %6138 }
0x4b5c   :  { %3336 = vrot.lane.b32.xlu0 %v6139_v14, %s6297_s10 }
0x4b5d   :  { %v6141_v30 = vpop.eup %6140 }
0x4b5e   :  { %v3330_v16 = vadd.f32 1.0, %v6141_v30 }
0x4b60   :  { %6142 = vrcp.f32 %v3330_v16 }
0x4b6a   :  { %v6143_v17 = vpop.eup %6142 }
0x4b6b   :  { %v3334_v20 = vmul.f32 %v6143_v17, %v3241_v2 }
0x4bce   :  { %v3337_v18 = vpop.permute.xlu0 %3336 }
0x4bcf   :  { %v3339_v19 = vmul.f32 %v6143_v17, %v3337_v18 }
0x4bd1   :  { %3341 = vrot.lane.b32.xlu1 %v3339_v19, %s6297_s10 }
0x4c43   :  { %v3342_v21 = vpop.permute.xlu1 %3341 }
0x4c44   :  { %v3344_v22 = vadd.f32 %v3342_v21, %v3334_v20  ;;  %v3665_v20 = vld [vmem:[#allocation3 + $0xe] sm:$0x3] }
0x4c46   :  { %6144 = vtanh.f32 %v3344_v22 }
0x4c50   :  { %v6145_v23 = vpop.eup %6144 }
0x4c51   :  { %3347 = vrot.lane.b32.xlu0 %v6145_v23, %s6297_s10 }
0x4cc3   :  { %v3348_v24 = vpop.permute.xlu0 %3347 }
0x4cc4   :  { %v3350_v25 = vmul.f32 %v6143_v17, %v3348_v24 }
0x4cc6   :  { %3352 = vrot.lane.b32.xlu1 %v3350_v25, %s6298_s11 }
0x4d38   :  { %v3353_v27 = vpop.permute.xlu1 %3352 }
0x4d39   :  { %3355 = vst.msk [vmem:[#allocation2 + $0x6] sm:$0x3] %vm257_vm2, %v3353_v27  ;;  %5484 = vmatmul.mubr.msk.f32.vlgmr.msra.gmra.mrb[32].mxu0 %vm154_vm3, %v3353_v27 }
0x4d3a   :  { %5839 = vmatpush3.bf16.msra.mxu0 %v6693_v3  ;;  %5505 = vmatprep.mubr.msk.f32.mxu0 %vm6295_vm0, %v6296_v1 }
0x4d3b   :  { %5840 = vmatprep.subr.bf16.mxu0 %v6294_v0 }
0x4d3e   :  { %5842 = vmatpush3.bf16.msra.mxu0 %v6696_v7 }
0x4d40   :  { %v3768_v61 = vld [vmem:[#allocation2] sm:$0xff] }
0x4e0c   :  { %v3425_v29 = vpop.f32.mrb[32].mxu0 }
0x4e0d   :  { %v3429_v31 = vadd.f32 %v3425_v29, %v3356_v28  ;;  %v5485_v32 = vpop.f32.mrb[33].mxu0 }
0x4e0f   :  { %6146 = vtanh.f32 %v3429_v31  ;;  %v4864_v33 = vmul.f32 -1.442695, %v3429_v31 }
0x4e11   :  { %6148 = vpow2.f32 %v4864_v33 }
0x4e19   :  { %v6147_v47 = vpop.eup %6146 }
0x4e1a   :  { %3439 = vrot.lane.b32.xlu0 %v6147_v47, %s6297_s10 }
0x4e1b   :  { %v6149_v34 = vpop.eup %6148 }
0x4e1c   :  { %v3433_v35 = vadd.f32 1.0, %v6149_v34 }
0x4e1e   :  { %6150 = vrcp.f32 %v3433_v35 }
0x4e28   :  { %v6151_v36 = vpop.eup %6150 }
0x4e29   :  { %v3437_v38 = vmul.f32 %v6151_v36, %v3344_v22 }
0x4e8c   :  { %v3440_v51 = vpop.permute.xlu0 %3439 }
0x4e8d   :  { %v3442_v37 = vmul.f32 %v6151_v36, %v3440_v51  ;;  %v3772_v51 = vld [vmem:[#allocation4 + $0x68] sm:$0xff] }
0x4e8f   :  { %3444 = vrot.lane.b32.xlu1 %v3442_v37, %s6297_s10 }
0x4f01   :  { %v3445_v39 = vpop.permute.xlu1 %3444 }
0x4f02   :  { %v3447_v40 = vadd.f32 %v3445_v39, %v3437_v38  ;;  %v3773_v38 = vld [vmem:[#allocation4 + $0x70] sm:$0xff]  ;;  %v3774_v39 = vld [vmem:[#allocation4 + $0x78] sm:$0xff] }
0x4f04   :  { %6152 = vtanh.f32 %v3447_v40 }
0x4f0e   :  { %v6153_v41 = vpop.eup %6152 }
0x4f0f   :  { %3450 = vrot.lane.b32.xlu0 %v6153_v41, %s6297_s10  ;;  %v3867_v41 = vld [vmem:[#allocation6 + $0x80] sm:$0xff] }
0x4f81   :  { %v3451_v42 = vpop.permute.xlu0 %3450 }
0x4f82   :  { %v3453_v43 = vmul.f32 %v6151_v36, %v3451_v42  ;;  %v3771_v36 = vld [vmem:[#allocation4 + $0x60] sm:$0xff]  ;;  %v3868_v42 = vld [vmem:[#allocation6 + $0x88] sm:$0xff] }
0x4f83   :  { %v5849_v37 = vpack.c.bf16 %v3772_v51, %v3771_v36 }
0x4f84   :  { %3455 = vrot.lane.b32.xlu1 %v3453_v43, %s6298_s11  ;;  %v3869_v43 = vld [vmem:[#allocation6 + $0x90] sm:$0xff] }
0x4f85   :  { %5850 = vmatprep.subr.bf16.mxu0 %v5849_v37 }
0x4ff6   :  { %v3456_v44 = vpop.permute.xlu1 %3455 }
0x4ff7   :  { %3458 = vst.msk [vmem:[#allocation2 + $0x8] sm:$0x3] %vm257_vm2, %v3456_v44  ;;  %5495 = vmatmul.mubr.msk.f32.vlgmr.msra.gmra.mrb[32].mxu1 %vm154_vm3, %v3456_v44  ;;  %v6798_v44 = vpack.c.bf16 %v3868_v42, %v3867_v41 }
0x4ff8   :  { %5845 = vmatpush3.bf16.msra.mxu1 %v6693_v3  ;;  %5516 = vmatprep.mubr.msk.f32.mxu1 %vm6295_vm0, %v6296_v1 }
0x4ff9   :  { %5846 = vmatprep.subr.bf16.mxu1 %v6294_v0 }
0x4ffc   :  { %5848 = vmatpush3.bf16.msra.mxu1 %v6696_v7 }
0x4ffd   :  { %5857 = vmatprep.subr.bf16.mxu1 %v6294_v0 }
0x50ca   :  { %v3528_v46 = vpop.f32.mrb[32].mxu1 }
0x50cb   :  { %v3532_v48 = vadd.f32 %v3528_v46, %v3459_v45  ;;  %v5496_v49 = vpop.f32.mrb[33].mxu1  ;;  %v3870_v45 = vld [vmem:[#allocation6 + $0x98] sm:$0xff] }
0x50cc   :  { %v6801_v49 = vpack.c.bf16 %v3870_v45, %v3869_v43 }
0x50cd   :  { %6154 = vtanh.f32 %v3532_v48  ;;  %v4866_v52 = vmul.f32 -1.442695, %v3532_v48 }
0x50cf   :  { %6156 = vpow2.f32 %v4866_v52 }
0x50d7   :  { %v6155_v50 = vpop.eup %6154 }
0x50d8   :  { %3542 = vrot.lane.b32.xlu0 %v6155_v50, %s6297_s10 }
0x50d9   :  { %v6157_v3 = vpop.eup %6156 }
0x50da   :  { %v3536_v53 = vadd.f32 1.0, %v6157_v3 }
0x50dc   :  { %6158 = vrcp.f32 %v3536_v53 }
0x50e6   :  { %v6159_v8 = vpop.eup %6158 }
0x50e7   :  { %v3540_v7 = vmul.f32 %v6159_v8, %v3447_v40  ;;  %v5853_v40 = vpack.c.bf16 %v3774_v39, %v3773_v38 }
0x514a   :  { %v3543_v54 = vpop.permute.xlu0 %3542 }
0x514b   :  { %v3545_v55 = vmul.f32 %v6159_v8, %v3543_v54 }
0x514d   :  { %3547 = vrot.lane.b32.xlu1 %v3545_v55, %s6297_s10 }
0x51bf   :  { %v3548_v56 = vpop.permute.xlu1 %3547 }
0x51c0   :  { %v3550_v57 = vadd.f32 %v3548_v56, %v3540_v7 }
0x51c2   :  { %6160 = vtanh.f32 %v3550_v57 }
0x51cc   :  { %v6161_v12 = vpop.eup %6160 }
0x51cd   :  { %3553 = vrot.lane.b32.xlu0 %v6161_v12, %s6297_s10 }
0x523f   :  { %v3554_v58 = vpop.permute.xlu0 %3553 }
0x5240   :  { %v3556_v59 = vmul.f32 %v6159_v8, %v3554_v58  ;;  %v4872_v8 = vld [vmem:[%s6927_s4 + $0x4] ss:$0 sm:$0xff] }
0x5242   :  { %3558 = vrot.lane.b32.xlu1 %v3556_v59, %s6298_s11 }
0x52b4   :  { %v3559_v60 = vpop.permute.xlu1 %3558 }
0x52b5   :  { %3561 = vst.msk [vmem:[#allocation2 + $0xa] sm:$0x3] %vm257_vm2, %v3559_v60  ;;  %5506 = vmatmul.mubr.msk.f32.vlgmr.msra.gmra.mrb[34].mxu0 %vm154_vm3, %v3559_v60 }
0x52b6   :  { %5527 = vmatprep.mubr.msk.f32.mxu0 %vm154_vm3, %v3768_v61  ;;  %5852 = vmatpush3.bf16.msra.mxu0 %v5849_v37 }
0x52b7   :  { %5854 = vmatprep.subr.bf16.mxu0 %v5853_v40 }
0x52ba   :  { %5856 = vmatpush3.bf16.msra.mxu0 %v5853_v40 }
0x52bb   :  { %5863 = vmatprep.subr.bf16.mxu0 %v6294_v0 }
0x5388   :  { %v3631_v63 = vpop.f32.mrb[34].mxu0 }
0x5389   :  { %v3635_v2 = vadd.f32 %v3631_v63, %v3562_v62  ;;  %v5507_v4 = vpop.f32.mrb[35].mxu0 }
0x538b   :  { %6162 = vtanh.f32 %v3635_v2  ;;  %v4868_v6 = vmul.f32 -1.442695, %v3635_v2 }
0x538d   :  { %6164 = vpow2.f32 %v4868_v6 }
0x5395   :  { %v6163_v5 = vpop.eup %6162 }
0x5396   :  { %3645 = vrot.lane.b32.xlu0 %v6163_v5, %s6297_s10 }
0x5397   :  { %v6165_v9 = vpop.eup %6164 }
0x5398   :  { %v3639_v10 = vadd.f32 1.0, %v6165_v9 }
0x539a   :  { %6166 = vrcp.f32 %v3639_v10 }
0x53a4   :  { %v6167_v26 = vpop.eup %6166 }
0x53a5   :  { %v3643_v14 = vmul.f32 %v6167_v26, %v3550_v57 }
0x5408   :  { %v3646_v11 = vpop.permute.xlu0 %3645 }
0x5409   :  { %v3648_v13 = vmul.f32 %v6167_v26, %v3646_v11 }
0x540b   :  { %3650 = vrot.lane.b32.xlu1 %v3648_v13, %s6297_s10 }
0x547d   :  { %v3651_v15 = vpop.permute.xlu1 %3650 }
0x547e   :  { %v3653_v30 = vadd.f32 %v3651_v15, %v3643_v14 }
0x5480   :  { %6168 = vtanh.f32 %v3653_v30 }
0x548a   :  { %v6169_v16 = vpop.eup %6168 }
0x548b   :  { %3656 = vrot.lane.b32.xlu0 %v6169_v16, %s6297_s10 }
0x54fd   :  { %v3657_v17 = vpop.permute.xlu0 %3656 }
0x54fe   :  { %v3659_v18 = vmul.f32 %v6167_v26, %v3657_v17 }
0x5500   :  { %3661 = vrot.lane.b32.xlu1 %v3659_v18, %s6298_s11 }
0x5572   :  { %v3662_v19 = vpop.permute.xlu1 %3661 }
0x5573   :  { %3664 = vst.msk [vmem:[#allocation2 + $0xc] sm:$0x3] %vm257_vm2, %v3662_v19  ;;  %5517 = vmatmul.mubr.msk.f32.vlgmr.msra.gmra.mrb[34].mxu1 %vm154_vm3, %v3662_v19 }
0x5574   :  { %5538 = vmatprep.mubr.msk.f32.mxu1 %vm6295_vm0, %v6296_v1  ;;  %5859 = vmatpush3.bf16.msra.mxu1 %v6798_v44 }
0x5575   :  { %5860 = vmatprep.subr.bf16.mxu1 %v6294_v0 }
0x5578   :  { %5862 = vmatpush3.bf16.msra.mxu1 %v6801_v49 }
0x5579   :  { %5869 = vmatprep.subr.bf16.mxu1 %v6294_v0 }
0x557b   :  { %5539 = vmatmul.mubr.f32.vlgmr.msra.gmra.mrb[36].mxu1 %v6296_v1 }
0x557c   :  { %5871 = vmatpush3.bf16.msra.mxu1 %v6798_v44  ;;  %5560 = vmatprep.mubr.msk.f32.mxu1 %vm6295_vm0, %v6296_v1 }
0x557d   :  { %5872 = vmatprep.subr.bf16.mxu1 %v6294_v0 }
0x5580   :  { %5874 = vmatpush3.bf16.msra.mxu1 %v6801_v49 }
0x5581   :  { %5881 = vmatprep.subr.bf16.mxu1 %v6294_v0 }
0x5646   :  { %v3734_v21 = vpop.f32.mrb[34].mxu1 }
0x5647   :  { %v3738_v22 = vadd.f32 %v3734_v21, %v3665_v20  ;;  %v5518_v23 = vpop.f32.mrb[35].mxu1 }
0x5649   :  { %6170 = vtanh.f32 %v3738_v22  ;;  %v4870_v25 = vmul.f32 -1.442695, %v3738_v22 }
0x564b   :  { %6172 = vpow2.f32 %v4870_v25 }
0x564e   :  { %v3938_v3 = vpop.f32.mrb[36].mxu1 }
0x564f   :  { %v5540_v53 = vpop.f32.mrb[37].mxu1 }
0x5653   :  { %v6171_v24 = vpop.eup %6170 }
0x5654   :  { %3748 = vrot.lane.b32.xlu0 %v6171_v24, %s6297_s10 }
0x5655   :  { %v6173_v27 = vpop.eup %6172 }
0x5656   :  { %v3742_v28 = vadd.f32 1.0, %v6173_v27 }
0x5658   :  { %6174 = vrcp.f32 %v3742_v28 }
0x5662   :  { %v6175_v29 = vpop.eup %6174 }
0x5663   :  { %v3746_v47 = vmul.f32 %v6175_v29, %v3653_v30 }
0x56c6   :  { %v3749_v31 = vpop.permute.xlu0 %3748 }
0x56c7   :  { %v3751_v32 = vmul.f32 %v6175_v29, %v3749_v31 }
0x56c9   :  { %3753 = vrot.lane.b32.xlu1 %v3751_v32, %s6297_s10 }
0x573b   :  { %v3754_v33 = vpop.permute.xlu1 %3753 }
0x573c   :  { %v3756_v34 = vadd.f32 %v3754_v33, %v3746_v47 }
0x573e   :  { %6176 = vtanh.f32 %v3756_v34 }
0x5748   :  { %v6177_v35 = vpop.eup %6176 }
0x5749   :  { %3759 = vrot.lane.b32.xlu0 %v6177_v35, %s6297_s10 }
0x57bb   :  { %v3760_v46 = vpop.permute.xlu0 %3759 }
0x57bc   :  { %v3762_v48 = vmul.f32 %v6175_v29, %v3760_v46 }
0x57be   :  { %3764 = vrot.lane.b32.xlu1 %v3762_v48, %s6298_s11 }
0x5830   :  { %v3765_v50 = vpop.permute.xlu1 %3764 }
0x5831   :  { %3767 = vst.msk [vmem:[#allocation2 + $0xe] sm:$0x3] %vm257_vm2, %v3765_v50 }
0x5838   :  { %v3769_v52 = vld [vmem:[#allocation2 + $0x8] sm:$0xff] }
0x5839   :  { %5528 = vmatmul.mubr.msk.f32.vlgmr.msra.gmra.mrb[36].mxu0 %vm154_vm3, %v3769_v52 }
0x583a   :  { %5865 = vmatpush3.bf16.msra.mxu0 %v6798_v44  ;;  %5549 = vmatprep.mubr.msk.f32.mxu0 %vm6295_vm0, %v6296_v1 }
0x583b   :  { %5866 = vmatprep.subr.bf16.mxu0 %v6294_v0 }
0x583e   :  { %5868 = vmatpush3.bf16.msra.mxu0 %v6801_v49 }
0x583f   :  { %5875 = vmatprep.subr.bf16.mxu0 %v6294_v0 }
0x590c   :  { %v5529_v54 = vpop.f32.mrb[36].mxu0 }
0x590d   :  { %v3861_v55 = vadd.f32 %v5529_v54, %v4872_v8  ;;  %v3855_v7 = vpop.f32.mrb[37].mxu0 }
0x590e   :  { %v3856_v56 = vadd.f32 %v4872_v8, %v3855_v7 }
0x590f   :  { %3865 = vst [vmem:[#allocation3 + $0x8] sm:$0xff] %v3861_v55 }
0x5910   :  { %3864 = vst [vmem:[#allocation3] sm:$0xff] %v3856_v56 }
0x5917   :  { %v3871_v57 = vld [vmem:[#allocation3] sm:$0x3]  ;;  %v3972_v13 = vld [vmem:[#allocation3 + $0x2] sm:$0x3]  ;;  %v4075_v32 = vld [vmem:[#allocation3 + $0x4] sm:$0x3] }
0x5918   :  { %v3942_v12 = vadd.f32 %v3938_v3, %v3871_v57  ;;  %v4178_v52 = vld [vmem:[#allocation3 + $0x6] sm:$0x3] }
0x591a   :  { %6178 = vtanh.f32 %v3942_v12  ;;  %v4875_v59 = vmul.f32 -1.442695, %v3942_v12 }
0x591c   :  { %6180 = vpow2.f32 %v4875_v59 }
0x5924   :  { %v6179_v58 = vpop.eup %6178 }
0x5925   :  { %3952 = vrot.lane.b32.xlu0 %v6179_v58, %s6297_s10 }
0x5926   :  { %v6181_v60 = vpop.eup %6180 }
0x5927   :  { %v3946_v61 = vadd.f32 1.0, %v6181_v60 }
0x5929   :  { %6182 = vrcp.f32 %v3946_v61 }
0x5933   :  { %v6183_v62 = vpop.eup %6182 }
0x5934   :  { %v3950_v4 = vmul.f32 0.0, %v6183_v62 }
0x5997   :  { %v3953_v63 = vpop.permute.xlu0 %3952 }
0x5998   :  { %v3955_v2 = vmul.f32 %v6183_v62, %v3953_v63 }
0x599a   :  { %3957 = vrot.lane.b32.xlu1 %v3955_v2, %s6297_s10 }
0x5a0c   :  { %v3958_v5 = vpop.permute.xlu1 %3957 }
0x5a0d   :  { %v3960_v6 = vadd.f32 %v3958_v5, %v3950_v4  ;;  %v4281_v5 = vld [vmem:[#allocation3 + $0x8] sm:$0x3] }
0x5a0f   :  { %6184 = vtanh.f32 %v3960_v6 }
0x5a19   :  { %v6185_v9 = vpop.eup %6184 }
0x5a1a   :  { %3963 = vrot.lane.b32.xlu0 %v6185_v9, %s6297_s10 }
0x5a8c   :  { %v3964_v10 = vpop.permute.xlu0 %3963 }
0x5a8d   :  { %v3966_v26 = vmul.f32 %v6183_v62, %v3964_v10 }
0x5a8f   :  { %3968 = vrot.lane.b32.xlu1 %v3966_v26, %s6298_s11 }
0x5b01   :  { %v3969_v11 = vpop.permute.xlu1 %3968 }
0x5b02   :  { %3971 = vst.msk [vmem:[#allocation2] sm:$0x3] %vm257_vm2, %v3969_v11  ;;  %5550 = vmatmul.mubr.msk.f32.vlgmr.msra.gmra.mrb[38].mxu0 %vm154_vm3, %v3969_v11 }
0x5b03   :  { %5877 = vmatpush3.bf16.msra.mxu0 %v6798_v44  ;;  %5571 = vmatprep.mubr.msk.f32.mxu0 %vm6295_vm0, %v6296_v1 }
0x5b04   :  { %5878 = vmatprep.subr.bf16.mxu0 %v6294_v0 }
0x5b07   :  { %5880 = vmatpush3.bf16.msra.mxu0 %v6801_v49 }
0x5b08   :  { %5887 = vmatprep.subr.bf16.mxu0 %v6294_v0 }
0x5bd5   :  { %v4041_v14 = vpop.f32.mrb[38].mxu0 }
0x5bd6   :  { %v4045_v15 = vadd.f32 %v4041_v14, %v3972_v13  ;;  %v5551_v30 = vpop.f32.mrb[39].mxu0 }
0x5bd8   :  { %6186 = vtanh.f32 %v4045_v15  ;;  %v4877_v17 = vmul.f32 -1.442695, %v4045_v15 }
0x5bda   :  { %6188 = vpow2.f32 %v4877_v17 }
0x5be2   :  { %v6187_v16 = vpop.eup %6186 }
0x5be3   :  { %4055 = vrot.lane.b32.xlu0 %v6187_v16, %s6297_s10 }
0x5be4   :  { %v6189_v18 = vpop.eup %6188 }
0x5be5   :  { %v4049_v19 = vadd.f32 1.0, %v6189_v18 }
0x5be7   :  { %6190 = vrcp.f32 %v4049_v19 }
0x5bf1   :  { %v6191_v20 = vpop.eup %6190 }
0x5bf2   :  { %v4053_v23 = vmul.f32 %v6191_v20, %v3960_v6 }
0x5c55   :  { %v4056_v21 = vpop.permute.xlu0 %4055 }
0x5c56   :  { %v4058_v22 = vmul.f32 %v6191_v20, %v4056_v21 }
0x5c58   :  { %4060 = vrot.lane.b32.xlu1 %v4058_v22, %s6297_s10 }
0x5cca   :  { %v4061_v24 = vpop.permute.xlu1 %4060 }
0x5ccb   :  { %v4063_v25 = vadd.f32 %v4061_v24, %v4053_v23  ;;  %v4384_v24 = vld [vmem:[#allocation3 + $0xa] sm:$0x3] }
0x5ccd   :  { %6192 = vtanh.f32 %v4063_v25 }
0x5cd7   :  { %v6193_v27 = vpop.eup %6192 }
0x5cd8   :  { %4066 = vrot.lane.b32.xlu0 %v6193_v27, %s6297_s10 }
0x5d4a   :  { %v4067_v28 = vpop.permute.xlu0 %4066 }
0x5d4b   :  { %v4069_v29 = vmul.f32 %v6191_v20, %v4067_v28 }
0x5d4d   :  { %4071 = vrot.lane.b32.xlu1 %v4069_v29, %s6298_s11 }
0x5dbf   :  { %v4072_v31 = vpop.permute.xlu1 %4071 }
0x5dc0   :  { %4074 = vst.msk [vmem:[#allocation2 + $0x2] sm:$0x3] %vm257_vm2, %v4072_v31  ;;  %5561 = vmatmul.mubr.msk.f32.vlgmr.msra.gmra.mrb[38].mxu1 %vm154_vm3, %v4072_v31 }
0x5dc1   :  { %5883 = vmatpush3.bf16.msra.mxu1 %v6798_v44  ;;  %5582 = vmatprep.mubr.msk.f32.mxu1 %vm6295_vm0, %v6296_v1 }
0x5dc2   :  { %5884 = vmatprep.subr.bf16.mxu1 %v6294_v0 }
0x5dc5   :  { %5886 = vmatpush3.bf16.msra.mxu1 %v6801_v49 }
0x5dc6   :  { %5893 = vmatprep.subr.bf16.mxu1 %v6294_v0 }
0x5e93   :  { %v4144_v47 = vpop.f32.mrb[38].mxu1 }
0x5e94   :  { %v4148_v33 = vadd.f32 %v4144_v47, %v4075_v32  ;;  %v5562_v34 = vpop.f32.mrb[39].mxu1 }
0x5e96   :  { %6194 = vtanh.f32 %v4148_v33  ;;  %v4879_v36 = vmul.f32 -1.442695, %v4148_v33 }
0x5e98   :  { %6196 = vpow2.f32 %v4879_v36 }
0x5ea0   :  { %v6195_v35 = vpop.eup %6194 }
0x5ea1   :  { %4158 = vrot.lane.b32.xlu0 %v6195_v35, %s6297_s10 }
0x5ea2   :  { %v6197_v51 = vpop.eup %6196 }
0x5ea3   :  { %v4152_v37 = vadd.f32 1.0, %v6197_v51 }
0x5ea5   :  { %6198 = vrcp.f32 %v4152_v37 }
0x5eaf   :  { %v6199_v38 = vpop.eup %6198 }
0x5eb0   :  { %v4156_v41 = vmul.f32 %v6199_v38, %v4063_v25 }
0x5f13   :  { %v4159_v39 = vpop.permute.xlu0 %4158 }
0x5f14   :  { %v4161_v40 = vmul.f32 %v6199_v38, %v4159_v39  ;;  %v4487_v39 = vld [vmem:[#allocation3 + $0xc] sm:$0x3] }
0x5f16   :  { %4163 = vrot.lane.b32.xlu1 %v4161_v40, %s6297_s10 }
0x5f88   :  { %v4164_v42 = vpop.permute.xlu1 %4163 }
0x5f89   :  { %v4166_v43 = vadd.f32 %v4164_v42, %v4156_v41 }
0x5f8b   :  { %6200 = vtanh.f32 %v4166_v43 }
0x5f95   :  { %v6201_v45 = vpop.eup %6200 }
0x5f96   :  { %4169 = vrot.lane.b32.xlu0 %v6201_v45, %s6297_s10 }
0x6008   :  { %v4170_v46 = vpop.permute.xlu0 %4169 }
0x6009   :  { %v4172_v48 = vmul.f32 %v6199_v38, %v4170_v46 }
0x600b   :  { %4174 = vrot.lane.b32.xlu1 %v4172_v48, %s6298_s11 }
0x607d   :  { %v4175_v50 = vpop.permute.xlu1 %4174 }
0x607e   :  { %4177 = vst.msk [vmem:[#allocation2 + $0x4] sm:$0x3] %vm257_vm2, %v4175_v50  ;;  %5572 = vmatmul.mubr.msk.f32.vlgmr.msra.gmra.mrb[40].mxu0 %vm154_vm3, %v4175_v50 }
0x607f   :  { %5889 = vmatpush3.bf16.msra.mxu0 %v6798_v44  ;;  %5593 = vmatprep.mubr.msk.f32.mxu0 %vm6295_vm0, %v6296_v1 }
0x6080   :  { %5890 = vmatprep.subr.bf16.mxu0 %v6294_v0 }
0x6083   :  { %5892 = vmatpush3.bf16.msra.mxu0 %v6801_v49 }
0x6084   :  { %5899 = vmatprep.subr.bf16.mxu0 %v6294_v0 }
0x6151   :  { %v4247_v3 = vpop.f32.mrb[40].mxu0 }
0x6152   :  { %v4251_v53 = vadd.f32 %v4247_v3, %v4178_v52  ;;  %v5573_v8 = vpop.f32.mrb[41].mxu0 }
0x6154   :  { %6202 = vtanh.f32 %v4251_v53  ;;  %v4881_v55 = vmul.f32 -1.442695, %v4251_v53 }
0x6156   :  { %6204 = vpow2.f32 %v4881_v55 }
0x615e   :  { %v6203_v54 = vpop.eup %6202 }
0x615f   :  { %4261 = vrot.lane.b32.xlu0 %v6203_v54, %s6297_s10 }
0x6160   :  { %v6205_v7 = vpop.eup %6204 }
0x6161   :  { %v4255_v56 = vadd.f32 1.0, %v6205_v7 }
0x6163   :  { %6206 = vrcp.f32 %v4255_v56 }
0x616d   :  { %v6207_v57 = vpop.eup %6206 }
0x616e   :  { %v4259_v59 = vmul.f32 %v6207_v57, %v4166_v43 }
0x61d1   :  { %v4262_v12 = vpop.permute.xlu0 %4261 }
0x61d2   :  { %v4264_v58 = vmul.f32 %v6207_v57, %v4262_v12  ;;  %v4590_v12 = vld [vmem:[#allocation3 + $0xe] sm:$0x3] }
0x61d4   :  { %4266 = vrot.lane.b32.xlu1 %v4264_v58, %s6297_s10 }
0x6246   :  { %v4267_v60 = vpop.permute.xlu1 %4266 }
0x6247   :  { %v4269_v61 = vadd.f32 %v4267_v60, %v4259_v59 }
0x6249   :  { %6208 = vtanh.f32 %v4269_v61 }
0x6253   :  { %v6209_v62 = vpop.eup %6208 }
0x6254   :  { %4272 = vrot.lane.b32.xlu0 %v6209_v62, %s6297_s10 }
0x62c6   :  { %v4273_v63 = vpop.permute.xlu0 %4272 }
0x62c7   :  { %v4275_v2 = vmul.f32 %v6207_v57, %v4273_v63 }
0x62c9   :  { %4277 = vrot.lane.b32.xlu1 %v4275_v2, %s6298_s11 }
0x633b   :  { %v4278_v4 = vpop.permute.xlu1 %4277 }
0x633c   :  { %4280 = vst.msk [vmem:[#allocation2 + $0x6] sm:$0x3] %vm257_vm2, %v4278_v4  ;;  %5583 = vmatmul.mubr.msk.f32.vlgmr.msra.gmra.mrb[40].mxu1 %vm154_vm3, %v4278_v4 }
0x633d   :  { %5895 = vmatpush3.bf16.msra.mxu1 %v6798_v44  ;;  %5604 = vmatprep.mubr.msk.f32.mxu1 %vm6295_vm0, %v6296_v1 }
0x633e   :  { %5896 = vmatprep.subr.bf16.mxu1 %v6294_v0 }
0x6341   :  { %5898 = vmatpush3.bf16.msra.mxu1 %v6801_v49 }
0x6343   :  { %v4693_v38 = vld [vmem:[#allocation2] sm:$0xff] }
0x640f   :  { %v4350_v6 = vpop.f32.mrb[40].mxu1 }
0x6410   :  { %v4354_v9 = vadd.f32 %v4350_v6, %v4281_v5  ;;  %v5584_v10 = vpop.f32.mrb[41].mxu1 }
0x6412   :  { %6210 = vtanh.f32 %v4354_v9  ;;  %v4883_v11 = vmul.f32 -1.442695, %v4354_v9 }
0x6414   :  { %6212 = vpow2.f32 %v4883_v11 }
0x641c   :  { %v6211_v26 = vpop.eup %6210 }
0x641d   :  { %4364 = vrot.lane.b32.xlu0 %v6211_v26, %s6297_s10 }
0x641e   :  { %v6213_v13 = vpop.eup %6212 }
0x641f   :  { %v4358_v14 = vadd.f32 1.0, %v6213_v13  ;;  %v4695_v13 = vld [vmem:[%s6928_s5] sm:$0xff] }
0x6421   :  { %6214 = vrcp.f32 %v4358_v14  ;;  %v4696_v14 = vld [vmem:[%s6928_s5 + $0x8] sm:$0xff] }
0x642b   :  { %v6215_v15 = vpop.eup %6214 }
0x642c   :  { %v4362_v17 = vmul.f32 %v6215_v15, %v4269_v61 }
0x648f   :  { %v4365_v30 = vpop.permute.xlu0 %4364 }
0x6490   :  { %v4367_v16 = vmul.f32 %v6215_v15, %v4365_v30  ;;  %v4697_v30 = vld [vmem:[%s6928_s5 + $0x10] sm:$0xff] }
0x6492   :  { %4369 = vrot.lane.b32.xlu1 %v4367_v16, %s6297_s10  ;;  %v4698_v16 = vld [vmem:[%s6928_s5 + $0x18] sm:$0xff] }
0x6504   :  { %v4370_v18 = vpop.permute.xlu1 %4369 }
0x6505   :  { %v4372_v19 = vadd.f32 %v4370_v18, %v4362_v17  ;;  %v5909_v17 = vpack.c.bf16 %v4698_v16, %v4697_v30 }
0x6507   :  { %6216 = vtanh.f32 %v4372_v19 }
0x6511   :  { %v6217_v20 = vpop.eup %6216 }
0x6512   :  { %4375 = vrot.lane.b32.xlu0 %v6217_v20, %s6297_s10 }
0x6584   :  { %v4376_v21 = vpop.permute.xlu0 %4375 }
0x6585   :  { %v4378_v22 = vmul.f32 %v6215_v15, %v4376_v21  ;;  %v5905_v15 = vpack.c.bf16 %v4696_v14, %v4695_v13 }
0x6587   :  { %4380 = vrot.lane.b32.xlu1 %v4378_v22, %s6298_s11  ;;  %5906 = vmatprep.subr.bf16.mxu1 %v5905_v15  ;;  %v4890_v22 = vld [vmem:[%s6929_s6] ss:$0 sm:$0xff] }
0x65f9   :  { %v4381_v23 = vpop.permute.xlu1 %4380 }
0x65fa   :  { %4383 = vst.msk [vmem:[#allocation2 + $0x8] sm:$0x3] %vm257_vm2, %v4381_v23  ;;  %5594 = vmatmul.mubr.msk.f32.vlgmr.msra.gmra.mrb[42].mxu0 %vm154_vm3, %v4381_v23 }
0x65fb   :  { %5901 = vmatpush3.bf16.msra.mxu0 %v6798_v44  ;;  %5615 = vmatprep.mubr.msk.f32.mxu0 %vm6295_vm0, %v6296_v1 }
0x65fc   :  { %5902 = vmatprep.subr.bf16.mxu0 %v6294_v0 }
0x65ff   :  { %5904 = vmatpush3.bf16.msra.mxu0 %v6801_v49 }
0x66cd   :  { %v4453_v25 = vpop.f32.mrb[42].mxu0 }
0x66ce   :  { %v4457_v27 = vadd.f32 %v4453_v25, %v4384_v24  ;;  %v5595_v28 = vpop.f32.mrb[43].mxu0 }
0x66d0   :  { %6218 = vtanh.f32 %v4457_v27  ;;  %v4885_v31 = vmul.f32 -1.442695, %v4457_v27 }
0x66d2   :  { %6220 = vpow2.f32 %v4885_v31 }
0x66da   :  { %v6219_v29 = vpop.eup %6218 }
0x66db   :  { %4467 = vrot.lane.b32.xlu0 %v6219_v29, %s6297_s10 }
0x66dc   :  { %v6221_v32 = vpop.eup %6220 }
0x66dd   :  { %v4461_v47 = vadd.f32 1.0, %v6221_v32 }
0x66df   :  { %6222 = vrcp.f32 %v4461_v47 }
0x66e9   :  { %v6223_v44 = vpop.eup %6222 }
0x66ea   :  { %v4465_v0 = vmul.f32 %v6223_v44, %v4372_v19 }
0x674d   :  { %v4468_v33 = vpop.permute.xlu0 %4467 }
0x674e   :  { %v4470_v1 = vmul.f32 %v6223_v44, %v4468_v33 }
0x6750   :  { %4472 = vrot.lane.b32.xlu1 %v4470_v1, %s6297_s10 }
0x67c2   :  { %v4473_v49 = vpop.permute.xlu1 %4472 }
0x67c3   :  { %v4475_v34 = vadd.f32 %v4473_v49, %v4465_v0 }
0x67c5   :  { %6224 = vtanh.f32 %v4475_v34 }
0x67cf   :  { %v6225_v35 = vpop.eup %6224 }
0x67d0   :  { %4478 = vrot.lane.b32.xlu0 %v6225_v35, %s6297_s10 }
0x6842   :  { %v4479_v36 = vpop.permute.xlu0 %4478 }
0x6843   :  { %v4481_v51 = vmul.f32 %v6223_v44, %v4479_v36 }
0x6845   :  { %4483 = vrot.lane.b32.xlu1 %v4481_v51, %s6298_s11 }
0x68b7   :  { %v4484_v37 = vpop.permute.xlu1 %4483 }
0x68b8   :  { %4486 = vst.msk [vmem:[#allocation2 + $0xa] sm:$0x3] %vm257_vm2, %v4484_v37  ;;  %5605 = vmatmul.mubr.msk.f32.vlgmr.msra.gmra.mrb[42].mxu1 %vm154_vm3, %v4484_v37 }
0x68b9   :  { %5626 = vmatprep.mubr.msk.f32.mxu1 %vm154_vm3, %v4693_v38  ;;  %5908 = vmatpush3.bf16.msra.mxu1 %v5905_v15 }
0x68ba   :  { %5910 = vmatprep.subr.bf16.mxu1 %v5909_v17 }
0x68bd   :  { %5912 = vmatpush3.bf16.msra.mxu1 %v5909_v17 }
0x698b   :  { %v4556_v40 = vpop.f32.mrb[42].mxu1 }
0x698c   :  { %v4560_v41 = vadd.f32 %v4556_v40, %v4487_v39  ;;  %v5606_v42 = vpop.f32.mrb[43].mxu1 }
0x698e   :  { %6226 = vtanh.f32 %v4560_v41  ;;  %v4887_v45 = vmul.f32 -1.442695, %v4560_v41 }
0x6990   :  { %6228 = vpow2.f32 %v4887_v45 }
0x6998   :  { %v6227_v43 = vpop.eup %6226 }
0x6999   :  { %4570 = vrot.lane.b32.xlu0 %v6227_v43, %s6297_s10 }
0x699a   :  { %v6229_v46 = vpop.eup %6228 }
0x699b   :  { %v4564_v48 = vadd.f32 1.0, %v6229_v46 }
0x699d   :  { %6230 = vrcp.f32 %v4564_v48 }
0x69a7   :  { %v6231_v50 = vpop.eup %6230 }
0x69a8   :  { %v4568_v53 = vmul.f32 %v6231_v50, %v4475_v34 }
0x6a0b   :  { %v4571_v52 = vpop.permute.xlu0 %4570 }
0x6a0c   :  { %v4573_v3 = vmul.f32 %v6231_v50, %v4571_v52 }
0x6a0e   :  { %4575 = vrot.lane.b32.xlu1 %v4573_v3, %s6297_s10 }
0x6a80   :  { %v4576_v8 = vpop.permute.xlu1 %4575 }
0x6a81   :  { %v4578_v54 = vadd.f32 %v4576_v8, %v4568_v53 }
0x6a83   :  { %6232 = vtanh.f32 %v4578_v54 }
0x6a8d   :  { %v6233_v55 = vpop.eup %6232 }
0x6a8e   :  { %4581 = vrot.lane.b32.xlu0 %v6233_v55, %s6297_s10 }
0x6b00   :  { %v4582_v7 = vpop.permute.xlu0 %4581 }
0x6b01   :  { %v4584_v56 = vmul.f32 %v6231_v50, %v4582_v7 }
0x6b03   :  { %4586 = vrot.lane.b32.xlu1 %v4584_v56, %s6298_s11 }
0x6b75   :  { %v4587_v57 = vpop.permute.xlu1 %4586 }
0x6b76   :  { %4589 = vst.msk [vmem:[#allocation2 + $0xc] sm:$0x3] %vm257_vm2, %v4587_v57  ;;  %5616 = vmatmul.mubr.msk.f32.vlgmr.msra.gmra.mrb[44].mxu0 %vm154_vm3, %v4587_v57 }
0x6c49   :  { %v4659_v58 = vpop.f32.mrb[44].mxu0 }
0x6c4a   :  { %v4663_v59 = vadd.f32 %v4659_v58, %v4590_v12  ;;  %v5617_v60 = vpop.f32.mrb[45].mxu0 }
0x6c4c   :  { %6234 = vtanh.f32 %v4663_v59  ;;  %v4889_v62 = vmul.f32 -1.442695, %v4663_v59 }
0x6c4e   :  { %6236 = vpow2.f32 %v4889_v62 }
0x6c56   :  { %v6235_v61 = vpop.eup %6234 }
0x6c57   :  { %4673 = vrot.lane.b32.xlu0 %v6235_v61, %s6297_s10 }
0x6c58   :  { %v6237_v63 = vpop.eup %6236 }
0x6c59   :  { %v4667_v2 = vadd.f32 1.0, %v6237_v63 }
0x6c5b   :  { %6238 = vrcp.f32 %v4667_v2 }
0x6c65   :  { %v6239_v4 = vpop.eup %6238 }
0x6c66   :  { %v4671_v9 = vmul.f32 %v6239_v4, %v4578_v54 }
0x6cc9   :  { %v4674_v5 = vpop.permute.xlu0 %4673 }
0x6cca   :  { %v4676_v6 = vmul.f32 %v6239_v4, %v4674_v5 }
0x6ccc   :  { %4678 = vrot.lane.b32.xlu1 %v4676_v6, %s6297_s10 }
0x6d3e   :  { %v4679_v10 = vpop.permute.xlu1 %4678 }
0x6d3f   :  { %v4681_v26 = vadd.f32 %v4679_v10, %v4671_v9 }
0x6d41   :  { %6240 = vtanh.f32 %v4681_v26 }
0x6d4b   :  { %v6241_v11 = vpop.eup %6240 }
0x6d4c   :  { %4684 = vrot.lane.b32.xlu0 %v6241_v11, %s6297_s10 }
0x6dbe   :  { %v4685_v18 = vpop.permute.xlu0 %4684 }
0x6dbf   :  { %v4687_v19 = vmul.f32 %v6239_v4, %v4685_v18 }
0x6dc1   :  { %4689 = vrot.lane.b32.xlu1 %v4687_v19, %s6298_s11 }
0x6e33   :  { %v4690_v20 = vpop.permute.xlu1 %4689 }
0x6e34   :  { %4692 = vst.msk [vmem:[#allocation2 + $0xe] sm:$0x3] %vm257_vm2, %v4690_v20 }
0x6e3b   :  { %v4694_v21 = vld [vmem:[#allocation2 + $0x8] sm:$0xff] }
0x6e3c   :  { %5627 = vmatmul.mubr.msk.f32.vlgmr.msra.gmra.mrb[44].mxu1 %vm154_vm3, %v4694_v21 }
0x6f0f   :  { %v5628_v23 = vpop.f32.mrb[44].mxu1 }
0x6f10   :  { %v4784_v24 = vadd.f32 %v5628_v23, %v4890_v22  ;;  %v4778_v25 = vpop.f32.mrb[45].mxu1 }
0x6f11   :  { %v4779_v27 = vadd.f32 %v4890_v22, %v4778_v25 }
0x6f12   :  { %4789 = vst.msk [vmem:[%s6930_s7 + $0x8] sm:$0xff] %vm4787_vm4, %v4784_v24 }
0x6f13   :  { %4788 = vst.msk [vmem:[%s6930_s7] sm:$0xff] %vm4787_vm4, %v4779_v27 }
0x6f14   :  { %4794 = vsyncpa [#allocation5], 1 }
0x6f15   :  { %4795 = vsyncpa [#allocation7], 1 }

</bundles_post_ra>
